<compile_context>
chip_gen: v7x
topology: tpu7x:2x2x1
jax: 0.10.0
libtpu: 0.0.40
codegen_flags: <defaults>
</compile_context>

<pallas_src>
import functools

import jax
import jax.numpy as jnp
from jax import lax
from jax.experimental import pallas as pl
from jax.experimental.pallas import tpu as pltpu


# bf16 operands on the MXU (f32 accumulation): ~2-3x MXU throughput on v6e/v7x,
# native on v5e, and comfortably inside the 2e-2 test tolerance.
MXU_DTYPE = jnp.bfloat16


def _phys_vmem_bytes():
    try:
        return int(pltpu.get_tpu_info().vmem_capacity_bytes)
    except Exception:
        return 64 * 1024 * 1024          # assume the smallest generation (v7x)


_PHYS_VMEM = _phys_vmem_bytes()
# Scoped-VMEM cap: generous on 128 MiB parts (v5e/v6e), conservative on v7x.
_VMEM_LIMIT = int(min(96 * 1024 * 1024, _PHYS_VMEM // 2))
# Bigger lane tiles amortise the ~0.35 us per-grid-step overhead; re-derived
# smaller on the 64 MiB-VMEM generation.
_MAX_LANE_TILE = 4096 if _PHYS_VMEM >= 96 * 1024 * 1024 else 2048


def _round_up(x, m):
    return (x + m - 1) // m * m


def _pick_lane_tile(n_pad, max_tile):
    """Largest multiple of 128 that divides n_pad, capped at max_tile."""
    t = max(128, min(n_pad, max_tile) // 128 * 128)
    while n_pad % t:
        t -= 128
    return t


# --------------------------------------------------------------------------
# Depthwise 3x3 conv (stride 1, padding 1, no bias): 9 shifted MACs in VMEM.
# Output stored in bf16 to halve its HBM traffic (it is read twice downstream).
# --------------------------------------------------------------------------
def _depthwise3x3_kernel(x_ref, w_ref, o_ref):
    C, H, W = o_ref.shape[1], o_ref.shape[2], o_ref.shape[3]
    x = x_ref[0].astype(jnp.float32)                     # (C, H+2, W+2)
    w = w_ref[...].astype(jnp.float32)                   # (C, 3, 3)
    acc = jnp.zeros((C, H, W), jnp.float32)
    for ky in range(3):                                  # statically unrolled taps
        for kx in range(3):
            tap = w[:, ky, kx][:, None, None]            # (C, 1, 1)
            acc = acc + x[:, ky:ky + H, kx:kx + W] * tap
    o_ref[0] = acc.astype(o_ref.dtype)


def depthwise_conv3x3(x, w):
    # TODO(synk): tile beyond (B,) (rows/channels) so the pipeline has more than
    # B steps, and pad in VMEM instead of this (small) HBM jnp.pad.
    B, C, H, W = x.shape
    x_pad = jnp.pad(x, ((0, 0), (0, 0), (1, 1), (1, 1)))
    return pl.pallas_call(
        _depthwise3x3_kernel,
        out_shape=jax.ShapeDtypeStruct((B, C, H, W), jnp.bfloat16),
        grid=(B,),
        in_specs=[
            pl.BlockSpec((1, C, H + 2, W + 2), lambda i: (i, 0, 0, 0)),
            pl.BlockSpec((C, 3, 3), lambda i: (0, 0, 0)),
        ],
        out_specs=pl.BlockSpec((1, C, H, W), lambda i: (i, 0, 0, 0)),
        compiler_params=pltpu.CompilerParams(
            dimension_semantics=("parallel",),
            vmem_limit_bytes=_VMEM_LIMIT),
    )(x_pad, w)


# --------------------------------------------------------------------------
# Pass A1: per-channel max of k = w_k @ dw over the pixel axis n (streamed).
# --------------------------------------------------------------------------
def _kmax_kernel(dw_ref, wk_ref, m_ref, *, n_valid, lane_tile, mask_tail,
                 mxu_dtype):
    j = pl.program_id(1)

    @pl.when(j == 0)
    def _():
        m_ref[...] = jnp.full_like(m_ref, -jnp.inf)

    x = dw_ref[0].astype(mxu_dtype)                          # (dim, tn)
    k_all = jnp.dot(wk_ref[...].astype(mxu_dtype), x,
                    preferred_element_type=jnp.float32)      # (inner, tn) f32
    if mask_tail:   # padded pixels must not enter the softmax over n (f32 mask)
        col = j * lane_tile + lax.broadcasted_iota(jnp.int32, (1, lane_tile), 1)
        k_all = jnp.where(col < n_valid, k_all, -1e30)
    m_ref[0] = jnp.maximum(m_ref[0], jnp.max(k_all, axis=1, keepdims=True))


def kmax_pass(dw_flat, w_k, *, n_valid, lane_tile):
    B, dim, Np = dw_flat.shape
    inner = w_k.shape[0]
    kern = functools.partial(_kmax_kernel, n_valid=n_valid, lane_tile=lane_tile,
                             mask_tail=(Np != n_valid), mxu_dtype=MXU_DTYPE)
    return pl.pallas_call(
        kern,
        out_shape=jax.ShapeDtypeStruct((B, inner, 1), jnp.float32),
        grid=(B, Np // lane_tile),
        in_specs=[
            pl.BlockSpec((1, dim, lane_tile), lambda i, j: (i, 0, j)),
            pl.BlockSpec((inner, dim), lambda i, j: (0, 0)),
        ],
        out_specs=pl.BlockSpec((1, inner, 1), lambda i, j: (i, 0, 0)),
        compiler_params=pltpu.CompilerParams(
            dimension_semantics=("parallel", "arbitrary"),
            vmem_limit_bytes=_VMEM_LIMIT),
    )(dw_flat, w_k)


# --------------------------------------------------------------------------
# Pass A2: streamed kv 1x1 conv + stable exp + per-head context accumulation.
#   ctxT[b, h, e, d] = sum_n v[h*D+e, n] * exp(k[h*D+d, n] - kmax[h*D+d])
#   l[b, c]          = sum_n exp(k[c, n] - kmax[c])      (softmax denominator)
# (1/l is folded into the q path in pass B, so no transposed broadcasts.)
# --------------------------------------------------------------------------
def _context_kernel(dw_ref, wk_ref, wv_ref, kmax_ref, ctx_ref, l_ref, *,
                    heads, dim_head, n_valid, lane_tile, mask_tail, mxu_dtype):
    j = pl.program_id(1)
    D = dim_head

    @pl.when(j == 0)
    def _():
        ctx_ref[...] = jnp.zeros_like(ctx_ref)
        l_ref[...] = jnp.zeros_like(l_ref)

    x = dw_ref[0].astype(mxu_dtype)                          # (dim, tn)
    k_all = jnp.dot(wk_ref[...].astype(mxu_dtype), x,
                    preferred_element_type=jnp.float32)      # (inner, tn) f32
    v_all = jnp.dot(wv_ref[...].astype(mxu_dtype), x,
                    preferred_element_type=jnp.float32)      # (inner, tn) f32

    if mask_tail:   # in-kernel padding mask (f32, pre-exp)
        col = j * lane_tile + lax.broadcasted_iota(jnp.int32, (1, lane_tile), 1)
        k_all = jnp.where(col < n_valid, k_all, -1e30)

    p = jnp.exp(k_all - kmax_ref[0])                         # (inner, tn) f32
    l_ref[0] += jnp.sum(p, axis=1, keepdims=True)

    p_m = p.astype(mxu_dtype)
    v_m = v_all.astype(mxu_dtype)
    for h in range(heads):                                   # static unroll
        sl = slice(h * D, (h + 1) * D)
        # ctxT[h][e, d] += sum_n v[e, n] * p[d, n]   (contraction on lanes)
        ctx_ref[0, h] += lax.dot_general(
            v_m[sl], p_m[sl], (((1,), (1,)), ((), ())),
            preferred_element_type=jnp.float32)


def context_pass(dw_flat, w_k, w_v, kmax, *, heads, dim_head, n_valid,
                 lane_tile):
    B, dim, Np = dw_flat.shape
    inner = heads * dim_head
    kern = functools.partial(_context_kernel, heads=heads, dim_head=dim_head,
                             n_valid=n_valid, lane_tile=lane_tile,
                             mask_tail=(Np != n_valid), mxu_dtype=MXU_DTYPE)
    return pl.pallas_call(
        kern,
        out_shape=(jax.ShapeDtypeStruct((B, heads, dim_head, dim_head),
                                        jnp.float32),
                   jax.ShapeDtypeStruct((B, inner, 1), jnp.float32)),
        grid=(B, Np // lane_tile),
        in_specs=[
            pl.BlockSpec((1, dim, lane_tile), lambda i, j: (i, 0, j)),   # dw tile
            pl.BlockSpec((inner, dim), lambda i, j: (0, 0)),             # w_k
            pl.BlockSpec((inner, dim), lambda i, j: (0, 0)),             # w_v
            pl.BlockSpec((1, inner, 1), lambda i, j: (i, 0, 0)),         # kmax
        ],
        out_specs=(pl.BlockSpec((1, heads, dim_head, dim_head),
                                lambda i, j: (i, 0, 0, 0)),
                   pl.BlockSpec((1, inner, 1), lambda i, j: (i, 0, 0))),
        compiler_params=pltpu.CompilerParams(
            dimension_semantics=("parallel", "arbitrary"),
            vmem_limit_bytes=_VMEM_LIMIT),
    )(dw_flat, w_k, w_v, kmax)


# --------------------------------------------------------------------------
# Pass B: fused q 1x1 conv + per-head q-softmax + attention matmul + GELU
#         + to_out 1x1 conv (+bias).  Both grid axes are fully parallel.
# --------------------------------------------------------------------------
def _attn_out_kernel(x_ref, wq_ref, ctx_ref, l_ref, wo_ref, bo_ref, o_ref, *,
                     heads, dim_head, scale, mxu_dtype):
    D = dim_head
    dim = o_ref.shape[1]
    tn = x_ref.shape[2]

    x = x_ref[0].astype(mxu_dtype)                           # (dim, tn)
    q_all = jnp.dot(wq_ref[...].astype(mxu_dtype), x,
                    preferred_element_type=jnp.float32)      # (inner, tn) f32
    inv_l = pl.reciprocal(l_ref[0], approx=True)             # (inner, 1) f32
    wo = wo_ref[...]                                         # (dim, inner)

    acc = jnp.zeros((dim, tn), jnp.float32)
    for h in range(heads):                                   # static unroll
        sl = slice(h * D, (h + 1) * D)
        q_h = q_all[sl]                                      # (D, tn)
        # softmax over the per-head channel axis (sublanes), per pixel
        q_max = jnp.max(q_h, axis=0, keepdims=True)
        q_exp = jnp.exp(q_h - q_max)
        q_sum = jnp.sum(q_exp, axis=0, keepdims=True)
        q_sm = q_exp * pl.reciprocal(q_sum, approx=True)
        # fold the k-softmax denominator (1/l) and the scale into q
        q_w = (q_sm * inv_l[sl] * scale).astype(mxu_dtype)   # (D, tn)
        # out_h[e, n] = sum_d ctxT[e, d] * q_w[d, n]
        out_h = jnp.dot(ctx_ref[0, h].astype(mxu_dtype), q_w,
                        preferred_element_type=jnp.float32)  # (D, tn) f32
        # fused GELU (tanh approximation)
        g = 0.5 * out_h * (1.0 + jnp.tanh(
            0.7978845608028654 * (out_h + 0.044715 * out_h * out_h * out_h)))
        # fused to_out 1x1 conv, accumulated per head
        acc += jnp.dot(wo[:, sl].astype(mxu_dtype), g.astype(mxu_dtype),
                       preferred_element_type=jnp.float32)
    o_ref[0] = (acc + bo_ref[...].astype(jnp.float32)).astype(o_ref.dtype)


def attention_out_pass(fmap_flat, wq, ctx, l_sum, wo, bo, *, heads, dim_head,
                       scale, lane_tile):
    B, dim, Np = fmap_flat.shape
    inner = heads * dim_head
    bo2 = bo.reshape(dim, 1).astype(jnp.float32)
    kern = functools.partial(_attn_out_kernel, heads=heads, dim_head=dim_head,
                             scale=scale, mxu_dtype=MXU_DTYPE)
    return pl.pallas_call(
        kern,
        out_shape=jax.ShapeDtypeStruct((B, dim, Np), jnp.float32),
        grid=(B, Np // lane_tile),
        in_specs=[
            pl.BlockSpec((1, dim, lane_tile), lambda i, j: (i, 0, j)),   # fmap tile
            pl.BlockSpec((inner, dim), lambda i, j: (0, 0)),             # wq
            pl.BlockSpec((1, heads, dim_head, dim_head),
                         lambda i, j: (i, 0, 0, 0)),                     # contextT
            pl.BlockSpec((1, inner, 1), lambda i, j: (i, 0, 0)),         # l (denom)
            pl.BlockSpec((dim, inner), lambda i, j: (0, 0)),             # wo
            pl.BlockSpec((dim, 1), lambda i, j: (0, 0)),                 # bias
        ],
        out_specs=pl.BlockSpec((1, dim, lane_tile), lambda i, j: (i, 0, j)),
        compiler_params=pltpu.CompilerParams(
            dimension_semantics=("parallel", "parallel"),
            vmem_limit_bytes=_VMEM_LIMIT),
    )(fmap_flat, wq, ctx, l_sum, wo, bo2)


# --------------------------------------------------------------------------
# Full forward pass (mirrors LinearAttention.forward).
# --------------------------------------------------------------------------
def linear_attention_forward(fmap, params, *, heads, dim_head):
    b, dim, H, W = fmap.shape
    inner = heads * dim_head
    n = H * W
    n_pad = _round_up(n, 128)           # lane-dense (multiple of 128) pixel axis
    lane_tile = _pick_lane_tile(n_pad, _MAX_LANE_TILE)
    scale = float(dim_head) ** -0.5

    # to_kv stage 1: depthwise 3x3 conv (spatial layout, bf16 output)
    dw = depthwise_conv3x3(fmap, params["w_dw"])             # (b, dim, H, W)

    # flatten pixels onto the lane axis; zero-pad to a multiple of 128
    fmap_flat = fmap.reshape(b, dim, n)
    dw_flat = dw.reshape(b, dim, n)
    if n_pad != n:
        pad = ((0, 0), (0, 0), (0, n_pad - n))
        fmap_flat = jnp.pad(fmap_flat, pad)
        dw_flat = jnp.pad(dw_flat, pad)

    w_k = params["w_kv"][:inner]
    w_v = params["w_kv"][inner:]

    # pass A1/A2: streamed kv 1x1 conv + stable softmax(n) + context matmul
    kmax = kmax_pass(dw_flat, w_k, n_valid=n, lane_tile=lane_tile)
    ctx, l_sum = context_pass(dw_flat, w_k, w_v, kmax, heads=heads,
                              dim_head=dim_head, n_valid=n,
                              lane_tile=lane_tile)

    # pass B: streamed q 1x1 conv + q-softmax + attention + GELU + to_out conv
    out = attention_out_pass(fmap_flat, params["wq"], ctx, l_sum,
                             params["wo"], params["bo"], heads=heads,
                             dim_head=dim_head, scale=scale,
                             lane_tile=lane_tile)            # (b, dim, n_pad)
    return out[:, :, :n].reshape(b, dim, H, W)


# ---------------- pure-JAX reference (mirrors the PyTorch forward) ----------
def ref_linear_attention(fmap, params, *, heads, dim_head):
    b, dim, H, W = fmap.shape
    inner = heads * dim_head
    n = H * W
    scale = float(dim_head) ** -0.5
    hp = jax.lax.Precision.HIGHEST

    q = jnp.einsum("oc,bchw->bohw", params["wq"], fmap, precision=hp)
    dw = lax.conv_general_dilated(
        fmap, params["w_dw"][:, None, :, :], (1, 1), [(1, 1), (1, 1)],
        dimension_numbers=("NCHW", "OIHW", "NCHW"),
        feature_group_count=dim, precision=hp)
    kv = jnp.einsum("oc,bchw->bohw", params["w_kv"], dw, precision=hp)
    k, v = kv[:, :inner], kv[:, inner:]

    def to_bh(t):   # 'b (h c) x y -> (b h) (x y) c'
        return t.reshape(b * heads, dim_head, n).transpose(0, 2, 1)

    q, k, v = map(to_bh, (q, k, v))
    q = jax.nn.softmax(q, axis=-1)
    k = jax.nn.softmax(k, axis=-2)
    q = q * scale
    context = jnp.einsum("bnd,bne->bde", k, v, precision=hp)
    out = jnp.einsum("bnd,bde->bne", q, context, precision=hp)
    out = out.transpose(0, 2, 1).reshape(b, inner, H, W)
    out = jax.nn.gelu(out, approximate=False)              # torch nn.GELU (exact)
    out = jnp.einsum("oc,bchw->bohw", params["wo"], out, precision=hp)
    return out + params["bo"][None, :, None, None]


if __name__ == "__main__":
    key = jax.random.PRNGKey(0)
    kf, kq, kd, kkv, ko, kb = jax.random.split(key, 6)

    b, dim, H, W = 2, 8, 16, 16
    heads, dim_head = 4, 16
    inner = heads * dim_head

    fmap = jax.random.normal(kf, (b, dim, H, W), dtype=jnp.float32)
    params = {
        "wq":   jax.random.normal(kq, (inner, dim), jnp.float32) * (dim ** -0.5),
        "w_dw": jax.random.normal(kd, (dim, 3, 3), jnp.float32) * (1.0 / 3.0),
        "w_kv": jax.random.normal(kkv, (2 * inner, dim), jnp.float32) * (dim ** -0.5),
        "wo":   jax.random.normal(ko, (dim, inner), jnp.float32) * (inner ** -0.5),
        "bo":   jax.random.normal(kb, (dim,), jnp.float32) * 0.1,
    }

    fwd = jax.jit(functools.partial(linear_attention_forward,
                                    heads=heads, dim_head=dim_head))
    out = jax.block_until_ready(fwd(fmap, params))

    ref = ref_linear_attention(fmap, params, heads=heads, dim_head=dim_head)
    assert out.shape == (b, dim, H, W)
    err = float(jnp.max(jnp.abs(out - ref)))
    assert jnp.allclose(out, ref, atol=2e-2, rtol=2e-2), f"mismatch vs reference: {err}"

    print("KERNEL_OK")
</pallas_src>

<mosaic_0001>
module attributes {stable_mosaic.version = 11 : i64} {
  func.func @_context_kernel(%arg0: i32, %arg1: i32, %arg2: memref<1x8x256xbf16, #tpu.memory_space<vmem>>, %arg3: memref<64x8xf32, #tpu.memory_space<vmem>>, %arg4: memref<64x8xf32, #tpu.memory_space<vmem>>, %arg5: memref<1x64x1xf32, #tpu.memory_space<vmem>>, %arg6: memref<1x4x16x16xf32, #tpu.memory_space<vmem>>, %arg7: memref<1x64x1xf32, #tpu.memory_space<vmem>>) attributes {dimension_semantics = [#tpu.dimension_semantics<parallel>, #tpu.dimension_semantics<arbitrary>], iteration_bounds = array<i64: 2, 1>, scalar_prefetch = 0 : i64, scratch_operands = 0 : i64, tpu.core_type = #tpu.core_type<tc>, window_params = [{transform_indices = @transform_0, window_bounds = array<i64: 1, 8, 256>}, {pipeline_mode = #tpu.pipeline_mode<synchronous>, transform_indices = @transform_1, window_bounds = array<i64: 64, 8>}, {pipeline_mode = #tpu.pipeline_mode<synchronous>, transform_indices = @transform_2, window_bounds = array<i64: 64, 8>}, {transform_indices = @transform_3, window_bounds = array<i64: 1, 64, 1>}, {transform_indices = @transform_4, window_bounds = array<i64: 1, 4, 16, 16>}, {transform_indices = @transform_5, window_bounds = array<i64: 1, 64, 1>}]} {
    %c0_i32 = arith.constant 0 : i32
    %0 = arith.cmpi eq, %arg1, %c0_i32 : i32
    %1 = arith.extui %0 : i1 to i32
    %c0_i32_0 = arith.constant 0 : i32
    %2 = arith.cmpi ne, %1, %c0_i32_0 : i32
    scf.if %2 {
      %cst_51 = arith.constant 0.000000e+00 : f32
      %62 = vector.broadcast %cst_51 : f32 to vector<1x4x16x16xf32>
      %c0_52 = arith.constant 0 : index
      %c0_53 = arith.constant 0 : index
      %c0_54 = arith.constant 0 : index
      %c0_55 = arith.constant 0 : index
      %63 = vector.load %arg6[%c0_52, %c0_53, %c0_54, %c0_55] : memref<1x4x16x16xf32, #tpu.memory_space<vmem>>, vector<1x4x16x16xf32>
      tpu.vector_store %arg6[%c0_52, %c0_53, %c0_54, %c0_55], %62 {strides = array<i32>} : memref<1x4x16x16xf32, #tpu.memory_space<vmem>>, vector<1x4x16x16xf32>,
      %cst_56 = arith.constant 0.000000e+00 : f32
      %64 = vector.broadcast %cst_56 : f32 to vector<1x64x1xf32>
      %c0_57 = arith.constant 0 : index
      %c0_58 = arith.constant 0 : index
      %c0_59 = arith.constant 0 : index
      %65 = vector.load %arg7[%c0_57, %c0_58, %c0_59] : memref<1x64x1xf32, #tpu.memory_space<vmem>>, vector<1x64x1xf32>
      tpu.vector_store %arg7[%c0_57, %c0_58, %c0_59], %64 {strides = array<i32>} : memref<1x64x1xf32, #tpu.memory_space<vmem>>, vector<1x64x1xf32>,
    } else {
    }
    %c0 = arith.constant 0 : index
    %c0_1 = arith.constant 0 : index
    %c0_2 = arith.constant 0 : index
    %3 = vector.load %arg2[%c0, %c0_1, %c0_2] : memref<1x8x256xbf16, #tpu.memory_space<vmem>>, vector<1x8x256xbf16>
    %4 = vector.shape_cast %3 : vector<1x8x256xbf16> to vector<8x256xbf16>
    %c0_3 = arith.constant 0 : index
    %c0_4 = arith.constant 0 : index
    %5 = vector.load %arg3[%c0_3, %c0_4] : memref<64x8xf32, #tpu.memory_space<vmem>>, vector<64x8xf32>
    %6 = arith.truncf %5 : vector<64x8xf32> to vector<64x8xbf16>
    %cst = arith.constant dense<0.000000e+00> : vector<64x256xf32>
    %7 = tpu.matmul %6, %4, %cst {dimension_numbers = #tpu.dot_dimension_numbers<[1], [0], [0], [1], [0, 0, 1, 1], [], []>} : vector<64x8xbf16>, vector<8x256xbf16>, vector<64x256xf32> -> vector<64x256xf32>
    %c0_5 = arith.constant 0 : index
    %c0_6 = arith.constant 0 : index
    %8 = vector.load %arg4[%c0_5, %c0_6] : memref<64x8xf32, #tpu.memory_space<vmem>>, vector<64x8xf32>
    %9 = arith.truncf %8 : vector<64x8xf32> to vector<64x8xbf16>
    %cst_7 = arith.constant dense<0.000000e+00> : vector<64x256xf32>
    %10 = tpu.matmul %9, %4, %cst_7 {dimension_numbers = #tpu.dot_dimension_numbers<[1], [0], [0], [1], [0, 0, 1, 1], [], []>} : vector<64x8xbf16>, vector<8x256xbf16>, vector<64x256xf32> -> vector<64x256xf32>
    %c0_8 = arith.constant 0 : index
    %c0_9 = arith.constant 0 : index
    %c0_10 = arith.constant 0 : index
    %11 = vector.load %arg5[%c0_8, %c0_9, %c0_10] : memref<1x64x1xf32, #tpu.memory_space<vmem>>, vector<1x64x1xf32>
    %12 = vector.shape_cast %11 : vector<1x64x1xf32> to vector<64x1xf32>
    %13 = vector.broadcast %12 : vector<64x1xf32> to vector<64x256xf32>
    %14 = arith.subf %7, %13 : vector<64x256xf32>
    %15 = math.exp %14 : vector<64x256xf32>
    %c0_11 = arith.constant 0 : index
    %c0_12 = arith.constant 0 : index
    %c0_13 = arith.constant 0 : index
    %16 = vector.load %arg7[%c0_11, %c0_12, %c0_13] : memref<1x64x1xf32, #tpu.memory_space<vmem>>, vector<1x64x1xf32>
    %17 = vector.shape_cast %16 : vector<1x64x1xf32> to vector<64x1xf32>
    %cst_14 = arith.constant dense<0.000000e+00> : vector<64xf32>
    %18 = vector.multi_reduction <add>, %15, %cst_14 [1] : vector<64x256xf32> to vector<64xf32>
    %19 = vector.shape_cast %18 : vector<64xf32> to vector<64x1xf32>
    %20 = arith.addf %17, %19 : vector<64x1xf32>
    %c0_15 = arith.constant 0 : index
    %c0_16 = arith.constant 0 : index
    %c0_17 = arith.constant 0 : index
    %21 = vector.load %arg7[%c0_15, %c0_16, %c0_17] : memref<1x64x1xf32, #tpu.memory_space<vmem>>, vector<1x64x1xf32>
    %22 = vector.shape_cast %21 : vector<1x64x1xf32> to vector<64x1xf32>
    %23 = vector.shape_cast %20 : vector<64x1xf32> to vector<1x64x1xf32>
    tpu.vector_store %arg7[%c0_15, %c0_16, %c0_17], %23 {strides = array<i32>} : memref<1x64x1xf32, #tpu.memory_space<vmem>>, vector<1x64x1xf32>,
    %24 = arith.truncf %15 : vector<64x256xf32> to vector<64x256xbf16>
    %25 = arith.truncf %10 : vector<64x256xf32> to vector<64x256xbf16>
    %c0_18 = arith.constant 0 : index
    %c0_19 = arith.constant 0 : index
    %c0_20 = arith.constant 0 : index
    %c0_21 = arith.constant 0 : index
    %26 = vector.load %arg6[%c0_18, %c0_19, %c0_20, %c0_21] : memref<1x4x16x16xf32, #tpu.memory_space<vmem>>, vector<1x1x16x16xf32>
    %27 = vector.shape_cast %26 : vector<1x1x16x16xf32> to vector<16x16xf32>
    %28 = vector.extract_strided_slice %25 {offsets = [0, 0], sizes = [16, 256], strides = [1, 1]} : vector<64x256xbf16> to vector<16x256xbf16>
    %29 = vector.extract_strided_slice %24 {offsets = [0, 0], sizes = [16, 256], strides = [1, 1]} : vector<64x256xbf16> to vector<16x256xbf16>
    %cst_22 = arith.constant dense<0.000000e+00> : vector<16x16xf32>
    %30 = tpu.matmul %28, %29, %cst_22 {dimension_numbers = #tpu.dot_dimension_numbers<[1], [1], [0], [0], [0, 0, 1, 0], [], []>} : vector<16x256xbf16>, vector<16x256xbf16>, vector<16x16xf32> -> vector<16x16xf32>
    %31 = arith.addf %27, %30 : vector<16x16xf32>
    %c0_23 = arith.constant 0 : index
    %c0_24 = arith.constant 0 : index
    %c0_25 = arith.constant 0 : index
    %c0_26 = arith.constant 0 : index
    %32 = vector.load %arg6[%c0_23, %c0_24, %c0_25, %c0_26] : memref<1x4x16x16xf32, #tpu.memory_space<vmem>>, vector<1x1x16x16xf32>
    %33 = vector.shape_cast %32 : vector<1x1x16x16xf32> to vector<16x16xf32>
    %34 = vector.shape_cast %31 : vector<16x16xf32> to vector<1x1x16x16xf32>
    tpu.vector_store %arg6[%c0_23, %c0_24, %c0_25, %c0_26], %34 {strides = array<i32>} : memref<1x4x16x16xf32, #tpu.memory_space<vmem>>, vector<1x1x16x16xf32>,
    %c0_27 = arith.constant 0 : index
    %c1 = arith.constant 1 : index
    %c0_28 = arith.constant 0 : index
    %c0_29 = arith.constant 0 : index
    %35 = vector.load %arg6[%c0_27, %c1, %c0_28, %c0_29] : memref<1x4x16x16xf32, #tpu.memory_space<vmem>>, vector<1x1x16x16xf32>
    %36 = vector.shape_cast %35 : vector<1x1x16x16xf32> to vector<16x16xf32>
    %37 = vector.extract_strided_slice %25 {offsets = [16, 0], sizes = [16, 256], strides = [1, 1]} : vector<64x256xbf16> to vector<16x256xbf16>
    %38 = vector.extract_strided_slice %24 {offsets = [16, 0], sizes = [16, 256], strides = [1, 1]} : vector<64x256xbf16> to vector<16x256xbf16>
    %cst_30 = arith.constant dense<0.000000e+00> : vector<16x16xf32>
    %39 = tpu.matmul %37, %38, %cst_30 {dimension_numbers = #tpu.dot_dimension_numbers<[1], [1], [0], [0], [0, 0, 1, 0], [], []>} : vector<16x256xbf16>, vector<16x256xbf16>, vector<16x16xf32> -> vector<16x16xf32>
    %40 = arith.addf %36, %39 : vector<16x16xf32>
    %c0_31 = arith.constant 0 : index
    %c1_32 = arith.constant 1 : index
    %c0_33 = arith.constant 0 : index
    %c0_34 = arith.constant 0 : index
    %41 = vector.load %arg6[%c0_31, %c1_32, %c0_33, %c0_34] : memref<1x4x16x16xf32, #tpu.memory_space<vmem>>, vector<1x1x16x16xf32>
    %42 = vector.shape_cast %41 : vector<1x1x16x16xf32> to vector<16x16xf32>
    %43 = vector.shape_cast %40 : vector<16x16xf32> to vector<1x1x16x16xf32>
    tpu.vector_store %arg6[%c0_31, %c1_32, %c0_33, %c0_34], %43 {strides = array<i32>} : memref<1x4x16x16xf32, #tpu.memory_space<vmem>>, vector<1x1x16x16xf32>,
    %c0_35 = arith.constant 0 : index
    %c2 = arith.constant 2 : index
    %c0_36 = arith.constant 0 : index
    %c0_37 = arith.constant 0 : index
    %44 = vector.load %arg6[%c0_35, %c2, %c0_36, %c0_37] : memref<1x4x16x16xf32, #tpu.memory_space<vmem>>, vector<1x1x16x16xf32>
    %45 = vector.shape_cast %44 : vector<1x1x16x16xf32> to vector<16x16xf32>
    %46 = vector.extract_strided_slice %25 {offsets = [32, 0], sizes = [16, 256], strides = [1, 1]} : vector<64x256xbf16> to vector<16x256xbf16>
    %47 = vector.extract_strided_slice %24 {offsets = [32, 0], sizes = [16, 256], strides = [1, 1]} : vector<64x256xbf16> to vector<16x256xbf16>
    %cst_38 = arith.constant dense<0.000000e+00> : vector<16x16xf32>
    %48 = tpu.matmul %46, %47, %cst_38 {dimension_numbers = #tpu.dot_dimension_numbers<[1], [1], [0], [0], [0, 0, 1, 0], [], []>} : vector<16x256xbf16>, vector<16x256xbf16>, vector<16x16xf32> -> vector<16x16xf32>
    %49 = arith.addf %45, %48 : vector<16x16xf32>
    %c0_39 = arith.constant 0 : index
    %c2_40 = arith.constant 2 : index
    %c0_41 = arith.constant 0 : index
    %c0_42 = arith.constant 0 : index
    %50 = vector.load %arg6[%c0_39, %c2_40, %c0_41, %c0_42] : memref<1x4x16x16xf32, #tpu.memory_space<vmem>>, vector<1x1x16x16xf32>
    %51 = vector.shape_cast %50 : vector<1x1x16x16xf32> to vector<16x16xf32>
    %52 = vector.shape_cast %49 : vector<16x16xf32> to vector<1x1x16x16xf32>
    tpu.vector_store %arg6[%c0_39, %c2_40, %c0_41, %c0_42], %52 {strides = array<i32>} : memref<1x4x16x16xf32, #tpu.memory_space<vmem>>, vector<1x1x16x16xf32>,
    %c0_43 = arith.constant 0 : index
    %c3 = arith.constant 3 : index
    %c0_44 = arith.constant 0 : index
    %c0_45 = arith.constant 0 : index
    %53 = vector.load %arg6[%c0_43, %c3, %c0_44, %c0_45] : memref<1x4x16x16xf32, #tpu.memory_space<vmem>>, vector<1x1x16x16xf32>
    %54 = vector.shape_cast %53 : vector<1x1x16x16xf32> to vector<16x16xf32>
    %55 = vector.extract_strided_slice %25 {offsets = [48, 0], sizes = [16, 256], strides = [1, 1]} : vector<64x256xbf16> to vector<16x256xbf16>
    %56 = vector.extract_strided_slice %24 {offsets = [48, 0], sizes = [16, 256], strides = [1, 1]} : vector<64x256xbf16> to vector<16x256xbf16>
    %cst_46 = arith.constant dense<0.000000e+00> : vector<16x16xf32>
    %57 = tpu.matmul %55, %56, %cst_46 {dimension_numbers = #tpu.dot_dimension_numbers<[1], [1], [0], [0], [0, 0, 1, 0], [], []>} : vector<16x256xbf16>, vector<16x256xbf16>, vector<16x16xf32> -> vector<16x16xf32>
    %58 = arith.addf %54, %57 : vector<16x16xf32>
    %c0_47 = arith.constant 0 : index
    %c3_48 = arith.constant 3 : index
    %c0_49 = arith.constant 0 : index
    %c0_50 = arith.constant 0 : index
    %59 = vector.load %arg6[%c0_47, %c3_48, %c0_49, %c0_50] : memref<1x4x16x16xf32, #tpu.memory_space<vmem>>, vector<1x1x16x16xf32>
    %60 = vector.shape_cast %59 : vector<1x1x16x16xf32> to vector<16x16xf32>
    %61 = vector.shape_cast %58 : vector<16x16xf32> to vector<1x1x16x16xf32>
    tpu.vector_store %arg6[%c0_47, %c3_48, %c0_49, %c0_50], %61 {strides = array<i32>} : memref<1x4x16x16xf32, #tpu.memory_space<vmem>>, vector<1x1x16x16xf32>,
    return
  }
  func.func @transform_0(%arg0: i32, %arg1: i32) -> (i32, i32, i32) {
    %c0_i32 = arith.constant 0 : i32
    %c0_i32_0 = arith.constant 0 : i32
    return %arg0, %c0_i32, %arg1 : i32, i32, i32
  }
  func.func @transform_1(%arg0: i32, %arg1: i32) -> (i32, i32) {
    %c0_i32 = arith.constant 0 : i32
    %c0_i32_0 = arith.constant 0 : i32
    %c0_i32_1 = arith.constant 0 : i32
    return %c0_i32, %c0_i32_0 : i32, i32
  }
  func.func @transform_2(%arg0: i32, %arg1: i32) -> (i32, i32) {
    %c0_i32 = arith.constant 0 : i32
    %c0_i32_0 = arith.constant 0 : i32
    %c0_i32_1 = arith.constant 0 : i32
    return %c0_i32, %c0_i32_0 : i32, i32
  }
  func.func @transform_3(%arg0: i32, %arg1: i32) -> (i32, i32, i32) {
    %c0_i32 = arith.constant 0 : i32
    %c0_i32_0 = arith.constant 0 : i32
    %c0_i32_1 = arith.constant 0 : i32
    return %arg0, %c0_i32, %c0_i32_0 : i32, i32, i32
  }
  func.func @transform_4(%arg0: i32, %arg1: i32) -> (i32, i32, i32, i32) {
    %c0_i32 = arith.constant 0 : i32
    %c0_i32_0 = arith.constant 0 : i32
    %c0_i32_1 = arith.constant 0 : i32
    %c0_i32_2 = arith.constant 0 : i32
    return %arg0, %c0_i32, %c0_i32_0, %c0_i32_1 : i32, i32, i32, i32
  }
  func.func @transform_5(%arg0: i32, %arg1: i32) -> (i32, i32, i32) {
    %c0_i32 = arith.constant 0 : i32
    %c0_i32_0 = arith.constant 0 : i32
    %c0_i32_1 = arith.constant 0 : i32
    return %arg0, %c0_i32, %c0_i32_0 : i32, i32, i32
  }
}

module attributes {stable_mosaic.version = 11 : i64} {
  func.func @_kmax_kernel(%arg0: i32, %arg1: i32, %arg2: memref<1x8x256xbf16, #tpu.memory_space<vmem>>, %arg3: memref<64x8xf32, #tpu.memory_space<vmem>>, %arg4: memref<1x64x1xf32, #tpu.memory_space<vmem>>) attributes {dimension_semantics = [#tpu.dimension_semantics<parallel>, #tpu.dimension_semantics<arbitrary>], iteration_bounds = array<i64: 2, 1>, scalar_prefetch = 0 : i64, scratch_operands = 0 : i64, tpu.core_type = #tpu.core_type<tc>, window_params = [{transform_indices = @transform_0, window_bounds = array<i64: 1, 8, 256>}, {pipeline_mode = #tpu.pipeline_mode<synchronous>, transform_indices = @transform_1, window_bounds = array<i64: 64, 8>}, {transform_indices = @transform_2, window_bounds = array<i64: 1, 64, 1>}]} {
    %c0_i32 = arith.constant 0 : i32
    %0 = arith.cmpi eq, %arg1, %c0_i32 : i32
    %1 = arith.extui %0 : i1 to i32
    %c0_i32_0 = arith.constant 0 : i32
    %2 = arith.cmpi ne, %1, %c0_i32_0 : i32
    scf.if %2 {
      %cst_12 = arith.constant 0xFF800000 : f32
      %16 = vector.broadcast %cst_12 : f32 to vector<1x64x1xf32>
      %c0_13 = arith.constant 0 : index
      %c0_14 = arith.constant 0 : index
      %c0_15 = arith.constant 0 : index
      %17 = vector.load %arg4[%c0_13, %c0_14, %c0_15] : memref<1x64x1xf32, #tpu.memory_space<vmem>>, vector<1x64x1xf32>
      tpu.vector_store %arg4[%c0_13, %c0_14, %c0_15], %16 {strides = array<i32>} : memref<1x64x1xf32, #tpu.memory_space<vmem>>, vector<1x64x1xf32>,
    } else {
    }
    %c0 = arith.constant 0 : index
    %c0_1 = arith.constant 0 : index
    %c0_2 = arith.constant 0 : index
    %3 = vector.load %arg2[%c0, %c0_1, %c0_2] : memref<1x8x256xbf16, #tpu.memory_space<vmem>>, vector<1x8x256xbf16>
    %4 = vector.shape_cast %3 : vector<1x8x256xbf16> to vector<8x256xbf16>
    %c0_3 = arith.constant 0 : index
    %c0_4 = arith.constant 0 : index
    %5 = vector.load %arg3[%c0_3, %c0_4] : memref<64x8xf32, #tpu.memory_space<vmem>>, vector<64x8xf32>
    %6 = arith.truncf %5 : vector<64x8xf32> to vector<64x8xbf16>
    %cst = arith.constant dense<0.000000e+00> : vector<64x256xf32>
    %7 = tpu.matmul %6, %4, %cst {dimension_numbers = #tpu.dot_dimension_numbers<[1], [0], [0], [1], [0, 0, 1, 1], [], []>} : vector<64x8xbf16>, vector<8x256xbf16>, vector<64x256xf32> -> vector<64x256xf32>
    %c0_5 = arith.constant 0 : index
    %c0_6 = arith.constant 0 : index
    %c0_7 = arith.constant 0 : index
    %8 = vector.load %arg4[%c0_5, %c0_6, %c0_7] : memref<1x64x1xf32, #tpu.memory_space<vmem>>, vector<1x64x1xf32>
    %9 = vector.shape_cast %8 : vector<1x64x1xf32> to vector<64x1xf32>
    %cst_8 = arith.constant dense<0xFF800000> : vector<64xf32>
    %10 = vector.multi_reduction <maximumf>, %7, %cst_8 [1] : vector<64x256xf32> to vector<64xf32>
    %11 = vector.shape_cast %10 : vector<64xf32> to vector<64x1xf32>
    %12 = arith.maximumf %9, %11 : vector<64x1xf32>
    %c0_9 = arith.constant 0 : index
    %c0_10 = arith.constant 0 : index
    %c0_11 = arith.constant 0 : index
    %13 = vector.load %arg4[%c0_9, %c0_10, %c0_11] : memref<1x64x1xf32, #tpu.memory_space<vmem>>, vector<1x64x1xf32>
    %14 = vector.shape_cast %13 : vector<1x64x1xf32> to vector<64x1xf32>
    %15 = vector.shape_cast %12 : vector<64x1xf32> to vector<1x64x1xf32>
    tpu.vector_store %arg4[%c0_9, %c0_10, %c0_11], %15 {strides = array<i32>} : memref<1x64x1xf32, #tpu.memory_space<vmem>>, vector<1x64x1xf32>,
    return
  }
  func.func @transform_0(%arg0: i32, %arg1: i32) -> (i32, i32, i32) {
    %c0_i32 = arith.constant 0 : i32
    %c0_i32_0 = arith.constant 0 : i32
    return %arg0, %c0_i32, %arg1 : i32, i32, i32
  }
  func.func @transform_1(%arg0: i32, %arg1: i32) -> (i32, i32) {
    %c0_i32 = arith.constant 0 : i32
    %c0_i32_0 = arith.constant 0 : i32
    %c0_i32_1 = arith.constant 0 : i32
    return %c0_i32, %c0_i32_0 : i32, i32
  }
  func.func @transform_2(%arg0: i32, %arg1: i32) -> (i32, i32, i32) {
    %c0_i32 = arith.constant 0 : i32
    %c0_i32_0 = arith.constant 0 : i32
    %c0_i32_1 = arith.constant 0 : i32
    return %arg0, %c0_i32, %c0_i32_0 : i32, i32, i32
  }
}

module attributes {stable_mosaic.version = 11 : i64} {
  func.func @_depthwise3x3_kernel(%arg0: i32, %arg1: memref<1x8x18x18xf32, #tpu.memory_space<vmem>>, %arg2: memref<8x3x3xf32, #tpu.memory_space<vmem>>, %arg3: memref<1x8x16x16xbf16, #tpu.memory_space<vmem>>) attributes {dimension_semantics = [#tpu.dimension_semantics<parallel>], iteration_bounds = array<i64: 2>, scalar_prefetch = 0 : i64, scratch_operands = 0 : i64, tpu.core_type = #tpu.core_type<tc>, window_params = [{transform_indices = @transform_0, window_bounds = array<i64: 1, 8, 18, 18>}, {pipeline_mode = #tpu.pipeline_mode<synchronous>, transform_indices = @transform_1, window_bounds = array<i64: 8, 3, 3>}, {transform_indices = @transform_2, window_bounds = array<i64: 1, 8, 16, 16>}]} {
    %c0 = arith.constant 0 : index
    %c0_0 = arith.constant 0 : index
    %c0_1 = arith.constant 0 : index
    %c0_2 = arith.constant 0 : index
    %0 = vector.load %arg1[%c0, %c0_0, %c0_1, %c0_2] : memref<1x8x18x18xf32, #tpu.memory_space<vmem>>, vector<1x8x18x18xf32>
    %1 = vector.shape_cast %0 : vector<1x8x18x18xf32> to vector<8x18x18xf32>
    %c0_3 = arith.constant 0 : index
    %c0_4 = arith.constant 0 : index
    %c0_5 = arith.constant 0 : index
    %2 = vector.load %arg2[%c0_3, %c0_4, %c0_5] : memref<8x3x3xf32, #tpu.memory_space<vmem>>, vector<8x3x3xf32>
    %cst = arith.constant 0.000000e+00 : f32
    %3 = vector.broadcast %cst : f32 to vector<8x16x16xf32>
    %4 = vector.extract_strided_slice %2 {offsets = [0, 0, 0], sizes = [8, 1, 1], strides = [1, 1, 1]} : vector<8x3x3xf32> to vector<8x1x1xf32>
    %5 = vector.shape_cast %4 : vector<8x1x1xf32> to vector<8xf32>
    %6 = vector.shape_cast %5 : vector<8xf32> to vector<8x1x1xf32>
    %7 = vector.extract_strided_slice %1 {offsets = [0, 0, 0], sizes = [8, 16, 16], strides = [1, 1, 1]} : vector<8x18x18xf32> to vector<8x16x16xf32>
    %8 = vector.broadcast %6 : vector<8x1x1xf32> to vector<8x16x16xf32>
    %9 = arith.mulf %7, %8 : vector<8x16x16xf32>
    %10 = arith.addf %3, %9 : vector<8x16x16xf32>
    %11 = vector.extract_strided_slice %2 {offsets = [0, 0, 1], sizes = [8, 1, 1], strides = [1, 1, 1]} : vector<8x3x3xf32> to vector<8x1x1xf32>
    %12 = vector.shape_cast %11 : vector<8x1x1xf32> to vector<8xf32>
    %13 = vector.shape_cast %12 : vector<8xf32> to vector<8x1x1xf32>
    %14 = vector.extract_strided_slice %1 {offsets = [0, 0, 1], sizes = [8, 16, 16], strides = [1, 1, 1]} : vector<8x18x18xf32> to vector<8x16x16xf32>
    %15 = vector.broadcast %13 : vector<8x1x1xf32> to vector<8x16x16xf32>
    %16 = arith.mulf %14, %15 : vector<8x16x16xf32>
    %17 = arith.addf %10, %16 : vector<8x16x16xf32>
    %18 = vector.extract_strided_slice %2 {offsets = [0, 0, 2], sizes = [8, 1, 1], strides = [1, 1, 1]} : vector<8x3x3xf32> to vector<8x1x1xf32>
    %19 = vector.shape_cast %18 : vector<8x1x1xf32> to vector<8xf32>
    %20 = vector.shape_cast %19 : vector<8xf32> to vector<8x1x1xf32>
    %21 = vector.extract_strided_slice %1 {offsets = [0, 0, 2], sizes = [8, 16, 16], strides = [1, 1, 1]} : vector<8x18x18xf32> to vector<8x16x16xf32>
    %22 = vector.broadcast %20 : vector<8x1x1xf32> to vector<8x16x16xf32>
    %23 = arith.mulf %21, %22 : vector<8x16x16xf32>
    %24 = arith.addf %17, %23 : vector<8x16x16xf32>
    %25 = vector.extract_strided_slice %2 {offsets = [0, 1, 0], sizes = [8, 1, 1], strides = [1, 1, 1]} : vector<8x3x3xf32> to vector<8x1x1xf32>
    %26 = vector.shape_cast %25 : vector<8x1x1xf32> to vector<8xf32>
    %27 = vector.shape_cast %26 : vector<8xf32> to vector<8x1x1xf32>
    %28 = vector.extract_strided_slice %1 {offsets = [0, 1, 0], sizes = [8, 16, 16], strides = [1, 1, 1]} : vector<8x18x18xf32> to vector<8x16x16xf32>
    %29 = vector.broadcast %27 : vector<8x1x1xf32> to vector<8x16x16xf32>
    %30 = arith.mulf %28, %29 : vector<8x16x16xf32>
    %31 = arith.addf %24, %30 : vector<8x16x16xf32>
    %32 = vector.extract_strided_slice %2 {offsets = [0, 1, 1], sizes = [8, 1, 1], strides = [1, 1, 1]} : vector<8x3x3xf32> to vector<8x1x1xf32>
    %33 = vector.shape_cast %32 : vector<8x1x1xf32> to vector<8xf32>
    %34 = vector.shape_cast %33 : vector<8xf32> to vector<8x1x1xf32>
    %35 = vector.extract_strided_slice %1 {offsets = [0, 1, 1], sizes = [8, 16, 16], strides = [1, 1, 1]} : vector<8x18x18xf32> to vector<8x16x16xf32>
    %36 = vector.broadcast %34 : vector<8x1x1xf32> to vector<8x16x16xf32>
    %37 = arith.mulf %35, %36 : vector<8x16x16xf32>
    %38 = arith.addf %31, %37 : vector<8x16x16xf32>
    %39 = vector.extract_strided_slice %2 {offsets = [0, 1, 2], sizes = [8, 1, 1], strides = [1, 1, 1]} : vector<8x3x3xf32> to vector<8x1x1xf32>
    %40 = vector.shape_cast %39 : vector<8x1x1xf32> to vector<8xf32>
    %41 = vector.shape_cast %40 : vector<8xf32> to vector<8x1x1xf32>
    %42 = vector.extract_strided_slice %1 {offsets = [0, 1, 2], sizes = [8, 16, 16], strides = [1, 1, 1]} : vector<8x18x18xf32> to vector<8x16x16xf32>
    %43 = vector.broadcast %41 : vector<8x1x1xf32> to vector<8x16x16xf32>
    %44 = arith.mulf %42, %43 : vector<8x16x16xf32>
    %45 = arith.addf %38, %44 : vector<8x16x16xf32>
    %46 = vector.extract_strided_slice %2 {offsets = [0, 2, 0], sizes = [8, 1, 1], strides = [1, 1, 1]} : vector<8x3x3xf32> to vector<8x1x1xf32>
    %47 = vector.shape_cast %46 : vector<8x1x1xf32> to vector<8xf32>
    %48 = vector.shape_cast %47 : vector<8xf32> to vector<8x1x1xf32>
    %49 = vector.extract_strided_slice %1 {offsets = [0, 2, 0], sizes = [8, 16, 16], strides = [1, 1, 1]} : vector<8x18x18xf32> to vector<8x16x16xf32>
    %50 = vector.broadcast %48 : vector<8x1x1xf32> to vector<8x16x16xf32>
    %51 = arith.mulf %49, %50 : vector<8x16x16xf32>
    %52 = arith.addf %45, %51 : vector<8x16x16xf32>
    %53 = vector.extract_strided_slice %2 {offsets = [0, 2, 1], sizes = [8, 1, 1], strides = [1, 1, 1]} : vector<8x3x3xf32> to vector<8x1x1xf32>
    %54 = vector.shape_cast %53 : vector<8x1x1xf32> to vector<8xf32>
    %55 = vector.shape_cast %54 : vector<8xf32> to vector<8x1x1xf32>
    %56 = vector.extract_strided_slice %1 {offsets = [0, 2, 1], sizes = [8, 16, 16], strides = [1, 1, 1]} : vector<8x18x18xf32> to vector<8x16x16xf32>
    %57 = vector.broadcast %55 : vector<8x1x1xf32> to vector<8x16x16xf32>
    %58 = arith.mulf %56, %57 : vector<8x16x16xf32>
    %59 = arith.addf %52, %58 : vector<8x16x16xf32>
    %60 = vector.extract_strided_slice %2 {offsets = [0, 2, 2], sizes = [8, 1, 1], strides = [1, 1, 1]} : vector<8x3x3xf32> to vector<8x1x1xf32>
    %61 = vector.shape_cast %60 : vector<8x1x1xf32> to vector<8xf32>
    %62 = vector.shape_cast %61 : vector<8xf32> to vector<8x1x1xf32>
    %63 = vector.extract_strided_slice %1 {offsets = [0, 2, 2], sizes = [8, 16, 16], strides = [1, 1, 1]} : vector<8x18x18xf32> to vector<8x16x16xf32>
    %64 = vector.broadcast %62 : vector<8x1x1xf32> to vector<8x16x16xf32>
    %65 = arith.mulf %63, %64 : vector<8x16x16xf32>
    %66 = arith.addf %59, %65 : vector<8x16x16xf32>
    %67 = arith.truncf %66 : vector<8x16x16xf32> to vector<8x16x16xbf16>
    %c0_6 = arith.constant 0 : index
    %c0_7 = arith.constant 0 : index
    %c0_8 = arith.constant 0 : index
    %c0_9 = arith.constant 0 : index
    %68 = vector.load %arg3[%c0_6, %c0_7, %c0_8, %c0_9] : memref<1x8x16x16xbf16, #tpu.memory_space<vmem>>, vector<1x8x16x16xbf16>
    %69 = vector.shape_cast %68 : vector<1x8x16x16xbf16> to vector<8x16x16xbf16>
    %70 = vector.shape_cast %67 : vector<8x16x16xbf16> to vector<1x8x16x16xbf16>
    tpu.vector_store %arg3[%c0_6, %c0_7, %c0_8, %c0_9], %70 {strides = array<i32>} : memref<1x8x16x16xbf16, #tpu.memory_space<vmem>>, vector<1x8x16x16xbf16>,
    return
  }
  func.func @transform_0(%arg0: i32) -> (i32, i32, i32, i32) {
    %c0_i32 = arith.constant 0 : i32
    %c0_i32_0 = arith.constant 0 : i32
    %c0_i32_1 = arith.constant 0 : i32
    %c0_i32_2 = arith.constant 0 : i32
    return %arg0, %c0_i32, %c0_i32_0, %c0_i32_1 : i32, i32, i32, i32
  }
  func.func @transform_1(%arg0: i32) -> (i32, i32, i32) {
    %c0_i32 = arith.constant 0 : i32
    %c0_i32_0 = arith.constant 0 : i32
    %c0_i32_1 = arith.constant 0 : i32
    %c0_i32_2 = arith.constant 0 : i32
    return %c0_i32, %c0_i32_0, %c0_i32_1 : i32, i32, i32
  }
  func.func @transform_2(%arg0: i32) -> (i32, i32, i32, i32) {
    %c0_i32 = arith.constant 0 : i32
    %c0_i32_0 = arith.constant 0 : i32
    %c0_i32_1 = arith.constant 0 : i32
    %c0_i32_2 = arith.constant 0 : i32
    return %arg0, %c0_i32, %c0_i32_0, %c0_i32_1 : i32, i32, i32, i32
  }
}

module attributes {stable_mosaic.version = 11 : i64} {
  func.func @_attn_out_kernel(%arg0: i32, %arg1: i32, %arg2: memref<1x8x256xf32, #tpu.memory_space<vmem>>, %arg3: memref<64x8xf32, #tpu.memory_space<vmem>>, %arg4: memref<1x4x16x16xf32, #tpu.memory_space<vmem>>, %arg5: memref<1x64x1xf32, #tpu.memory_space<vmem>>, %arg6: memref<8x64xf32, #tpu.memory_space<vmem>>, %arg7: memref<8x1xf32, #tpu.memory_space<vmem>>, %arg8: memref<1x8x256xf32, #tpu.memory_space<vmem>>) attributes {dimension_semantics = [#tpu.dimension_semantics<parallel>, #tpu.dimension_semantics<parallel>], iteration_bounds = array<i64: 2, 1>, scalar_prefetch = 0 : i64, scratch_operands = 0 : i64, tpu.core_type = #tpu.core_type<tc>, window_params = [{transform_indices = @transform_0, window_bounds = array<i64: 1, 8, 256>}, {pipeline_mode = #tpu.pipeline_mode<synchronous>, transform_indices = @transform_1, window_bounds = array<i64: 64, 8>}, {transform_indices = @transform_2, window_bounds = array<i64: 1, 4, 16, 16>}, {transform_indices = @transform_3, window_bounds = array<i64: 1, 64, 1>}, {pipeline_mode = #tpu.pipeline_mode<synchronous>, transform_indices = @transform_4, window_bounds = array<i64: 8, 64>}, {pipeline_mode = #tpu.pipeline_mode<synchronous>, transform_indices = @transform_5, window_bounds = array<i64: 8, 1>}, {transform_indices = @transform_6, window_bounds = array<i64: 1, 8, 256>}]} {
    %c0 = arith.constant 0 : index
    %c0_0 = arith.constant 0 : index
    %c0_1 = arith.constant 0 : index
    %0 = vector.load %arg2[%c0, %c0_0, %c0_1] : memref<1x8x256xf32, #tpu.memory_space<vmem>>, vector<1x8x256xf32>
    %1 = vector.shape_cast %0 : vector<1x8x256xf32> to vector<8x256xf32>
    %2 = arith.truncf %1 : vector<8x256xf32> to vector<8x256xbf16>
    %c0_2 = arith.constant 0 : index
    %c0_3 = arith.constant 0 : index
    %3 = vector.load %arg3[%c0_2, %c0_3] : memref<64x8xf32, #tpu.memory_space<vmem>>, vector<64x8xf32>
    %4 = arith.truncf %3 : vector<64x8xf32> to vector<64x8xbf16>
    %cst = arith.constant dense<0.000000e+00> : vector<64x256xf32>
    %5 = tpu.matmul %4, %2, %cst {dimension_numbers = #tpu.dot_dimension_numbers<[1], [0], [0], [1], [0, 0, 1, 1], [], []>} : vector<64x8xbf16>, vector<8x256xbf16>, vector<64x256xf32> -> vector<64x256xf32>
    %c0_4 = arith.constant 0 : index
    %c0_5 = arith.constant 0 : index
    %c0_6 = arith.constant 0 : index
    %6 = vector.load %arg5[%c0_4, %c0_5, %c0_6] : memref<1x64x1xf32, #tpu.memory_space<vmem>>, vector<1x64x1xf32>
    %7 = vector.shape_cast %6 : vector<1x64x1xf32> to vector<64x1xf32>
    %8 = tpu.reciprocal %7 {approx = true} : vector<64x1xf32> -> vector<64x1xf32>
    %c0_7 = arith.constant 0 : index
    %c0_8 = arith.constant 0 : index
    %9 = vector.load %arg6[%c0_7, %c0_8] : memref<8x64xf32, #tpu.memory_space<vmem>>, vector<8x64xf32>
    %cst_9 = arith.constant 0.000000e+00 : f32
    %10 = vector.broadcast %cst_9 : f32 to vector<8x256xf32>
    %11 = vector.extract_strided_slice %5 {offsets = [0, 0], sizes = [16, 256], strides = [1, 1]} : vector<64x256xf32> to vector<16x256xf32>
    %cst_10 = arith.constant dense<0xFF800000> : vector<256xf32>
    %12 = vector.multi_reduction <maximumf>, %11, %cst_10 [0] : vector<16x256xf32> to vector<256xf32>
    %13 = vector.shape_cast %12 : vector<256xf32> to vector<1x256xf32>
    %14 = vector.broadcast %13 : vector<1x256xf32> to vector<16x256xf32>
    %15 = arith.subf %11, %14 : vector<16x256xf32>
    %16 = math.exp %15 : vector<16x256xf32>
    %cst_11 = arith.constant dense<0.000000e+00> : vector<256xf32>
    %17 = vector.multi_reduction <add>, %16, %cst_11 [0] : vector<16x256xf32> to vector<256xf32>
    %18 = vector.shape_cast %17 : vector<256xf32> to vector<1x256xf32>
    %19 = tpu.reciprocal %18 {approx = true} : vector<1x256xf32> -> vector<1x256xf32>
    %20 = vector.broadcast %19 : vector<1x256xf32> to vector<16x256xf32>
    %21 = arith.mulf %16, %20 : vector<16x256xf32>
    %22 = vector.extract_strided_slice %8 {offsets = [0, 0], sizes = [16, 1], strides = [1, 1]} : vector<64x1xf32> to vector<16x1xf32>
    %23 = vector.broadcast %22 : vector<16x1xf32> to vector<16x256xf32>
    %24 = arith.mulf %21, %23 : vector<16x256xf32>
    %cst_12 = arith.constant 2.500000e-01 : f32
    %25 = vector.broadcast %cst_12 : f32 to vector<16x256xf32>
    %26 = arith.mulf %24, %25 : vector<16x256xf32>
    %27 = arith.truncf %26 : vector<16x256xf32> to vector<16x256xbf16>
    %c0_13 = arith.constant 0 : index
    %c0_14 = arith.constant 0 : index
    %c0_15 = arith.constant 0 : index
    %c0_16 = arith.constant 0 : index
    %28 = vector.load %arg4[%c0_13, %c0_14, %c0_15, %c0_16] : memref<1x4x16x16xf32, #tpu.memory_space<vmem>>, vector<1x1x16x16xf32>
    %29 = vector.shape_cast %28 : vector<1x1x16x16xf32> to vector<16x16xf32>
    %30 = arith.truncf %29 : vector<16x16xf32> to vector<16x16xbf16>
    %cst_17 = arith.constant dense<0.000000e+00> : vector<16x256xf32>
    %31 = tpu.matmul %30, %27, %cst_17 {dimension_numbers = #tpu.dot_dimension_numbers<[1], [0], [0], [1], [0, 0, 1, 1], [], []>} : vector<16x16xbf16>, vector<16x256xbf16>, vector<16x256xf32> -> vector<16x256xf32>
    %cst_18 = arith.constant 5.000000e-01 : f32
    %32 = vector.broadcast %cst_18 : f32 to vector<16x256xf32>
    %33 = arith.mulf %32, %31 : vector<16x256xf32>
    %cst_19 = arith.constant 4.471500e-02 : f32
    %34 = vector.broadcast %cst_19 : f32 to vector<16x256xf32>
    %35 = arith.mulf %34, %31 : vector<16x256xf32>
    %36 = arith.mulf %35, %31 : vector<16x256xf32>
    %37 = arith.mulf %36, %31 : vector<16x256xf32>
    %38 = arith.addf %31, %37 : vector<16x256xf32>
    %cst_20 = arith.constant 0.797884583 : f32
    %39 = vector.broadcast %cst_20 : f32 to vector<16x256xf32>
    %40 = arith.mulf %39, %38 : vector<16x256xf32>
    %41 = math.tanh %40 : vector<16x256xf32>
    %cst_21 = arith.constant 1.000000e+00 : f32
    %42 = vector.broadcast %cst_21 : f32 to vector<16x256xf32>
    %43 = arith.addf %42, %41 : vector<16x256xf32>
    %44 = arith.mulf %33, %43 : vector<16x256xf32>
    %45 = vector.extract_strided_slice %9 {offsets = [0, 0], sizes = [8, 16], strides = [1, 1]} : vector<8x64xf32> to vector<8x16xf32>
    %46 = arith.truncf %45 : vector<8x16xf32> to vector<8x16xbf16>
    %47 = arith.truncf %44 : vector<16x256xf32> to vector<16x256xbf16>
    %cst_22 = arith.constant dense<0.000000e+00> : vector<8x256xf32>
    %48 = tpu.matmul %46, %47, %cst_22 {dimension_numbers = #tpu.dot_dimension_numbers<[1], [0], [0], [1], [0, 0, 1, 1], [], []>} : vector<8x16xbf16>, vector<16x256xbf16>, vector<8x256xf32> -> vector<8x256xf32>
    %49 = arith.addf %10, %48 : vector<8x256xf32>
    %50 = vector.extract_strided_slice %5 {offsets = [16, 0], sizes = [16, 256], strides = [1, 1]} : vector<64x256xf32> to vector<16x256xf32>
    %cst_23 = arith.constant dense<0xFF800000> : vector<256xf32>
    %51 = vector.multi_reduction <maximumf>, %50, %cst_23 [0] : vector<16x256xf32> to vector<256xf32>
    %52 = vector.shape_cast %51 : vector<256xf32> to vector<1x256xf32>
    %53 = vector.broadcast %52 : vector<1x256xf32> to vector<16x256xf32>
    %54 = arith.subf %50, %53 : vector<16x256xf32>
    %55 = math.exp %54 : vector<16x256xf32>
    %cst_24 = arith.constant dense<0.000000e+00> : vector<256xf32>
    %56 = vector.multi_reduction <add>, %55, %cst_24 [0] : vector<16x256xf32> to vector<256xf32>
    %57 = vector.shape_cast %56 : vector<256xf32> to vector<1x256xf32>
    %58 = tpu.reciprocal %57 {approx = true} : vector<1x256xf32> -> vector<1x256xf32>
    %59 = vector.broadcast %58 : vector<1x256xf32> to vector<16x256xf32>
    %60 = arith.mulf %55, %59 : vector<16x256xf32>
    %61 = vector.extract_strided_slice %8 {offsets = [16, 0], sizes = [16, 1], strides = [1, 1]} : vector<64x1xf32> to vector<16x1xf32>
    %62 = vector.broadcast %61 : vector<16x1xf32> to vector<16x256xf32>
    %63 = arith.mulf %60, %62 : vector<16x256xf32>
    %cst_25 = arith.constant 2.500000e-01 : f32
    %64 = vector.broadcast %cst_25 : f32 to vector<16x256xf32>
    %65 = arith.mulf %63, %64 : vector<16x256xf32>
    %66 = arith.truncf %65 : vector<16x256xf32> to vector<16x256xbf16>
    %c0_26 = arith.constant 0 : index
    %c1 = arith.constant 1 : index
    %c0_27 = arith.constant 0 : index
    %c0_28 = arith.constant 0 : index
    %67 = vector.load %arg4[%c0_26, %c1, %c0_27, %c0_28] : memref<1x4x16x16xf32, #tpu.memory_space<vmem>>, vector<1x1x16x16xf32>
    %68 = vector.shape_cast %67 : vector<1x1x16x16xf32> to vector<16x16xf32>
    %69 = arith.truncf %68 : vector<16x16xf32> to vector<16x16xbf16>
    %cst_29 = arith.constant dense<0.000000e+00> : vector<16x256xf32>
    %70 = tpu.matmul %69, %66, %cst_29 {dimension_numbers = #tpu.dot_dimension_numbers<[1], [0], [0], [1], [0, 0, 1, 1], [], []>} : vector<16x16xbf16>, vector<16x256xbf16>, vector<16x256xf32> -> vector<16x256xf32>
    %cst_30 = arith.constant 5.000000e-01 : f32
    %71 = vector.broadcast %cst_30 : f32 to vector<16x256xf32>
    %72 = arith.mulf %71, %70 : vector<16x256xf32>
    %cst_31 = arith.constant 4.471500e-02 : f32
    %73 = vector.broadcast %cst_31 : f32 to vector<16x256xf32>
    %74 = arith.mulf %73, %70 : vector<16x256xf32>
    %75 = arith.mulf %74, %70 : vector<16x256xf32>
    %76 = arith.mulf %75, %70 : vector<16x256xf32>
    %77 = arith.addf %70, %76 : vector<16x256xf32>
    %cst_32 = arith.constant 0.797884583 : f32
    %78 = vector.broadcast %cst_32 : f32 to vector<16x256xf32>
    %79 = arith.mulf %78, %77 : vector<16x256xf32>
    %80 = math.tanh %79 : vector<16x256xf32>
    %cst_33 = arith.constant 1.000000e+00 : f32
    %81 = vector.broadcast %cst_33 : f32 to vector<16x256xf32>
    %82 = arith.addf %81, %80 : vector<16x256xf32>
    %83 = arith.mulf %72, %82 : vector<16x256xf32>
    %84 = vector.extract_strided_slice %9 {offsets = [0, 16], sizes = [8, 16], strides = [1, 1]} : vector<8x64xf32> to vector<8x16xf32>
    %85 = arith.truncf %84 : vector<8x16xf32> to vector<8x16xbf16>
    %86 = arith.truncf %83 : vector<16x256xf32> to vector<16x256xbf16>
    %cst_34 = arith.constant dense<0.000000e+00> : vector<8x256xf32>
    %87 = tpu.matmul %85, %86, %cst_34 {dimension_numbers = #tpu.dot_dimension_numbers<[1], [0], [0], [1], [0, 0, 1, 1], [], []>} : vector<8x16xbf16>, vector<16x256xbf16>, vector<8x256xf32> -> vector<8x256xf32>
    %88 = arith.addf %49, %87 : vector<8x256xf32>
    %89 = vector.extract_strided_slice %5 {offsets = [32, 0], sizes = [16, 256], strides = [1, 1]} : vector<64x256xf32> to vector<16x256xf32>
    %cst_35 = arith.constant dense<0xFF800000> : vector<256xf32>
    %90 = vector.multi_reduction <maximumf>, %89, %cst_35 [0] : vector<16x256xf32> to vector<256xf32>
    %91 = vector.shape_cast %90 : vector<256xf32> to vector<1x256xf32>
    %92 = vector.broadcast %91 : vector<1x256xf32> to vector<16x256xf32>
    %93 = arith.subf %89, %92 : vector<16x256xf32>
    %94 = math.exp %93 : vector<16x256xf32>
    %cst_36 = arith.constant dense<0.000000e+00> : vector<256xf32>
    %95 = vector.multi_reduction <add>, %94, %cst_36 [0] : vector<16x256xf32> to vector<256xf32>
    %96 = vector.shape_cast %95 : vector<256xf32> to vector<1x256xf32>
    %97 = tpu.reciprocal %96 {approx = true} : vector<1x256xf32> -> vector<1x256xf32>
    %98 = vector.broadcast %97 : vector<1x256xf32> to vector<16x256xf32>
    %99 = arith.mulf %94, %98 : vector<16x256xf32>
    %100 = vector.extract_strided_slice %8 {offsets = [32, 0], sizes = [16, 1], strides = [1, 1]} : vector<64x1xf32> to vector<16x1xf32>
    %101 = vector.broadcast %100 : vector<16x1xf32> to vector<16x256xf32>
    %102 = arith.mulf %99, %101 : vector<16x256xf32>
    %cst_37 = arith.constant 2.500000e-01 : f32
    %103 = vector.broadcast %cst_37 : f32 to vector<16x256xf32>
    %104 = arith.mulf %102, %103 : vector<16x256xf32>
    %105 = arith.truncf %104 : vector<16x256xf32> to vector<16x256xbf16>
    %c0_38 = arith.constant 0 : index
    %c2 = arith.constant 2 : index
    %c0_39 = arith.constant 0 : index
    %c0_40 = arith.constant 0 : index
    %106 = vector.load %arg4[%c0_38, %c2, %c0_39, %c0_40] : memref<1x4x16x16xf32, #tpu.memory_space<vmem>>, vector<1x1x16x16xf32>
    %107 = vector.shape_cast %106 : vector<1x1x16x16xf32> to vector<16x16xf32>
    %108 = arith.truncf %107 : vector<16x16xf32> to vector<16x16xbf16>
    %cst_41 = arith.constant dense<0.000000e+00> : vector<16x256xf32>
    %109 = tpu.matmul %108, %105, %cst_41 {dimension_numbers = #tpu.dot_dimension_numbers<[1], [0], [0], [1], [0, 0, 1, 1], [], []>} : vector<16x16xbf16>, vector<16x256xbf16>, vector<16x256xf32> -> vector<16x256xf32>
    %cst_42 = arith.constant 5.000000e-01 : f32
    %110 = vector.broadcast %cst_42 : f32 to vector<16x256xf32>
    %111 = arith.mulf %110, %109 : vector<16x256xf32>
    %cst_43 = arith.constant 4.471500e-02 : f32
    %112 = vector.broadcast %cst_43 : f32 to vector<16x256xf32>
    %113 = arith.mulf %112, %109 : vector<16x256xf32>
    %114 = arith.mulf %113, %109 : vector<16x256xf32>
    %115 = arith.mulf %114, %109 : vector<16x256xf32>
    %116 = arith.addf %109, %115 : vector<16x256xf32>
    %cst_44 = arith.constant 0.797884583 : f32
    %117 = vector.broadcast %cst_44 : f32 to vector<16x256xf32>
    %118 = arith.mulf %117, %116 : vector<16x256xf32>
    %119 = math.tanh %118 : vector<16x256xf32>
    %cst_45 = arith.constant 1.000000e+00 : f32
    %120 = vector.broadcast %cst_45 : f32 to vector<16x256xf32>
    %121 = arith.addf %120, %119 : vector<16x256xf32>
    %122 = arith.mulf %111, %121 : vector<16x256xf32>
    %123 = vector.extract_strided_slice %9 {offsets = [0, 32], sizes = [8, 16], strides = [1, 1]} : vector<8x64xf32> to vector<8x16xf32>
    %124 = arith.truncf %123 : vector<8x16xf32> to vector<8x16xbf16>
    %125 = arith.truncf %122 : vector<16x256xf32> to vector<16x256xbf16>
    %cst_46 = arith.constant dense<0.000000e+00> : vector<8x256xf32>
    %126 = tpu.matmul %124, %125, %cst_46 {dimension_numbers = #tpu.dot_dimension_numbers<[1], [0], [0], [1], [0, 0, 1, 1], [], []>} : vector<8x16xbf16>, vector<16x256xbf16>, vector<8x256xf32> -> vector<8x256xf32>
    %127 = arith.addf %88, %126 : vector<8x256xf32>
    %128 = vector.extract_strided_slice %5 {offsets = [48, 0], sizes = [16, 256], strides = [1, 1]} : vector<64x256xf32> to vector<16x256xf32>
    %cst_47 = arith.constant dense<0xFF800000> : vector<256xf32>
    %129 = vector.multi_reduction <maximumf>, %128, %cst_47 [0] : vector<16x256xf32> to vector<256xf32>
    %130 = vector.shape_cast %129 : vector<256xf32> to vector<1x256xf32>
    %131 = vector.broadcast %130 : vector<1x256xf32> to vector<16x256xf32>
    %132 = arith.subf %128, %131 : vector<16x256xf32>
    %133 = math.exp %132 : vector<16x256xf32>
    %cst_48 = arith.constant dense<0.000000e+00> : vector<256xf32>
    %134 = vector.multi_reduction <add>, %133, %cst_48 [0] : vector<16x256xf32> to vector<256xf32>
    %135 = vector.shape_cast %134 : vector<256xf32> to vector<1x256xf32>
    %136 = tpu.reciprocal %135 {approx = true} : vector<1x256xf32> -> vector<1x256xf32>
    %137 = vector.broadcast %136 : vector<1x256xf32> to vector<16x256xf32>
    %138 = arith.mulf %133, %137 : vector<16x256xf32>
    %139 = vector.extract_strided_slice %8 {offsets = [48, 0], sizes = [16, 1], strides = [1, 1]} : vector<64x1xf32> to vector<16x1xf32>
    %140 = vector.broadcast %139 : vector<16x1xf32> to vector<16x256xf32>
    %141 = arith.mulf %138, %140 : vector<16x256xf32>
    %cst_49 = arith.constant 2.500000e-01 : f32
    %142 = vector.broadcast %cst_49 : f32 to vector<16x256xf32>
    %143 = arith.mulf %141, %142 : vector<16x256xf32>
    %144 = arith.truncf %143 : vector<16x256xf32> to vector<16x256xbf16>
    %c0_50 = arith.constant 0 : index
    %c3 = arith.constant 3 : index
    %c0_51 = arith.constant 0 : index
    %c0_52 = arith.constant 0 : index
    %145 = vector.load %arg4[%c0_50, %c3, %c0_51, %c0_52] : memref<1x4x16x16xf32, #tpu.memory_space<vmem>>, vector<1x1x16x16xf32>
    %146 = vector.shape_cast %145 : vector<1x1x16x16xf32> to vector<16x16xf32>
    %147 = arith.truncf %146 : vector<16x16xf32> to vector<16x16xbf16>
    %cst_53 = arith.constant dense<0.000000e+00> : vector<16x256xf32>
    %148 = tpu.matmul %147, %144, %cst_53 {dimension_numbers = #tpu.dot_dimension_numbers<[1], [0], [0], [1], [0, 0, 1, 1], [], []>} : vector<16x16xbf16>, vector<16x256xbf16>, vector<16x256xf32> -> vector<16x256xf32>
    %cst_54 = arith.constant 5.000000e-01 : f32
    %149 = vector.broadcast %cst_54 : f32 to vector<16x256xf32>
    %150 = arith.mulf %149, %148 : vector<16x256xf32>
    %cst_55 = arith.constant 4.471500e-02 : f32
    %151 = vector.broadcast %cst_55 : f32 to vector<16x256xf32>
    %152 = arith.mulf %151, %148 : vector<16x256xf32>
    %153 = arith.mulf %152, %148 : vector<16x256xf32>
    %154 = arith.mulf %153, %148 : vector<16x256xf32>
    %155 = arith.addf %148, %154 : vector<16x256xf32>
    %cst_56 = arith.constant 0.797884583 : f32
    %156 = vector.broadcast %cst_56 : f32 to vector<16x256xf32>
    %157 = arith.mulf %156, %155 : vector<16x256xf32>
    %158 = math.tanh %157 : vector<16x256xf32>
    %cst_57 = arith.constant 1.000000e+00 : f32
    %159 = vector.broadcast %cst_57 : f32 to vector<16x256xf32>
    %160 = arith.addf %159, %158 : vector<16x256xf32>
    %161 = arith.mulf %150, %160 : vector<16x256xf32>
    %162 = vector.extract_strided_slice %9 {offsets = [0, 48], sizes = [8, 16], strides = [1, 1]} : vector<8x64xf32> to vector<8x16xf32>
    %163 = arith.truncf %162 : vector<8x16xf32> to vector<8x16xbf16>
    %164 = arith.truncf %161 : vector<16x256xf32> to vector<16x256xbf16>
    %cst_58 = arith.constant dense<0.000000e+00> : vector<8x256xf32>
    %165 = tpu.matmul %163, %164, %cst_58 {dimension_numbers = #tpu.dot_dimension_numbers<[1], [0], [0], [1], [0, 0, 1, 1], [], []>} : vector<8x16xbf16>, vector<16x256xbf16>, vector<8x256xf32> -> vector<8x256xf32>
    %166 = arith.addf %127, %165 : vector<8x256xf32>
    %c0_59 = arith.constant 0 : index
    %c0_60 = arith.constant 0 : index
    %167 = vector.load %arg7[%c0_59, %c0_60] : memref<8x1xf32, #tpu.memory_space<vmem>>, vector<8x1xf32>
    %168 = vector.broadcast %167 : vector<8x1xf32> to vector<8x256xf32>
    %169 = arith.addf %166, %168 : vector<8x256xf32>
    %c0_61 = arith.constant 0 : index
    %c0_62 = arith.constant 0 : index
    %c0_63 = arith.constant 0 : index
    %170 = vector.load %arg8[%c0_61, %c0_62, %c0_63] : memref<1x8x256xf32, #tpu.memory_space<vmem>>, vector<1x8x256xf32>
    %171 = vector.shape_cast %170 : vector<1x8x256xf32> to vector<8x256xf32>
    %172 = vector.shape_cast %169 : vector<8x256xf32> to vector<1x8x256xf32>
    tpu.vector_store %arg8[%c0_61, %c0_62, %c0_63], %172 {strides = array<i32>} : memref<1x8x256xf32, #tpu.memory_space<vmem>>, vector<1x8x256xf32>,
    return
  }
  func.func @transform_0(%arg0: i32, %arg1: i32) -> (i32, i32, i32) {
    %c0_i32 = arith.constant 0 : i32
    %c0_i32_0 = arith.constant 0 : i32
    return %arg0, %c0_i32, %arg1 : i32, i32, i32
  }
  func.func @transform_1(%arg0: i32, %arg1: i32) -> (i32, i32) {
    %c0_i32 = arith.constant 0 : i32
    %c0_i32_0 = arith.constant 0 : i32
    %c0_i32_1 = arith.constant 0 : i32
    return %c0_i32, %c0_i32_0 : i32, i32
  }
  func.func @transform_2(%arg0: i32, %arg1: i32) -> (i32, i32, i32, i32) {
    %c0_i32 = arith.constant 0 : i32
    %c0_i32_0 = arith.constant 0 : i32
    %c0_i32_1 = arith.constant 0 : i32
    %c0_i32_2 = arith.constant 0 : i32
    return %arg0, %c0_i32, %c0_i32_0, %c0_i32_1 : i32, i32, i32, i32
  }
  func.func @transform_3(%arg0: i32, %arg1: i32) -> (i32, i32, i32) {
    %c0_i32 = arith.constant 0 : i32
    %c0_i32_0 = arith.constant 0 : i32
    %c0_i32_1 = arith.constant 0 : i32
    return %arg0, %c0_i32, %c0_i32_0 : i32, i32, i32
  }
  func.func @transform_4(%arg0: i32, %arg1: i32) -> (i32, i32) {
    %c0_i32 = arith.constant 0 : i32
    %c0_i32_0 = arith.constant 0 : i32
    %c0_i32_1 = arith.constant 0 : i32
    return %c0_i32, %c0_i32_0 : i32, i32
  }
  func.func @transform_5(%arg0: i32, %arg1: i32) -> (i32, i32) {
    %c0_i32 = arith.constant 0 : i32
    %c0_i32_0 = arith.constant 0 : i32
    %c0_i32_1 = arith.constant 0 : i32
    return %c0_i32, %c0_i32_0 : i32, i32
  }
  func.func @transform_6(%arg0: i32, %arg1: i32) -> (i32, i32, i32) {
    %c0_i32 = arith.constant 0 : i32
    %c0_i32_0 = arith.constant 0 : i32
    return %arg0, %c0_i32, %arg1 : i32, i32, i32
  }
}

</mosaic_0001>

<bundles_post_ra>
// kernel: linear_attention_forward.5
= control target key start
LH: loop header
LB: loop body
LE: loop exit
PB: predicated region body
PF: predicated region fallthrough
CT: control target
= control target key end

     0   :  { %s506_s9 = smov 0   ;;  %s508_s10 = smov 0   ;;  %s609_s0 = inlined_call_operand.vmem [shape: bf16[2,8,256], index: 0, kind: input, shape index: {}]   ;;  %s610_s1 = inlined_call_operand.vmem [shape: f32[64,8], index: 1, kind: input, shape index: {}]   ;;  %s611_s2 = inlined_call_operand.vmem [shape: f32[2,64,1], index: 2, kind: output, shape index: {}]  }
   0x1   :  { %s510_s11 = smov 0  }
   0x2 LB: > { %s24_s12 = sadd.s32 1, %s483_s10  ;;  %p419_p0 = scmp.ge.s32.totalorder %s487_s11, 1  ;;  %s487_s11 = sphi %s510_s11, %s12_s11   ;;  %s483_s10 = sphi %s508_s10, %s613_s10   ;;  %s479_s9 = sphi %s506_s9, %s612_s9  }
   0x3   : > { %p26_p1 = scmp.ge.s32.totalorder %s24_s12, 2  ;;  %p131_p2 = scmp.lt.s32.totalorder %s487_s11, 3 }
   0x5   : > { %s615_s12 = smov (%p26_p1, %s24_s12), 0  ;;  %p132_p3 = pnand %p419_p0, %p131_p2 }
   0x6   : > { %p158_p4 = scmp.lt.s32.totalorder (!%p132_p3), %s479_s9, 1  ;;  %v489_v0 = vmov (!%p132_p3), 0   ;;  %v187_v1 = vld [vmem:[%s610_s1] sm:$0xff] (!%p132_p3)  ;;  %v188_v2 = vld [vmem:[%s610_s1 + $0x8] sm:$0xff] (!%p132_p3)  ;;  %vm217_vm0 = vcmask (!%p132_p3), 1043456   ;;  %vm204_vm1 = vcmask (!%p132_p3), 64512  }
   0x7   : > { %135 = sbr.rel (%p132_p3) target bundleno = 400 (0x190), region = 28  ;;  %256 = vmatprep.mubr.bf16.mxu0 (!%p132_p3), %v489_v0  ;;  %276 = vmatprep.mubr.bf16.mxu1 (!%p132_p3), %v489_v0  ;;  %v191_v4 = vld [vmem:[%s610_s1 + $0x20] sm:$0xff] (!%p132_p3)  ;;  %v192_v5 = vld [vmem:[%s610_s1 + $0x28] sm:$0xff] (!%p132_p3)  ;;  %v195_v9 = vpack.c.bf16 (!%p132_p3), %v188_v2, %v187_v1  ;;  %v189_v11 = vld [vmem:[%s610_s1 + $0x10] sm:$0xff] (!%p132_p3)  ;;  %vm177_vm2 = vcmask (!%p132_p3), 7168   ;;  %v490_v17 = vmov (!%p132_p3), -inf  }
   0x8   : > { %v197_v10 = vpack.c.bf16 (!%p132_p3), %v192_v5, %v191_v4  ;;  %v190_v12 = vld [vmem:[%s610_s1 + $0x18] sm:$0xff] (!%p132_p3)  ;;  %v193_v13 = vld [vmem:[%s610_s1 + $0x30] sm:$0xff] (!%p132_p3) }
   0x9   : > { %v194_v14 = vld [vmem:[%s610_s1 + $0x38] sm:$0xff] (!%p132_p3)  ;;  %v196_v15 = vpack.c.bf16 (!%p132_p3), %v190_v12, %v189_v11 }
   0xa   : > { %v198_v16 = vpack.c.bf16 (!%p132_p3), %v194_v14, %v193_v13 }
   0xe   : > { %s617_s9 = smov (!%p158_p4, %s479_s9), 1 }
   0xf   : > { %s433_s13 = sshll.u32 %s617_s9, 3  ;;  %s434_s5 = sshll.u32 %s617_s9, 6 }
  0x10   : > { %s165_s16 = scalar_lea.vmem %s609_s0, %s433_s13  ;;  %s558_s8 = scalar_lea.vmem %s611_s2, %s434_s5 }
  0x11   : > { %v186_v3 = vld [vmem:[%s165_s16] sm:$0xff]  ;;  %178 = vst.msk [vmem:[%s558_s8] sm:$0xff] %vm177_vm2, %v490_v17  ;;  %179 = vst.msk [vmem:[%s558_s8 + $0x8] sm:$0xff] %vm177_vm2, %v490_v17 }
  0x12   : > { %v425_v6 = vcombine.high %v186_v3, %v186_v3  ;;  %v424_v7 = vcombine.low %v186_v3, %v186_v3  ;;  %180 = vst.msk [vmem:[%s558_s8 + $0x10] sm:$0xff] %vm177_vm2, %v490_v17  ;;  %181 = vst.msk [vmem:[%s558_s8 + $0x18] sm:$0xff] %vm177_vm2, %v490_v17 }
  0x13   : > { %182 = vst.msk [vmem:[%s558_s8 + $0x20] sm:$0xff] %vm177_vm2, %v490_v17  ;;  %183 = vst.msk [vmem:[%s558_s8 + $0x28] sm:$0xff] %vm177_vm2, %v490_v17 }
  0x14   : > { %426 = vmatprep.subr.msk.bf16.mxu0 %vm217_vm0, %v425_v6  ;;  %435 = vmatprep.subr.msk.bf16.mxu1 %vm217_vm0, %v425_v6  ;;  %v219_v8 = vsel %vm217_vm0, %v424_v7, 0  ;;  %184 = vst.msk [vmem:[%s558_s8 + $0x30] sm:$0xff] %vm177_vm2, %v490_v17  ;;  %185 = vst.msk [vmem:[%s558_s8 + $0x38] sm:$0xff] %vm177_vm2, %v490_v17 }
  0x15   : > { %225 = vmatpush1.bf16.msra.mxu0 %v219_v8  ;;  %436 = vmatpush1.bf16.msra.mxu1 %v219_v8 }
  0x18   : > { %427 = vmatmul.mubr.msk.bf16.vlgmr.msra.gmra.mrb[0].mxu0 %vm204_vm1, %v195_v9  ;;  %429 = vmatmul.mubr.msk.bf16.vlgmr.msra.gmra.mrb[0].mxu1 %vm204_vm1, %v197_v10  ;;  %v297_v42 = vld [vmem:[%s558_s8] sm:$0xff]  ;;  %v298_v51 = vld [vmem:[%s558_s8 + $0x8] sm:$0xff] }
  0x19   : > { %266 = vmatprep.mubr.bf16.mxu0 %v489_v0  ;;  %286 = vmatprep.mubr.bf16.mxu1 %v489_v0  ;;  %v299_v52 = vld [vmem:[%s558_s8 + $0x10] sm:$0xff]  ;;  %v300_v57 = vld [vmem:[%s558_s8 + $0x18] sm:$0xff] }
  0x1a   : > { %v302_v44 = vld [vmem:[%s558_s8 + $0x28] sm:$0xff]  ;;  %v301_v47 = vld [vmem:[%s558_s8 + $0x20] sm:$0xff] }
  0x1b   : > { %v303_v58 = vld [vmem:[%s558_s8 + $0x30] sm:$0xff]  ;;  %v304_v63 = vld [vmem:[%s558_s8 + $0x38] sm:$0xff] }
  0x20   : > { %428 = vmatmul.mubr.msk.bf16.gmra.mrb[4].mxu0 %vm204_vm1, %v196_v15  ;;  %430 = vmatmul.mubr.msk.bf16.gmra.mrb[4].mxu1 %vm204_vm1, %v198_v16 }
  0xeb   : > { %v258_v18 = vpop.f32.mrb[0].mxu0  ;;  %v278_v19 = vpop.f32.mrb[0].mxu1 }
  0xec   : > { %v260_v20 = vpop.f32.mrb[1].mxu0  ;;  %v280_v21 = vpop.f32.mrb[1].mxu1 }
  0xed   : > { %v317_v22 = vmax.f32 %v278_v19, %v280_v21  ;;  %v262_v23 = vpop.f32.mrb[2].mxu0  ;;  %v282_v24 = vpop.f32.mrb[2].mxu1  ;;  %v305_v25 = vmax.f32 %v258_v18, %v260_v20 }
  0xee   : > { %v264_v26 = vpop.f32.mrb[3].mxu0  ;;  %v284_v27 = vpop.f32.mrb[3].mxu1 }
  0xef   : > { %v308_v28 = vmax.f32 %v262_v23, %v264_v26  ;;  %306 = vmax.xlane.f32.xlu0 %v305_v25  ;;  %v320_v29 = vmax.f32 %v282_v24, %v284_v27 }
  0xf1   : > { %321 = vmax.xlane.f32.xlu1 %v320_v29 }
  0xf3   : > { %318 = vmax.xlane.f32.xlu0 %v317_v22  ;;  %v268_v30 = vpop.f32.mrb[4].mxu0  ;;  %v288_v31 = vpop.f32.mrb[4].mxu1 }
  0xf4   : > { %v270_v32 = vpop.f32.mrb[5].mxu0  ;;  %v290_v33 = vpop.f32.mrb[5].mxu1 }
  0xf5   : > { %v311_v34 = vmax.f32 %v268_v30, %v270_v32  ;;  %v272_v35 = vpop.f32.mrb[6].mxu0  ;;  %v323_v36 = vmax.f32 %v288_v31, %v290_v33  ;;  %v292_v37 = vpop.f32.mrb[6].mxu1 }
  0xf6   : > { %v274_v38 = vpop.f32.mrb[7].mxu0  ;;  %v294_v39 = vpop.f32.mrb[7].mxu1 }
  0xf7   : > { %v314_v40 = vmax.f32 %v272_v35, %v274_v38  ;;  %309 = vmax.xlane.f32.xlu0 %v308_v28  ;;  %312 = vmax.xlane.f32.xlu1 %v311_v34  ;;  %v326_v41 = vmax.f32 %v292_v37, %v294_v39 }
  0xfb   : > { %315 = vmax.xlane.f32.xlu1 %v314_v40  ;;  %324 = vmax.xlane.f32.xlu0 %v323_v36 }
  0xff   : > { %327 = vmax.xlane.f32.xlu1 %v326_v41 }
 0x17c   : > { %v307_v43 = vpop.xlane.xlu0 %306 }
 0x17d   : > { %v329_v45 = vmax.f32 %v297_v42, %v307_v43 }
 0x17e   : > { %v322_v46 = vpop.xlane.xlu1 %321 }
 0x17f   : > { %338 = vst.msk [vmem:[%s558_s8] sm:$0xff] %vm177_vm2, %v329_v45  ;;  %v334_v48 = vmax.f32 %v302_v44, %v322_v46 }
 0x180   : > { %v319_v49 = vpop.xlane.xlu0 %318 }
 0x181   : > { %343 = vst.msk [vmem:[%s558_s8 + $0x28] sm:$0xff] %vm177_vm2, %v334_v48  ;;  %v333_v50 = vmax.f32 %v301_v47, %v319_v49 }
 0x183   : > { %342 = vst.msk [vmem:[%s558_s8 + $0x20] sm:$0xff] %vm177_vm2, %v333_v50 }
 0x184   : > { %v310_v53 = vpop.xlane.xlu0 %309  ;;  %v313_v54 = vpop.xlane.xlu1 %312 }
 0x185   : > { %v330_v55 = vmax.f32 %v298_v51, %v310_v53  ;;  %v331_v56 = vmax.f32 %v299_v52, %v313_v54 }
 0x187   : > { %339 = vst.msk [vmem:[%s558_s8 + $0x8] sm:$0xff] %vm177_vm2, %v330_v55  ;;  %340 = vst.msk [vmem:[%s558_s8 + $0x10] sm:$0xff] %vm177_vm2, %v331_v56 }
 0x188   : > { %v316_v59 = vpop.xlane.xlu1 %315  ;;  %v325_v60 = vpop.xlane.xlu0 %324 }
 0x189   : > { %v332_v61 = vmax.f32 %v300_v57, %v316_v59  ;;  %v335_v62 = vmax.f32 %v303_v58, %v325_v60 }
 0x18b   : > { %341 = vst.msk [vmem:[%s558_s8 + $0x18] sm:$0xff] %vm177_vm2, %v332_v61  ;;  %344 = vst.msk [vmem:[%s558_s8 + $0x30] sm:$0xff] %vm177_vm2, %v335_v62 }
 0x18c   : > { %v328_v0 = vpop.xlane.xlu1 %327 }
 0x18d   : > { %v336_v1 = vmax.f32 %v304_v63, %v328_v0 }
 0x18f   : > { %345 = vst.msk [vmem:[%s558_s8 + $0x38] sm:$0xff] %vm177_vm2, %v336_v1 }
 0x190 PF: > { %s12_s11 = sadd.s32 1, %s487_s11   ;;  %s612_s9 = smov %s483_s10 }
 0x191   : > { %p9_p5 = scmp.ge.s32.totalorder %s12_s11, 4   ;;  %s613_s10 = smov %s615_s12 }
 0x193   :  { %11 = sbr.rel (!%p9_p5) target bundleno = 2 (0x2), region = 62 }

// kernel: linear_attention_forward.6
= control target key start
LH: loop header
LB: loop body
LE: loop exit
PB: predicated region body
PF: predicated region fallthrough
CT: control target
= control target key end

     0   :  { %s1145_s18 = smov 0   ;;  %s1147_s19 = smov 0   ;;  %s1392_s0 = inlined_call_operand.vmem [shape: bf16[2,8,256], index: 0, kind: input, shape index: {}]   ;;  %s1393_s1 = inlined_call_operand.vmem [shape: f32[64,8], index: 1, kind: input, shape index: {}]   ;;  %s1394_s2 = inlined_call_operand.vmem [shape: f32[64,8], index: 2, kind: input, shape index: {}]   ;;  %s1395_s3 = inlined_call_operand.vmem [shape: f32[2,64,1], index: 3, kind: input, shape index: {}]   ;;  %s1396_s4 = inlined_call_operand.vmem [shape: f32[2,4,16,16], index: 4, kind: output, shape index: {0}]   ;;  %s1397_s5 = inlined_call_operand.vmem [shape: f32[2,64,1], index: 5, kind: output, shape index: {1}]  }
   0x1   :  { %s1149_s20 = smov 0  }
   0x2 LB: > { %s28_s21 = sadd.s32 1, %s1107_s19  ;;  %p988_p0 = scmp.ge.s32.totalorder %s1111_s20, 1  ;;  %s1111_s20 = sphi %s1149_s20, %s16_s20   ;;  %s1107_s19 = sphi %s1147_s19, %s1399_s19   ;;  %s1103_s18 = sphi %s1145_s18, %s1398_s18  }
   0x3   : > { %p30_p1 = scmp.ge.s32.totalorder %s28_s21, 2  ;;  %p219_p2 = scmp.lt.s32.totalorder %s1111_s20, 3 }
   0x5   : > { %s1401_s21 = smov (%p30_p1, %s28_s21), 0  ;;  %p220_p3 = pnand %p988_p0, %p219_p2 }
   0x6   : > { %p262_p4 = scmp.lt.s32.totalorder (!%p220_p3), %s1103_s18, 1  ;;  %v1113_v0 = vmov (!%p220_p3), 0   ;;  %v310_v1 = vld [vmem:[%s1393_s1] sm:$0xff] (!%p220_p3)  ;;  %v311_v2 = vld [vmem:[%s1393_s1 + $0x8] sm:$0xff] (!%p220_p3)  ;;  %vm340_vm0 = vcmask (!%p220_p3), 1043456   ;;  %vm327_vm1 = vcmask (!%p220_p3), 64512  }
   0x7   : > { %223 = sbr.rel (%p220_p3) target bundleno = 506 (0x1fa), region = 36  ;;  %379 = vmatprep.mubr.bf16.mxu0 (!%p220_p3), %v1113_v0  ;;  %476 = vmatprep.mubr.bf16.mxu1 (!%p220_p3), %v1113_v0  ;;  %v420_v3 = vld [vmem:[%s1394_s2] sm:$0xff] (!%p220_p3)  ;;  %v421_v4 = vld [vmem:[%s1394_s2 + $0x8] sm:$0xff] (!%p220_p3)  ;;  %v318_v13 = vpack.c.bf16 (!%p220_p3), %v311_v2, %v310_v1  ;;  %v312_v17 = vld [vmem:[%s1393_s1 + $0x10] sm:$0xff] (!%p220_p3)  ;;  %vm300_vm2 = vcmask (!%p220_p3), 7168   ;;  %v1114_v37 = vmov (!%p220_p3), 0.0  }
   0x8   : > { %1054 = vset.pattern.permute.xlu1 (!%p220_p3), %v1113_v0  ;;  %1053 = vset.pattern.permute.xlu0 (!%p220_p3), %v1113_v0  ;;  %v428_v14 = vpack.c.bf16 (!%p220_p3), %v421_v4, %v420_v3  ;;  %v313_v18 = vld [vmem:[%s1393_s1 + $0x18] sm:$0xff] (!%p220_p3)  ;;  %v422_v19 = vld [vmem:[%s1394_s2 + $0x10] sm:$0xff] (!%p220_p3)  ;;  %v314_v25 = vld [vmem:[%s1393_s1 + $0x20] sm:$0xff] (!%p220_p3)  ;;  %vm291_vm3 = vcmask (!%p220_p3), 130048  }
   0x9   : > { %v423_v20 = vld [vmem:[%s1394_s2 + $0x18] sm:$0xff] (!%p220_p3)  ;;  %v319_v23 = vpack.c.bf16 (!%p220_p3), %v313_v18, %v312_v17  ;;  %v315_v26 = vld [vmem:[%s1393_s1 + $0x28] sm:$0xff] (!%p220_p3)  ;;  %v424_v27 = vld [vmem:[%s1394_s2 + $0x20] sm:$0xff] (!%p220_p3) }
   0xa   : > { %v429_v24 = vpack.c.bf16 (!%p220_p3), %v423_v20, %v422_v19  ;;  %v425_v28 = vld [vmem:[%s1394_s2 + $0x28] sm:$0xff] (!%p220_p3)  ;;  %v320_v29 = vpack.c.bf16 (!%p220_p3), %v315_v26, %v314_v25  ;;  %v316_v31 = vld [vmem:[%s1393_s1 + $0x30] sm:$0xff] (!%p220_p3)  ;;  %v317_v32 = vld [vmem:[%s1393_s1 + $0x38] sm:$0xff] (!%p220_p3) }
   0xb   : > { %v430_v30 = vpack.c.bf16 (!%p220_p3), %v425_v28, %v424_v27  ;;  %v426_v33 = vld [vmem:[%s1394_s2 + $0x30] sm:$0xff] (!%p220_p3)  ;;  %v427_v34 = vld [vmem:[%s1394_s2 + $0x38] sm:$0xff] (!%p220_p3)  ;;  %v321_v35 = vpack.c.bf16 (!%p220_p3), %v317_v32, %v316_v31 }
   0xc   : > { %v431_v36 = vpack.c.bf16 (!%p220_p3), %v427_v34, %v426_v33 }
   0xe   : > { %s1403_s18 = smov (!%p262_p4, %s1103_s18), 1 }
   0xf   : > { %s1023_s22 = sshll.u32 %s1403_s18, 3  ;;  %s1167_s23 = sshll.u32 %s1403_s18, 6 }
  0x10   : > { %s269_s28 = scalar_lea.vmem %s1392_s0, %s1023_s22  ;;  %s1179_s6 = scalar_lea.vmem %s1395_s3, %s1167_s23 }
  0x11   : > { %v309_v5 = vld [vmem:[%s269_s28] sm:$0xff]  ;;  %v519_v6 = vld [vmem:[%s1179_s6 + $0x10] sm:$0xff]  ;;  %v520_v10 = vld [vmem:[%s1179_s6 + $0x18] sm:$0xff]  ;;  %s1252_s18 = scalar_lea.vmem %s1397_s5, %s1167_s23  ;;  %s1309_s25 = scalar_lea.vmem %s1396_s4, %s1167_s23 }
  0x12   : > { %v517_v7 = vld [vmem:[%s1179_s6] sm:$0xff]  ;;  %v998_v8 = vcombine.high %v309_v5, %v309_v5  ;;  %v997_v9 = vcombine.low %v309_v5, %v309_v5  ;;  %537 = vperm.xlu1 %1054, %v519_v6   ;;  %v518_v11 = vld [vmem:[%s1179_s6 + $0x8] sm:$0xff]  ;;  %v524_v21 = vld [vmem:[%s1179_s6 + $0x38] sm:$0xff]  ;;  %301 = vst.msk [vmem:[%s1252_s18] sm:$0xff] %vm300_vm2, %v1114_v37 }
  0x13   : > { %527 = vperm.xlu0 %1053, %v517_v7   ;;  %v522_v15 = vld [vmem:[%s1179_s6 + $0x28] sm:$0xff]  ;;  %v521_v16 = vld [vmem:[%s1179_s6 + $0x20] sm:$0xff]  ;;  %v523_v22 = vld [vmem:[%s1179_s6 + $0x30] sm:$0xff]  ;;  %302 = vst.msk [vmem:[%s1252_s18 + $0x8] sm:$0xff] %vm300_vm2, %v1114_v37 }
  0x14   : > { %999 = vmatprep.subr.msk.bf16.mxu0 %vm340_vm0, %v998_v8  ;;  %v342_v12 = vsel %vm340_vm0, %v997_v9, 0  ;;  %1004 = vmatprep.subr.msk.bf16.mxu1 %vm340_vm0, %v998_v8  ;;  %303 = vst.msk [vmem:[%s1252_s18 + $0x10] sm:$0xff] %vm300_vm2, %v1114_v37  ;;  %304 = vst.msk [vmem:[%s1252_s18 + $0x18] sm:$0xff] %vm300_vm2, %v1114_v37 }
  0x15   : > { %348 = vmatpush1.bf16.msra.mxu0 %v342_v12  ;;  %445 = vmatpush1.bf16.msra.mxu1 %v342_v12  ;;  %305 = vst.msk [vmem:[%s1252_s18 + $0x20] sm:$0xff] %vm300_vm2, %v1114_v37  ;;  %306 = vst.msk [vmem:[%s1252_s18 + $0x28] sm:$0xff] %vm300_vm2, %v1114_v37 }
  0x16   : > { %542 = vperm.xlu1 %1054, %v520_v10   ;;  %307 = vst.msk [vmem:[%s1252_s18 + $0x30] sm:$0xff] %vm300_vm2, %v1114_v37  ;;  %308 = vst.msk [vmem:[%s1252_s18 + $0x38] sm:$0xff] %vm300_vm2, %v1114_v37 }
  0x17   : > { %532 = vperm.xlu0 %1053, %v518_v11   ;;  %292 = vst.msk [vmem:[%s1309_s25] sm:$0xff] %vm291_vm3, %v1114_v37  ;;  %293 = vst.msk [vmem:[%s1309_s25 + $0x8] sm:$0xff] %vm291_vm3, %v1114_v37 }
  0x18   : > { %1000 = vmatmul.mubr.msk.bf16.vlgmr.msra.gmra.mrb[0].mxu0 %vm327_vm1, %v318_v13  ;;  %1005 = vmatmul.mubr.msk.bf16.vlgmr.msra.gmra.mrb[0].mxu1 %vm327_vm1, %v428_v14  ;;  %294 = vst.msk [vmem:[%s1309_s25 + $0x10] sm:$0xff] %vm291_vm3, %v1114_v37  ;;  %295 = vst.msk [vmem:[%s1309_s25 + $0x18] sm:$0xff] %vm291_vm3, %v1114_v37 }
  0x19   : > { %389 = vmatprep.mubr.bf16.mxu0 %v1113_v0  ;;  %486 = vmatprep.mubr.bf16.mxu1 %v1113_v0  ;;  %296 = vst.msk [vmem:[%s1309_s25 + $0x20] sm:$0xff] %vm291_vm3, %v1114_v37  ;;  %297 = vst.msk [vmem:[%s1309_s25 + $0x28] sm:$0xff] %vm291_vm3, %v1114_v37 }
  0x1a   : > { %552 = vperm.xlu1 %1054, %v522_v15   ;;  %298 = vst.msk [vmem:[%s1309_s25 + $0x30] sm:$0xff] %vm291_vm3, %v1114_v37  ;;  %299 = vst.msk [vmem:[%s1309_s25 + $0x38] sm:$0xff] %vm291_vm3, %v1114_v37 }
  0x1b   : > { %547 = vperm.xlu0 %1053, %v521_v16   ;;  %v616_v37 = vld [vmem:[%s1252_s18 + $0x18] sm:$0xff] }
  0x1e   : > { %562 = vperm.xlu1 %1054, %v524_v21  }
  0x1f   : > { %557 = vperm.xlu0 %1053, %v523_v22  }
  0x20   : > { %1001 = vmatmul.mubr.msk.bf16.gmra.mrb[4].mxu0 %vm327_vm1, %v319_v23  ;;  %1006 = vmatmul.mubr.msk.bf16.gmra.mrb[4].mxu1 %vm327_vm1, %v429_v24 }
  0x21   : > { %399 = vmatprep.mubr.bf16.mxu0 %v1113_v0  ;;  %496 = vmatprep.mubr.bf16.mxu1 %v1113_v0 }
  0x28   : > { %1002 = vmatmul.mubr.msk.bf16.gmra.mrb[8].mxu0 %vm327_vm1, %v320_v29  ;;  %1007 = vmatmul.mubr.msk.bf16.gmra.mrb[8].mxu1 %vm327_vm1, %v430_v30 }
  0x29   : > { %409 = vmatprep.mubr.bf16.mxu0 %v1113_v0  ;;  %506 = vmatprep.mubr.bf16.mxu1 %v1113_v0 }
  0x30   : > { %1003 = vmatmul.mubr.msk.bf16.gmra.mrb[12].mxu0 %vm327_vm1, %v321_v35  ;;  %1008 = vmatmul.mubr.msk.bf16.gmra.mrb[12].mxu1 %vm327_vm1, %v431_v36 }
  0x91   : > { %v538_v39 = vpop.permute.xlu1 %537 }
  0x92   : > { %v528_v38 = vpop.permute.xlu0 %527 }
  0x95   : > { %v543_v59 = vpop.permute.xlu1 %542 }
  0x96   : > { %v533_v40 = vpop.permute.xlu0 %532 }
  0x99   : > { %v553_v15 = vpop.permute.xlu1 %552 }
  0x9a   : > { %v548_v16 = vpop.permute.xlu0 %547 }
  0xeb   : > { %v381_v41 = vpop.f32.mrb[0].mxu0  ;;  %v1278_v42 = vpop.f32.mrb[0].mxu1 }
  0xec   : > { %v565_v43 = vsub.f32 %v381_v41, %v528_v38  ;;  %v383_v44 = vpop.f32.mrb[1].mxu0  ;;  %v480_v45 = vpop.f32.mrb[1].mxu1 }
  0xed   : > { %v566_v46 = vsub.f32 %v383_v44, %v528_v38  ;;  %v385_v47 = vpop.f32.mrb[2].mxu0  ;;  %v1280_v48 = vpop.f32.mrb[2].mxu1 }
  0xee   : > { %v581_v49 = vmul.f32 1.442695, %v565_v43  ;;  %v567_v50 = vsub.f32 %v385_v47, %v533_v40  ;;  %v387_v51 = vpop.f32.mrb[3].mxu0  ;;  %v670_v52 = vpack.c.bf16 %v1280_v48, %v1278_v42  ;;  %v484_v53 = vpop.f32.mrb[3].mxu1 }
  0xef   : > { %v583_v54 = vmul.f32 1.442695, %v566_v46  ;;  %v568_v55 = vsub.f32 %v387_v51, %v533_v40  ;;  %v671_v56 = vpack.c.bf16 %v484_v53, %v480_v45  ;;  %v563_v45 = vpop.permute.xlu1 %562  ;;  %v558_v46 = vpop.permute.xlu0 %557 }
  0xf0   : > { %1057 = vpow2.f32 %v581_v49  ;;  %v585_v57 = vmul.f32 1.442695, %v567_v50 }
  0xf1   : > { %1059 = vpow2.f32 %v583_v54  ;;  %v587_v58 = vmul.f32 1.442695, %v568_v55  ;;  %712 = vmatprep.mubr.bf16.mxu0 %v671_v56 }
  0xf2   : > { %1061 = vpow2.f32 %v585_v57 }
  0xf3   : > { %1063 = vpow2.f32 %v587_v58  ;;  %v391_v60 = vpop.f32.mrb[4].mxu0  ;;  %v1284_v61 = vpop.f32.mrb[4].mxu1 }
  0xf4   : > { %v569_v62 = vsub.f32 %v391_v60, %v538_v39  ;;  %v393_v63 = vpop.f32.mrb[5].mxu0  ;;  %v490_v0 = vpop.f32.mrb[5].mxu1 }
  0xf5   : > { %v570_v1 = vsub.f32 %v393_v63, %v538_v39  ;;  %v395_v2 = vpop.f32.mrb[6].mxu0  ;;  %v1286_v3 = vpop.f32.mrb[6].mxu1 }
  0xf6   : > { %v589_v4 = vmul.f32 1.442695, %v569_v62  ;;  %v571_v5 = vsub.f32 %v395_v2, %v543_v59  ;;  %v397_v6 = vpop.f32.mrb[7].mxu0  ;;  %v672_v7 = vpack.c.bf16 %v1286_v3, %v1284_v61  ;;  %v494_v8 = vpop.f32.mrb[7].mxu1  ;;  %v613_v61 = vld [vmem:[%s1252_s18] sm:$0xff] }
  0xf7   : > { %v591_v9 = vmul.f32 1.442695, %v570_v1  ;;  %v572_v10 = vsub.f32 %v397_v6, %v543_v59  ;;  %v673_v11 = vpack.c.bf16 %v494_v8, %v490_v0 }
  0xf8   : > { %1065 = vpow2.f32 %v589_v4  ;;  %v593_v12 = vmul.f32 1.442695, %v571_v5 }
  0xf9   : > { %1067 = vpow2.f32 %v591_v9  ;;  %v595_v13 = vmul.f32 1.442695, %v572_v10  ;;  %761 = vmatprep.mubr.bf16.mxu1 %v673_v11 }
  0xfa   : > { %v1058_v14 = vpop.eup %1057  ;;  %1069 = vpow2.f32 %v593_v12 }
  0xfb   : > { %v1060_v17 = vpop.eup %1059  ;;  %1071 = vpow2.f32 %v595_v13  ;;  %v401_v18 = vpop.f32.mrb[8].mxu0 }
  0xfc   : > { %v1290_v19 = vpop.f32.mrb[8].mxu1  ;;  %v1062_v20 = vpop.eup %1061  ;;  %v573_v21 = vsub.f32 %v401_v18, %v548_v16  ;;  %v621_v23 = vadd.f32 %v1060_v17, %v1058_v14 }
  0xfd   : > { %v403_v22 = vpop.f32.mrb[9].mxu0  ;;  %v500_v24 = vpop.f32.mrb[9].mxu1  ;;  %v662_v28 = vpack.c.bf16 %v1062_v20, %v1058_v14 }
  0xfe   : > { %v1064_v25 = vpop.eup %1063  ;;  %v574_v26 = vsub.f32 %v403_v22, %v548_v16  ;;  %v405_v27 = vpop.f32.mrb[10].mxu0  ;;  %v597_v30 = vmul.f32 1.442695, %v573_v21  ;;  %622 = vadd.xlane.f32.xlu0 %v621_v23 }
  0xff   : > { %v1292_v29 = vpop.f32.mrb[10].mxu1  ;;  %v575_v31 = vsub.f32 %v405_v27, %v553_v15  ;;  %v407_v32 = vpop.f32.mrb[11].mxu0  ;;  %v663_v33 = vpack.c.bf16 %v1064_v25, %v1060_v17  ;;  %v624_v34 = vadd.f32 %v1064_v25, %v1062_v20 }
 0x100   : > { %v504_v35 = vpop.f32.mrb[11].mxu1  ;;  %v599_v36 = vmul.f32 1.442695, %v574_v26  ;;  %v576_v38 = vsub.f32 %v407_v32, %v553_v15  ;;  %v674_v39 = vpack.c.bf16 %v1292_v29, %v1290_v19  ;;  %1073 = vpow2.f32 %v597_v30  ;;  %v615_v29 = vld [vmem:[%s1252_s18 + $0x10] sm:$0xff] }
 0x101   : > { %v675_v40 = vpack.c.bf16 %v504_v35, %v500_v24  ;;  %v601_v41 = vmul.f32 1.442695, %v575_v31  ;;  %680 = vmatprep.subr.bf16.mxu0 %v663_v33  ;;  %625 = vadd.xlane.f32.xlu1 %v624_v34  ;;  %v617_v34 = vld [vmem:[%s1252_s18 + $0x20] sm:$0xff] }
 0x102   : > { %1075 = vpow2.f32 %v599_v36  ;;  %v603_v43 = vmul.f32 1.442695, %v576_v38  ;;  %681 = vmatpush1.bf16.xpose.msra.mxu0 %v662_v28  ;;  %v1066_v44 = vpop.eup %1065  ;;  %v618_v36 = vld [vmem:[%s1252_s18 + $0x28] sm:$0xff] }
 0x103   : > { %1077 = vpow2.f32 %v601_v41  ;;  %v1068_v47 = vpop.eup %1067  ;;  %v411_v49 = vpop.f32.mrb[12].mxu0  ;;  %v619_v41 = vld [vmem:[%s1252_s18 + $0x30] sm:$0xff] }
 0x104   : > { %1079 = vpow2.f32 %v603_v43  ;;  %v508_v50 = vpop.f32.mrb[12].mxu1  ;;  %v1070_v51 = vpop.eup %1069  ;;  %v577_v53 = vsub.f32 %v411_v49, %v558_v46  ;;  %v627_v55 = vadd.f32 %v1068_v47, %v1066_v44  ;;  %v678_v49 = vld [vmem:[%s1309_s25] sm:$0xff] }
 0x105   : > { %v413_v54 = vpop.f32.mrb[13].mxu0  ;;  %v510_v56 = vpop.f32.mrb[13].mxu1  ;;  %v664_v60 = vpack.c.bf16 %v1070_v51, %v1066_v44  ;;  %v620_v44 = vld [vmem:[%s1252_s18 + $0x38] sm:$0xff] }
 0x106   : > { %v1072_v57 = vpop.eup %1071  ;;  %v578_v58 = vsub.f32 %v413_v54, %v558_v46  ;;  %v415_v59 = vpop.f32.mrb[14].mxu0  ;;  %v605_v63 = vmul.f32 1.442695, %v577_v53  ;;  %628 = vadd.xlane.f32.xlu0 %v627_v55 }
 0x107   : > { %v512_v62 = vpop.f32.mrb[14].mxu1  ;;  %v579_v0 = vsub.f32 %v415_v59, %v563_v45  ;;  %v417_v1 = vpop.f32.mrb[15].mxu0  ;;  %v665_v2 = vpack.c.bf16 %v1072_v57, %v1068_v47  ;;  %v630_v4 = vadd.f32 %v1072_v57, %v1070_v51  ;;  %v679_v51 = vld [vmem:[%s1309_s25 + $0x8] sm:$0xff] }
 0x108   : > { %v514_v5 = vpop.f32.mrb[15].mxu1  ;;  %v607_v6 = vmul.f32 1.442695, %v578_v58  ;;  %v580_v8 = vsub.f32 %v417_v1, %v563_v45  ;;  %v676_v9 = vpack.c.bf16 %v512_v62, %v508_v50  ;;  %1081 = vpow2.f32 %v605_v63  ;;  %v1009_v58 = vld [vmem:[%s1309_s25 + $0x10] sm:$0xff] }
 0x109   : > { %v677_v10 = vpack.c.bf16 %v514_v5, %v510_v56  ;;  %v609_v11 = vmul.f32 1.442695, %v579_v0  ;;  %729 = vmatprep.subr.bf16.mxu1 %v665_v2  ;;  %713 = vmatmul.mubr.bf16.vlgmr.msra.gmra.mrb[16].mxu0 %v670_v52 }
 0x10a   : > { %1083 = vpow2.f32 %v607_v6  ;;  %v611_v12 = vmul.f32 1.442695, %v580_v8  ;;  %730 = vmatpush1.bf16.xpose.msra.mxu1 %v664_v60  ;;  %809 = vmatprep.mubr.bf16.mxu0 %v675_v40  ;;  %v1074_v13 = vpop.eup %1073  ;;  %v1010_v60 = vld [vmem:[%s1309_s25 + $0x18] sm:$0xff]  ;;  %v1014_v6 = vld [vmem:[%s1309_s25 + $0x28] sm:$0xff] }
 0x10b   : > { %1085 = vpow2.f32 %v609_v11  ;;  %631 = vadd.xlane.f32.xlu0 %v630_v4  ;;  %v1013_v4 = vld [vmem:[%s1309_s25 + $0x20] sm:$0xff] }
 0x10c   : > { %v1076_v14 = vpop.eup %1075  ;;  %1087 = vpow2.f32 %v611_v12 }
 0x10d   : > { %v1078_v15 = vpop.eup %1077  ;;  %v633_v16 = vadd.f32 %v1076_v14, %v1074_v13 }
 0x10e   : > { %v1080_v17 = vpop.eup %1079  ;;  %v666_v18 = vpack.c.bf16 %v1078_v15, %v1074_v13  ;;  %v1017_v13 = vld [vmem:[%s1309_s25 + $0x30] sm:$0xff] }
 0x10f   : > { %634 = vadd.xlane.f32.xlu1 %v633_v16  ;;  %v667_v20 = vpack.c.bf16 %v1080_v17, %v1076_v14  ;;  %v636_v21 = vadd.f32 %v1080_v17, %v1078_v15  ;;  %v1018_v15 = vld [vmem:[%s1309_s25 + $0x38] sm:$0xff] }
 0x111   : > { %777 = vmatprep.subr.bf16.mxu0 %v667_v20  ;;  %637 = vadd.xlane.f32.xlu0 %v636_v21 }
 0x112   : > { %778 = vmatpush1.bf16.xpose.msra.mxu0 %v666_v18  ;;  %762 = vmatmul.mubr.bf16.vlgmr.msra.gmra.mrb[16].mxu1 %v672_v7  ;;  %v1082_v42 = vpop.eup %1081  ;;  %v614_v7 = vld [vmem:[%s1252_s18 + $0x8] sm:$0xff] }
 0x113   : > { %857 = vmatprep.mubr.bf16.mxu1 %v677_v10 }
 0x114   : > { %v1084_v48 = vpop.eup %1083 }
 0x115   : > { %v1086_v52 = vpop.eup %1085  ;;  %v639_v22 = vadd.f32 %v1084_v48, %v1082_v42 }
 0x116   : > { %v1088_v23 = vpop.eup %1087  ;;  %v668_v24 = vpack.c.bf16 %v1086_v52, %v1082_v42 }
 0x117   : > { %640 = vadd.xlane.f32.xlu1 %v639_v22  ;;  %v669_v25 = vpack.c.bf16 %v1088_v23, %v1084_v48  ;;  %v642_v26 = vadd.f32 %v1088_v23, %v1086_v52 }
 0x119   : > { %825 = vmatprep.subr.bf16.mxu1 %v669_v25  ;;  %643 = vadd.xlane.f32.xlu0 %v642_v26 }
 0x11a   : > { %826 = vmatpush1.bf16.xpose.msra.mxu1 %v668_v24  ;;  %810 = vmatmul.mubr.bf16.vlgmr.msra.gmra.mrb[20].mxu0 %v674_v39 }
 0x121   : > { %858 = vmatmul.mubr.bf16.vlgmr.msra.gmra.mrb[20].mxu1 %v676_v9 }
 0x18b   : > { %v623_v3 = vpop.xlane.xlu0 %622 }
 0x18c   : > { %v645_v19 = vadd.f32 %v623_v3, %v613_v61 }
 0x18e   : > { %v626_v27 = vpop.xlane.xlu1 %625  ;;  %654 = vst.msk [vmem:[%s1252_s18] sm:$0xff] %vm300_vm2, %v645_v19 }
 0x18f   : > { %v646_v28 = vadd.f32 %v626_v27, %v614_v7 }
 0x191   : > { %655 = vst.msk [vmem:[%s1252_s18 + $0x8] sm:$0xff] %vm300_vm2, %v646_v28 }
 0x193   : > { %v629_v30 = vpop.xlane.xlu0 %628 }
 0x194   : > { %v647_v31 = vadd.f32 %v629_v30, %v615_v29 }
 0x196   : > { %656 = vst.msk [vmem:[%s1252_s18 + $0x10] sm:$0xff] %vm300_vm2, %v647_v31 }
 0x198   : > { %v632_v32 = vpop.xlane.xlu0 %631 }
 0x199   : > { %v648_v33 = vadd.f32 %v632_v32, %v616_v37 }
 0x19b   : > { %657 = vst.msk [vmem:[%s1252_s18 + $0x18] sm:$0xff] %vm300_vm2, %v648_v33 }
 0x19c   : > { %v635_v35 = vpop.xlane.xlu1 %634 }
 0x19d   : > { %v649_v38 = vadd.f32 %v635_v35, %v617_v34 }
 0x19e   : > { %v638_v39 = vpop.xlane.xlu0 %637 }
 0x19f   : > { %658 = vst.msk [vmem:[%s1252_s18 + $0x20] sm:$0xff] %vm300_vm2, %v649_v38  ;;  %v650_v40 = vadd.f32 %v638_v39, %v618_v36 }
 0x1a1   : > { %659 = vst.msk [vmem:[%s1252_s18 + $0x28] sm:$0xff] %vm300_vm2, %v650_v40 }
 0x1a4   : > { %v641_v43 = vpop.xlane.xlu1 %640 }
 0x1a5   : > { %v651_v45 = vadd.f32 %v641_v43, %v619_v41 }
 0x1a6   : > { %v644_v46 = vpop.xlane.xlu0 %643 }
 0x1a7   : > { %660 = vst.msk [vmem:[%s1252_s18 + $0x30] sm:$0xff] %vm300_vm2, %v651_v45  ;;  %v652_v47 = vadd.f32 %v644_v46, %v620_v44 }
 0x1a9   : > { %661 = vst.msk [vmem:[%s1252_s18 + $0x38] sm:$0xff] %vm300_vm2, %v652_v47 }
 0x1dc   : > { %v714_v50 = vpop.f32.mrb[16].mxu0 }
 0x1dd   : > { %v721_v53 = vadd.f32 %v714_v50, %v678_v49  ;;  %v716_v54 = vpop.f32.mrb[17].mxu0 }
 0x1de   : > { %v717_v55 = vpop.f32.mrb[18].mxu0 }
 0x1df   : > { %724 = vst.msk [vmem:[%s1309_s25] sm:$0xff] %vm291_vm3, %v721_v53  ;;  %v722_v56 = vadd.f32 %v717_v55, %v679_v51  ;;  %v719_v57 = vpop.f32.mrb[19].mxu0 }
 0x1e1   : > { %725 = vst.msk [vmem:[%s1309_s25 + $0x8] sm:$0xff] %vm291_vm3, %v722_v56 }
 0x1e5   : > { %v763_v59 = vpop.f32.mrb[16].mxu1 }
 0x1e6   : > { %v770_v62 = vadd.f32 %v1009_v58, %v763_v59  ;;  %v765_v63 = vpop.f32.mrb[17].mxu1 }
 0x1e7   : > { %v766_v0 = vpop.f32.mrb[18].mxu1 }
 0x1e8   : > { %1011 = vst.msk [vmem:[%s1309_s25 + $0x10] sm:$0xff] %vm291_vm3, %v770_v62  ;;  %v771_v1 = vadd.f32 %v1010_v60, %v766_v0  ;;  %v768_v2 = vpop.f32.mrb[19].mxu1 }
 0x1ea   : > { %1012 = vst.msk [vmem:[%s1309_s25 + $0x18] sm:$0xff] %vm291_vm3, %v771_v1 }
 0x1ed   : > { %v811_v5 = vpop.f32.mrb[20].mxu0 }
 0x1ee   : > { %v818_v8 = vadd.f32 %v1013_v4, %v811_v5  ;;  %v813_v9 = vpop.f32.mrb[21].mxu0 }
 0x1ef   : > { %v814_v10 = vpop.f32.mrb[22].mxu0 }
 0x1f0   : > { %1015 = vst.msk [vmem:[%s1309_s25 + $0x20] sm:$0xff] %vm291_vm3, %v818_v8  ;;  %v819_v11 = vadd.f32 %v1014_v6, %v814_v10  ;;  %v816_v12 = vpop.f32.mrb[23].mxu0 }
 0x1f2   : > { %1016 = vst.msk [vmem:[%s1309_s25 + $0x28] sm:$0xff] %vm291_vm3, %v819_v11 }
 0x1f4   : > { %v859_v14 = vpop.f32.mrb[20].mxu1 }
 0x1f5   : > { %v866_v16 = vadd.f32 %v1017_v13, %v859_v14  ;;  %v861_v17 = vpop.f32.mrb[21].mxu1 }
 0x1f6   : > { %v862_v18 = vpop.f32.mrb[22].mxu1 }
 0x1f7   : > { %1019 = vst.msk [vmem:[%s1309_s25 + $0x30] sm:$0xff] %vm291_vm3, %v866_v16  ;;  %v867_v20 = vadd.f32 %v1018_v15, %v862_v18  ;;  %v864_v21 = vpop.f32.mrb[23].mxu1 }
 0x1f9   : > { %1020 = vst.msk [vmem:[%s1309_s25 + $0x38] sm:$0xff] %vm291_vm3, %v867_v20 }
 0x1fa PF: > { %s16_s20 = sadd.s32 1, %s1111_s20   ;;  %s1398_s18 = smov %s1107_s19 }
 0x1fb   : > { %p13_p5 = scmp.ge.s32.totalorder %s16_s20, 4   ;;  %s1399_s19 = smov %s1401_s21 }
 0x1fd   :  { %15 = sbr.rel (!%p13_p5) target bundleno = 2 (0x2), region = 88 }

// kernel: linear_attention_forward.4
= control target key start
LH: loop header
LB: loop body
LE: loop exit
PB: predicated region body
PF: predicated region fallthrough
CT: control target
= control target key end

     0   :  { %s1961_s9 = smov 0   ;;  %s3296_s0 = inlined_call_operand.vmem [shape: f32[2,8,18,18], index: 0, kind: input, shape index: {}]   ;;  %s3297_s1 = inlined_call_operand.vmem [shape: f32[8,3,3], index: 1, kind: input, shape index: {}]   ;;  %s3298_s2 = inlined_call_operand.vmem [shape: bf16[2,8,16,16], index: 2, kind: output, shape index: {}]  }
   0x1 LB: > { %s1722_s10 = sadd.s32 4294967295, %s1942_s9   ;;  %p1726_p0 = scmp.ge.s32.totalorder %s1942_s9, 1  ;;  %s1942_s9 = sphi %s1961_s9, %s12_s9  }
   0x2   : > { %p112_p1 = scmp.lt.s32.totalorder %s1942_s9, 3 }
   0x4   : > { %p113_p2 = pnand %p1726_p0, %p112_p1 }
   0x6   : > { %116 = sbr.rel (%p113_p2) target bundleno = 501 (0x1f5), region = 28 }
   0xd   : > { %v168_v0 = vld [vmem:[%s3297_s1] sm:$0x7]  ;;  %s1944_s13 = smov 127   ;;  %v169_v1 = vld [vmem:[%s3297_s1 + $0x4] sm:$0x7]  ;;  %s1945_s28 = smov 126  }
   0xe   : > { %240 = vrot.lane.b32.xlu0 %v168_v0, %s1944_s13  ;;  %v170_v2 = vld [vmem:[%s3297_s1 + $0x8] sm:$0x7]  ;;  %1766 = vpush %v168_v0  ;;  %v171_v3 = vld [vmem:[%s3297_s1 + $0xc] sm:$0x7]  ;;  %v172_v4 = vld [vmem:[%s3297_s1 + $0x10] sm:$0x7] }
   0xf   : > { %244 = vrot.lane.b32.xlu1 %v170_v2, %s1944_s13  ;;  %1768 = vpush %v169_v1  ;;  %v173_v5 = vld [vmem:[%s3297_s1 + $0x14] sm:$0x7]  ;;  %v174_v6 = vld [vmem:[%s3297_s1 + $0x18] sm:$0x7]  ;;  %v175_v7 = vld [vmem:[%s3297_s1 + $0x1c] sm:$0x7] }
  0x10   : > { %1770 = vpush %v170_v2  ;;  %v2008_v8 = vrot.slane %v168_v0, 1  ;;  %v2011_v9 = vrot.slane %v169_v1, 1  ;;  %v2015_v10 = vrot.slane %v170_v2, 1  ;;  %v2019_v11 = vrot.slane %v171_v3, 1  ;;  %p134_p3 = scmp.lt.s32.totalorder %s1722_s10, 1 }
  0x11   : > { %1772 = vpush %v171_v3  ;;  %v2023_v12 = vrot.slane %v172_v4, 1  ;;  %v2027_v13 = vrot.slane %v173_v5, 1  ;;  %v2031_v14 = vrot.slane %v174_v6, 1  ;;  %v2035_v15 = vrot.slane %v175_v7, 1 }
  0x12   : > { %242 = vrot.lane.b32.xlu0 %v169_v1, %s1944_s13  ;;  %1774 = vpush %v172_v4  ;;  %v2055_v16 = vrot.slane %v168_v0, 2  ;;  %v2059_v17 = vrot.slane %v169_v1, 2  ;;  %v2063_v18 = vrot.slane %v170_v2, 2  ;;  %v2067_v19 = vrot.slane %v171_v3, 2  ;;  %s3490_s10 = smov (!%p134_p3, %s1722_s10), 1 }
  0x13   : > { %246 = vrot.lane.b32.xlu1 %v171_v3, %s1944_s13  ;;  %1776 = vpush %v173_v5  ;;  %v2071_v20 = vrot.slane %v172_v4, 2  ;;  %v2075_v21 = vrot.slane %v173_v5, 2  ;;  %v2079_v22 = vrot.slane %v174_v6, 2  ;;  %v2083_v23 = vrot.slane %v175_v7, 2  ;;  %s1765_s5 = smul.u32 192, %s3490_s10 }
  0x14   : > { %1778 = vpush %v174_v6  ;;  %vm592_vm0 = vcmask 1046528   ;;  %vm1129_vm1 = vcmask 1045504   ;;  %vm1650_vm2 = vcmask 125952  }
  0x15   : > { %1780 = vpush %v175_v7  ;;  %s2135_s12 = scalar_lea.vmem %s3296_s0, %s1765_s5 }
  0x16   : > { %248 = vrot.lane.b32.xlu0 %v172_v4, %s1944_s13  ;;  %v2142_v49 = vld [vmem:[%s2135_s12] sm:$0xff]  ;;  %v2145_v50 = vld [vmem:[%s2135_s12 + $0x8] sm:$0xff]  ;;  %v2152_v57 = vld [vmem:[%s2135_s12 + $0x18] sm:$0xff] }
  0x17   : > { %250 = vrot.lane.b32.xlu1 %v173_v5, %s1944_s13  ;;  %v2155_v58 = vld [vmem:[%s2135_s12 + $0x20] sm:$0xff] }
  0x1a   : > { %252 = vrot.lane.b32.xlu0 %v174_v6, %s1944_s13 }
  0x1b   : > { %254 = vrot.lane.b32.xlu1 %v175_v7, %s1944_s13 }
  0x1e   : > { %376 = vrot.lane.b32.xlu0 %v168_v0, %s1945_s28  ;;  %v2160_v0 = vld [vmem:[%s2135_s12 + $0x30] sm:$0xff] }
  0x1f   : > { %378 = vrot.lane.b32.xlu1 %v169_v1, %s1945_s28  ;;  %v2163_v1 = vld [vmem:[%s2135_s12 + $0x38] sm:$0xff] }
  0x22   : > { %380 = vrot.lane.b32.xlu0 %v170_v2, %s1945_s28 }
  0x23   : > { %382 = vrot.lane.b32.xlu1 %v171_v3, %s1945_s28 }
  0x26   : > { %384 = vrot.lane.b32.xlu0 %v172_v4, %s1945_s28 }
  0x27   : > { %386 = vrot.lane.b32.xlu1 %v173_v5, %s1945_s28 }
  0x2a   : > { %388 = vrot.lane.b32.xlu0 %v174_v6, %s1945_s28 }
  0x2b   : > { %390 = vrot.lane.b32.xlu1 %v175_v7, %s1945_s28  ;;  %v2170_v7 = vld [vmem:[%s2135_s12 + $0x48] sm:$0xff] }
  0x2e   : > { %665 = vrot.lane.b32.xlu0 %v2008_v8, %s1944_s13 }
  0x2f   : > { %667 = vrot.lane.b32.xlu1 %v2011_v9, %s1944_s13 }
  0x32   : > { %669 = vrot.lane.b32.xlu0 %v2015_v10, %s1944_s13 }
  0x33   : > { %671 = vrot.lane.b32.xlu1 %v2019_v11, %s1944_s13 }
  0x36   : > { %673 = vrot.lane.b32.xlu0 %v2023_v12, %s1944_s13 }
  0x37   : > { %675 = vrot.lane.b32.xlu1 %v2027_v13, %s1944_s13 }
  0x3a   : > { %677 = vrot.lane.b32.xlu0 %v2031_v14, %s1944_s13 }
  0x3b   : > { %679 = vrot.lane.b32.xlu1 %v2035_v15, %s1944_s13 }
  0x3e   : > { %857 = vrot.lane.b32.xlu0 %v2008_v8, %s1945_s28 }
  0x3f   : > { %859 = vrot.lane.b32.xlu1 %v2011_v9, %s1945_s28  ;;  %s2110_s29 = spop %1766 }
  0x40   : > { %s2114_s30 = spop %1768 }
  0x41   : > { %s2122_s3 = spop %1770 }
  0x42   : > { %861 = vrot.lane.b32.xlu0 %v2015_v10, %s1945_s28  ;;  %s2125_s4 = spop %1772 }
  0x43   : > { %863 = vrot.lane.b32.xlu1 %v2019_v11, %s1945_s28  ;;  %s2128_s6 = spop %1774 }
  0x44   : > { %s2130_s7 = spop %1776 }
  0x45   : > { %s2137_s14 = spop %1778 }
  0x46   : > { %865 = vrot.lane.b32.xlu0 %v2023_v12, %s1945_s28  ;;  %s2139_s15 = spop %1780 }
  0x47   : > { %867 = vrot.lane.b32.xlu1 %v2027_v13, %s1945_s28 }
  0x4a   : > { %869 = vrot.lane.b32.xlu0 %v2031_v14, %s1945_s28 }
  0x4b   : > { %871 = vrot.lane.b32.xlu1 %v2035_v15, %s1945_s28 }
  0x4e   : > { %1202 = vrot.lane.b32.xlu0 %v2055_v16, %s1944_s13 }
  0x4f   : > { %1204 = vrot.lane.b32.xlu1 %v2059_v17, %s1944_s13 }
  0x52   : > { %1206 = vrot.lane.b32.xlu0 %v2063_v18, %s1944_s13 }
  0x53   : > { %1208 = vrot.lane.b32.xlu1 %v2067_v19, %s1944_s13 }
  0x56   : > { %1210 = vrot.lane.b32.xlu0 %v2071_v20, %s1944_s13 }
  0x57   : > { %1212 = vrot.lane.b32.xlu1 %v2075_v21, %s1944_s13 }
  0x5a   : > { %1214 = vrot.lane.b32.xlu0 %v2079_v22, %s1944_s13 }
  0x5b   : > { %1216 = vrot.lane.b32.xlu1 %v2083_v23, %s1944_s13 }
  0x5e   : > { %1394 = vrot.lane.b32.xlu0 %v2055_v16, %s1945_s28 }
  0x5f   : > { %1396 = vrot.lane.b32.xlu1 %v2059_v17, %s1945_s28 }
  0x62   : > { %1398 = vrot.lane.b32.xlu0 %v2063_v18, %s1945_s28 }
  0x63   : > { %1400 = vrot.lane.b32.xlu1 %v2067_v19, %s1945_s28 }
  0x66   : > { %1402 = vrot.lane.b32.xlu0 %v2071_v20, %s1945_s28 }
  0x67   : > { %1404 = vrot.lane.b32.xlu1 %v2075_v21, %s1945_s28 }
  0x6a   : > { %1406 = vrot.lane.b32.xlu0 %v2079_v22, %s1945_s28 }
  0x6b   : > { %1408 = vrot.lane.b32.xlu1 %v2083_v23, %s1945_s28 }
  0x80   : > { %v241_v24 = vpop.permute.xlu0 %240 }
  0x81   : > { %1782 = vpush %v241_v24  ;;  %v245_v25 = vpop.permute.xlu1 %244 }
  0x84   : > { %v243_v26 = vpop.permute.xlu0 %242 }
  0x85   : > { %1784 = vpush %v243_v26  ;;  %v247_v27 = vpop.permute.xlu1 %246 }
  0x86   : > { %1786 = vpush %v245_v25 }
  0x87   : > { %1788 = vpush %v247_v27  ;;  %v2199_v27 = vld [vmem:[%s2135_s12 + $0x80] sm:$0xff] }
  0x88   : > { %v249_v28 = vpop.permute.xlu0 %248 }
  0x89   : > { %1790 = vpush %v249_v28  ;;  %v251_v29 = vpop.permute.xlu1 %250 }
  0x8a   : > { %1792 = vpush %v251_v29 }
  0x8c   : > { %v253_v30 = vpop.permute.xlu0 %252 }
  0x8d   : > { %1794 = vpush %v253_v30  ;;  %v255_v31 = vpop.permute.xlu1 %254  ;;  %v2208_v30 = vld [vmem:[%s2135_s12 + $0x90] sm:$0xff] }
  0x8e   : > { %1796 = vpush %v255_v31 }
  0x90   : > { %v377_v32 = vpop.permute.xlu0 %376 }
  0x91   : > { %1798 = vpush %v377_v32  ;;  %v379_v33 = vpop.permute.xlu1 %378 }
  0x92   : > { %1800 = vpush %v379_v33 }
  0x94   : > { %v381_v34 = vpop.permute.xlu0 %380 }
  0x95   : > { %1802 = vpush %v381_v34  ;;  %v383_v35 = vpop.permute.xlu1 %382 }
  0x96   : > { %1804 = vpush %v383_v35  ;;  %v2218_v35 = vld [vmem:[%s2135_s12 + $0xa8] sm:$0xff] }
  0x98   : > { %v385_v36 = vpop.permute.xlu0 %384 }
  0x99   : > { %1806 = vpush %v385_v36  ;;  %v387_v37 = vpop.permute.xlu1 %386  ;;  %v2221_v36 = vld [vmem:[%s2135_s12 + $0xb0] sm:$0xff] }
  0x9a   : > { %1808 = vpush %v387_v37 }
  0x9c   : > { %v389_v38 = vpop.permute.xlu0 %388 }
  0x9d   : > { %1810 = vpush %v389_v38  ;;  %v391_v39 = vpop.permute.xlu1 %390 }
  0x9e   : > { %1812 = vpush %v391_v39 }
  0x9f   : > { %1814 = vpush %v2008_v8  ;;  %v2173_v8 = vld [vmem:[%s2135_s12 + $0x50] sm:$0xff] }
  0xa0   : > { %v666_v40 = vpop.permute.xlu0 %665  ;;  %1816 = vpush %v2011_v9 }
  0xa1   : > { %1818 = vpush %v2015_v10  ;;  %v668_v41 = vpop.permute.xlu1 %667 }
  0xa2   : > { %1820 = vpush %v2019_v11 }
  0xa3   : > { %1822 = vpush %v2023_v12 }
  0xa4   : > { %1824 = vpush %v2027_v13  ;;  %v670_v42 = vpop.permute.xlu0 %669 }
  0xa5   : > { %1826 = vpush %v2031_v14  ;;  %v672_v43 = vpop.permute.xlu1 %671  ;;  %v2182_v14 = vld [vmem:[%s2135_s12 + $0x60] sm:$0xff] }
  0xa6   : > { %1828 = vpush %v2035_v15  ;;  %v2185_v15 = vld [vmem:[%s2135_s12 + $0x68] sm:$0xff] }
  0xa7   : > { %1830 = vpush %v666_v40 }
  0xa8   : > { %1832 = vpush %v668_v41  ;;  %v674_v44 = vpop.permute.xlu0 %673 }
  0xa9   : > { %1834 = vpush %v670_v42  ;;  %v676_v45 = vpop.permute.xlu1 %675 }
  0xaa   : > { %1836 = vpush %v672_v43 }
  0xab   : > { %1838 = vpush %v674_v44 }
  0xac   : > { %1840 = vpush %v676_v45  ;;  %v678_v46 = vpop.permute.xlu0 %677 }
  0xad   : > { %1842 = vpush %v678_v46  ;;  %v680_v47 = vpop.permute.xlu1 %679 }
  0xae   : > { %1844 = vpush %v680_v47 }
  0xb0   : > { %v858_v48 = vpop.permute.xlu0 %857 }
  0xb1   : > { %1846 = vpush %v858_v48  ;;  %v860_v51 = vpop.permute.xlu1 %859 }
  0xb2   : > { %s1783_s16 = spop %1782  ;;  %1848 = vpush %v860_v51 }
  0xb3   : > { %v257_v52 = vstv %s1783_s16 }
  0xb4   : > { %v280_v53 = vmul.f32 %v257_v52, %v2142_v49  ;;  %v281_v54 = vmul.f32 %v257_v52, %v2145_v50  ;;  %v862_v55 = vpop.permute.xlu0 %861 }
  0xb5   : > { %1850 = vpush %v862_v55  ;;  %v864_v56 = vpop.permute.xlu1 %863 }
  0xb6   : > { %s1785_s17 = spop %1784  ;;  %314 = vrot.lane.b32.xlu1 %v281_v54, %s1944_s13  ;;  %312 = vrot.lane.b32.xlu0 %v280_v53, %s1944_s13  ;;  %1852 = vpush %v864_v56 }
  0xb7   : > { %v260_v59 = vstv %s1785_s17  ;;  %s1787_s18 = spop %1786 }
  0xb8   : > { %v282_v60 = vmul.f32 %v260_v59, %v2152_v57  ;;  %v283_v61 = vmul.f32 %v260_v59, %v2155_v58  ;;  %v263_v62 = vstv %s1787_s18  ;;  %s1789_s19 = spop %1788  ;;  %v866_v63 = vpop.permute.xlu0 %865 }
  0xb9   : > { %1854 = vpush %v866_v63  ;;  %v868_v2 = vpop.permute.xlu1 %867  ;;  %v284_v3 = vmul.f32 %v263_v62, %v2160_v0  ;;  %v285_v4 = vmul.f32 %v263_v62, %v2163_v1  ;;  %v266_v5 = vstv %s1789_s19 }
  0xba   : > { %318 = vrot.lane.b32.xlu1 %v283_v61, %s1944_s13  ;;  %316 = vrot.lane.b32.xlu0 %v282_v60, %s1944_s13  ;;  %1856 = vpush %v868_v2  ;;  %s1791_s20 = spop %1790  ;;  %v286_v10 = vmul.f32 %v266_v5, %v2170_v7  ;;  %v287_v11 = vmul.f32 %v266_v5, %v2173_v8 }
  0xbb   : > { %v269_v12 = vstv %s1791_s20  ;;  %s1793_s21 = spop %1792 }
  0xbc   : > { %v870_v6 = vpop.permute.xlu0 %869  ;;  %v288_v25 = vmul.f32 %v269_v12, %v2182_v14  ;;  %v289_v26 = vmul.f32 %v269_v12, %v2185_v15 }
  0xbd   : > { %1858 = vpush %v870_v6  ;;  %v872_v9 = vpop.permute.xlu1 %871 }
  0xbe   : > { %322 = vrot.lane.b32.xlu1 %v285_v4, %s1944_s13  ;;  %320 = vrot.lane.b32.xlu0 %v284_v3, %s1944_s13  ;;  %1860 = vpush %v872_v9  ;;  %s1795_s22 = spop %1794 }
  0xbf   : > { %1862 = vpush %v2055_v16  ;;  %v272_v16 = vstv %s1793_s21  ;;  %s1797_s23 = spop %1796 }
  0xc0   : > { %v1203_v13 = vpop.permute.xlu0 %1202  ;;  %1864 = vpush %v2059_v17 }
  0xc1   : > { %1866 = vpush %v2063_v18  ;;  %v1205_v24 = vpop.permute.xlu1 %1204  ;;  %v2196_v18 = vld [vmem:[%s2135_s12 + $0x78] sm:$0xff] }
  0xc2   : > { %326 = vrot.lane.b32.xlu1 %v287_v11, %s1944_s13  ;;  %324 = vrot.lane.b32.xlu0 %v286_v10, %s1944_s13  ;;  %1868 = vpush %v2067_v19  ;;  %v290_v29 = vmul.f32 %v272_v16, %v2196_v18  ;;  %v291_v19 = vmul.f32 %v272_v16, %v2199_v27  ;;  %s1799_s24 = spop %1798  ;;  %v2285_v11 = vld [vmem:[%s2135_s12 + $0x10] sm:$0x3] }
  0xc3   : > { %1870 = vpush %v2071_v20  ;;  %v275_v20 = vstv %s1795_s22  ;;  %s1801_s25 = spop %1800  ;;  %v393_v40 = vstv %s1799_s24 }
  0xc4   : > { %1872 = vpush %v2075_v21  ;;  %v1207_v17 = vpop.permute.xlu0 %1206  ;;  %v292_v32 = vmul.f32 %v275_v20, %v2208_v30  ;;  %v416_v43 = vmul.f32 %v393_v40, %v2142_v49  ;;  %v417_v44 = vmul.f32 %v393_v40, %v2145_v50  ;;  %v396_v45 = vstv %s1801_s25 }
  0xc5   : > { %1874 = vpush %v2079_v22  ;;  %v1209_v28 = vpop.permute.xlu1 %1208  ;;  %v2211_v22 = vld [vmem:[%s2135_s12 + $0x98] sm:$0xff]  ;;  %v418_v48 = vmul.f32 %v396_v45, %v2152_v57  ;;  %v419_v51 = vmul.f32 %v396_v45, %v2155_v58 }
  0xc6   : > { %330 = vrot.lane.b32.xlu1 %v289_v26, %s1944_s13  ;;  %328 = vrot.lane.b32.xlu0 %v288_v25, %s1944_s13  ;;  %1876 = vpush %v2083_v23  ;;  %v293_v33 = vmul.f32 %v275_v20, %v2211_v22  ;;  %v278_v23 = vstv %s1797_s23  ;;  %s2227_s26 = spop %1802 }
  0xc7   : > { %1878 = vpush %v1203_v13  ;;  %v294_v38 = vmul.f32 %v278_v23, %v2218_v35  ;;  %v295_v39 = vmul.f32 %v278_v23, %v2221_v36  ;;  %s2229_s27 = spop %1804  ;;  %v399_v52 = vstv %s2227_s26 }
  0xc8   : > { %1880 = vpush %v1205_v24  ;;  %v1211_v21 = vpop.permute.xlu0 %1210  ;;  %v420_v55 = vmul.f32 %v399_v52, %v2160_v0  ;;  %v421_v56 = vmul.f32 %v399_v52, %v2163_v1  ;;  %v402_v59 = vstv %s2229_s27 }
  0xc9   : > { %1882 = vpush %v1207_v17  ;;  %v1213_v31 = vpop.permute.xlu1 %1212  ;;  %v422_v62 = vmul.f32 %v402_v59, %v2170_v7  ;;  %v423_v63 = vmul.f32 %v402_v59, %v2173_v8 }
  0xca   : > { %334 = vrot.lane.b32.xlu1 %v291_v19, %s1944_s13  ;;  %332 = vrot.lane.b32.xlu0 %v290_v29, %s1944_s13  ;;  %1884 = vpush %v1209_v28  ;;  %s2231_s5 = spop %1806  ;;  %v178_v29 = vstv %s2110_s29  ;;  %v182_v19 = vstv %s2114_s30 }
  0xcb   : > { %1886 = vpush %v1211_v21  ;;  %s2233_s8 = spop %1808  ;;  %v405_v2 = vstv %s2231_s5  ;;  %v2308_v40 = vmul.f32 %v178_v29, %v2142_v49 }
  0xcc   : > { %1888 = vpush %v1213_v31  ;;  %v1215_v34 = vpop.permute.xlu0 %1214  ;;  %v424_v3 = vmul.f32 %v405_v2, %v2182_v14  ;;  %v425_v4 = vmul.f32 %v405_v2, %v2185_v15  ;;  %v408_v5 = vstv %s2233_s8  ;;  %v2300_v31 = vld [vmem:[%s2135_s12 + $0x28] sm:$0x3] }
  0xcd   : > { %v1217_v37 = vpop.permute.xlu1 %1216  ;;  %1890 = vpush %v1215_v34  ;;  %v426_v6 = vmul.f32 %v408_v5, %v2196_v18  ;;  %v427_v9 = vmul.f32 %v408_v5, %v2199_v27 }
  0xce   : > { %338 = vrot.lane.b32.xlu1 %v293_v33, %s1944_s13  ;;  %336 = vrot.lane.b32.xlu0 %v292_v32, %s1944_s13  ;;  %1892 = vpush %v1217_v37  ;;  %s2239_s11 = spop %1810 }
  0xcf   : > { %s2241_s16 = spop %1812  ;;  %v411_v10 = vstv %s2239_s11 }
  0xd0   : > { %v1395_v41 = vpop.permute.xlu0 %1394  ;;  %s2243_s17 = spop %1814  ;;  %v428_v13 = vmul.f32 %v411_v10, %v2208_v30  ;;  %v429_v24 = vmul.f32 %v411_v10, %v2211_v22  ;;  %v414_v25 = vstv %s2241_s16 }
  0xd1   : > { %v1397_v42 = vpop.permute.xlu1 %1396  ;;  %1894 = vpush %v1395_v41  ;;  %s2250_s18 = spop %1816  ;;  %v430_v20 = vmul.f32 %v414_v25, %v2218_v35  ;;  %v431_v21 = vmul.f32 %v414_v25, %v2221_v36  ;;  %v2311_v41 = vmul.f32 %v178_v29, %v2145_v50 }
  0xd2   : > { %342 = vrot.lane.b32.xlu1 %v295_v39, %s1944_s13  ;;  %340 = vrot.lane.b32.xlu0 %v294_v38, %s1944_s13  ;;  %1896 = vpush %v1397_v42  ;;  %s2252_s19 = spop %1818  ;;  %v2314_v42 = vmul.f32 %v182_v19, %v2152_v57 }
  0xd3   : > { %s2259_s20 = spop %1820 }
  0xd4   : > { %v1399_v46 = vpop.permute.xlu0 %1398  ;;  %s2261_s21 = spop %1822 }
  0xd5   : > { %v1401_v47 = vpop.permute.xlu1 %1400  ;;  %1898 = vpush %v1399_v46  ;;  %s2268_s22 = spop %1824 }
  0xd6   : > { %450 = vrot.lane.b32.xlu1 %v417_v44, %s1945_s28  ;;  %448 = vrot.lane.b32.xlu0 %v416_v43, %s1945_s28  ;;  %1900 = vpush %v1401_v47  ;;  %s2270_s23 = spop %1826  ;;  %v186_v43 = vstv %s2122_s3  ;;  %v190_v44 = vstv %s2125_s4  ;;  %v2321_v47 = vmul.f32 %v182_v19, %v2155_v58 }
  0xd7   : > { %s2277_s24 = spop %1828  ;;  %v2342_v2 = vmul.f32 %v190_v44, %v2173_v8 }
  0xd8   : > { %v1403_v53 = vpop.permute.xlu0 %1402  ;;  %s1831_s25 = spop %1830 }
  0xd9   : > { %v1405_v54 = vpop.permute.xlu1 %1404  ;;  %1902 = vpush %v1403_v53  ;;  %v682_v12 = vstv %s1831_s25  ;;  %s1833_s26 = spop %1832 }
  0xda   : > { %454 = vrot.lane.b32.xlu1 %v419_v51, %s1945_s28  ;;  %452 = vrot.lane.b32.xlu0 %v418_v48, %s1945_s28  ;;  %1904 = vpush %v1405_v54  ;;  %v705_v26 = vmul.f32 %v682_v12, %v2142_v49  ;;  %v706_v16 = vmul.f32 %v682_v12, %v2145_v50  ;;  %v685_v28 = vstv %s1833_s26  ;;  %s1835_s27 = spop %1834  ;;  %v2324_v48 = vld [vmem:[%s2135_s12 + $0x40] sm:$0x3] }
  0xdb   : > { %v707_v17 = vmul.f32 %v682_v12, %v2285_v11  ;;  %v708_v32 = vmul.f32 %v685_v28, %v2152_v57  ;;  %v709_v33 = vmul.f32 %v685_v28, %v2155_v58  ;;  %v710_v23 = vmul.f32 %v685_v28, %v2300_v31  ;;  %s1837_s29 = spop %1836 }
  0xdc   : > { %v1407_v60 = vpop.permute.xlu0 %1406  ;;  %v688_v34 = vstv %s1835_s27  ;;  %v753_v37 = vrot.slane %v705_v26, 1  ;;  %v754_v38 = vrot.slane %v706_v16, 1  ;;  %v691_v59 = vstv %s1837_s29  ;;  %s1839_s30 = spop %1838 }
  0xdd   : > { %v1409_v61 = vpop.permute.xlu1 %1408  ;;  %1906 = vpush %v1407_v60  ;;  %v756_v39 = vrot.slane %v707_v17, 1  ;;  %v711_v45 = vmul.f32 %v688_v34, %v2160_v0  ;;  %v712_v46 = vmul.f32 %v688_v34, %v2163_v1  ;;  %v758_v51 = vrot.slane %v708_v32, 1  ;;  %s1841_s3 = spop %1840 }
  0xde   : > { %458 = vrot.lane.b32.xlu1 %v421_v56, %s1945_s28  ;;  %456 = vrot.lane.b32.xlu0 %v420_v55, %s1945_s28  ;;  %1908 = vpush %v1409_v61  ;;  %v759_v52 = vrot.slane %v709_v33, 1  ;;  %v761_v53 = vrot.slane %v710_v23, 1  ;;  %v755_v55 = vsel %vm592_vm0, %v753_v37, %v754_v38  ;;  %v713_v56 = vmul.f32 %v688_v34, %v2324_v48  ;;  %v2375_v23 = vld [vmem:[%s2135_s12 + $0x70] sm:$0x3]  ;;  %s1843_s4 = spop %1842 }
  0xdf   : > { %v757_v54 = vsel %vm592_vm0, %v754_v38, %v756_v39  ;;  %v2332_v60 = vmul.f32 %v186_v43, %v2160_v0  ;;  %v2335_v61 = vmul.f32 %v186_v43, %v2163_v1  ;;  %v763_v5 = vrot.slane %v711_v45, 1 }
  0xe0   : > { %v714_v10 = vmul.f32 %v691_v59, %v2170_v7  ;;  %v715_v12 = vmul.f32 %v691_v59, %v2173_v8  ;;  %v766_v25 = vrot.slane %v713_v56, 1  ;;  %v762_v26 = vsel %vm592_vm0, %v759_v52, %v761_v53 }
  0xe1   : > { %v760_v16 = vsel %vm592_vm0, %v758_v51, %v759_v52  ;;  %v694_v19 = vstv %s1839_s30  ;;  %v521_v32 = vstv %s2243_s17  ;;  %v697_v39 = vstv %s1841_s3 }
  0xe2   : > { %462 = vrot.lane.b32.xlu1 %v423_v63, %s1945_s28  ;;  %460 = vrot.lane.b32.xlu0 %v422_v62, %s1945_s28  ;;  %v2338_v62 = vmul.f32 %v190_v44, %v2170_v7  ;;  %v194_v63 = vstv %s2128_s6  ;;  %v768_v34 = vrot.slane %v714_v10, 1  ;;  %v769_v37 = vrot.slane %v715_v12, 1  ;;  %s1845_s6 = spop %1844 }
  0xe3   : > { %v2360_v17 = vmul.f32 %v194_v63, %v2185_v15  ;;  %v717_v44 = vmul.f32 %v694_v19, %v2182_v14  ;;  %v718_v45 = vmul.f32 %v694_v19, %v2185_v15  ;;  %v2399_v56 = vmul.f32 %v521_v32, %v2285_v11 }
  0xe4   : > { %v700_v10 = vstv %s1843_s4 }
  0xe5   : > { %3341 = vst [vmem:[#allocation10_spill] sm:$0xff] %v2399_v56  ;;  %v773_v12 = vrot.slane %v717_v44, 1 }
  0xe6   : > { %466 = vrot.lane.b32.xlu1 %v425_v4, %s1945_s28  ;;  %464 = vrot.lane.b32.xlu0 %v424_v3, %s1945_s28  ;;  %v198_v3 = vstv %s2130_s7  ;;  %v2346_v4 = vld [vmem:[%s2135_s12 + $0x58] sm:$0x3]  ;;  %s1847_s7 = spop %1846 }
  0xe7   : > { %v2363_v28 = vmul.f32 %v198_v3, %v2196_v18  ;;  %v2366_v29 = vmul.f32 %v198_v3, %v2199_v27  ;;  %v2404_v3 = vld [vmem:[%s2135_s12 + $0x88] sm:$0x3] }
  0xe8   : > { %3342 = vst [vmem:[#allocation11_spill] sm:$0xff] %v2404_v3 }
  0xe9   : > { %3333 = vst [vmem:[#allocation2_spill] sm:$0xff] %v2363_v28  ;;  %3334 = vst [vmem:[#allocation3_spill] sm:$0xff] %v2366_v29 }
  0xea   : > { %470 = vrot.lane.b32.xlu1 %v427_v9, %s1945_s28  ;;  %468 = vrot.lane.b32.xlu0 %v426_v6, %s1945_s28  ;;  %v764_v6 = vrot.slane %v712_v46, 1  ;;  %v202_v9 = vstv %s2137_s14  ;;  %v719_v46 = vmul.f32 %v694_v19, %v2375_v23  ;;  %s1849_s14 = spop %1848 }
  0xeb   : > { %v2384_v51 = vmul.f32 %v202_v9, %v2211_v22 }
  0xec   : > { %v765_v33 = vsel %vm592_vm0, %v763_v5, %v764_v6  ;;  %v767_v43 = vsel %vm592_vm0, %v764_v6, %v766_v25  ;;  %v770_v6 = vsel %vm592_vm0, %v768_v34, %v769_v37  ;;  %v776_v25 = vrot.slane %v719_v46, 1 }
  0xed   : > { %3336 = vst [vmem:[#allocation5_spill] sm:$0xff] %v2384_v51  ;;  %v703_v46 = vstv %s1845_s6 }
  0xee   : > { %474 = vrot.lane.b32.xlu1 %v429_v24, %s1945_s28  ;;  %472 = vrot.lane.b32.xlu0 %v428_v13, %s1945_s28  ;;  %v716_v13 = vmul.f32 %v691_v59, %v2346_v4  ;;  %v2355_v24 = vmul.f32 %v194_v63, %v2182_v14  ;;  %v524_v59 = vstv %s2250_s18  ;;  %v720_v63 = vmul.f32 %v697_v39, %v2196_v18 }
  0xef   : > { %v2416_v19 = vmul.f32 %v524_v59, %v2155_v58 }
  0xf0   : > { %v771_v38 = vrot.slane %v716_v13, 1  ;;  %v774_v13 = vrot.slane %v718_v45, 1  ;;  %v724_v45 = vmul.f32 %v700_v10, %v2211_v22 }
  0xf1   : > { %3344 = vst [vmem:[#allocation13_spill] sm:$0xff] %v2416_v19 }
  0xf2   : > { %478 = vrot.lane.b32.xlu1 %v431_v21, %s1945_s28  ;;  %476 = vrot.lane.b32.xlu0 %v430_v20, %s1945_s28  ;;  %v2369_v20 = vmul.f32 %v202_v9, %v2208_v30  ;;  %v206_v21 = vstv %s2139_s15  ;;  %v772_v5 = vsel %vm592_vm0, %v769_v37, %v771_v38  ;;  %v721_v9 = vmul.f32 %v697_v39, %v2199_v27  ;;  %s1851_s15 = spop %1850 }
  0xf3   : > { %v2387_v52 = vmul.f32 %v206_v21, %v2218_v35  ;;  %v2390_v53 = vmul.f32 %v206_v21, %v2221_v36  ;;  %v2419_v21 = vmul.f32 %v524_v59, %v2300_v31  ;;  %v723_v38 = vmul.f32 %v700_v10, %v2208_v30  ;;  %s1853_s5 = spop %1852 }
  0xf4   : > { %3335 = vst [vmem:[#allocation4_spill] sm:$0xff] %v2369_v20  ;;  %v779_v44 = vrot.slane %v721_v9, 1  ;;  %v775_v34 = vsel %vm592_vm0, %v773_v12, %v774_v13  ;;  %s1855_s8 = spop %1854  ;;  %v2553_v20 = vstv %s2277_s24 }
  0xf5   : > { %3337 = vst [vmem:[#allocation6_spill] sm:$0xff] %v2387_v52  ;;  %3338 = vst [vmem:[#allocation7_spill] sm:$0xff] %v2390_v53  ;;  %v783_v12 = vrot.slane %v723_v38, 1  ;;  %v874_v53 = vstv %s1847_s7  ;;  %s1857_s11 = spop %1856 }
  0xf6   : > { %795 = vrot.lane.b32.xlu1 %v757_v54, %s1944_s13  ;;  %793 = vrot.lane.b32.xlu0 %v755_v55, %s1944_s13  ;;  %v2393_v54 = vmul.f32 %v521_v32, %v2142_v49  ;;  %v2396_v55 = vmul.f32 %v521_v32, %v2145_v50  ;;  %3345 = vst [vmem:[#allocation14_spill] sm:$0xff] %v2419_v21  ;;  %v527_v32 = vstv %s2252_s19  ;;  %s1859_s16 = spop %1858  ;;  %3359 = vst [vmem:[#allocation28_spill] sm:$0xff] %v2553_v20 }
  0xf7   : > { %v899_v19 = vmul.f32 %v874_v53, %v2285_v11  ;;  %s1861_s17 = spop %1860 }
  0xf8   : > { %3339 = vst [vmem:[#allocation8_spill] sm:$0xff] %v2393_v54  ;;  %3340 = vst [vmem:[#allocation9_spill] sm:$0xff] %v2396_v55  ;;  %s2512_s18 = spop %1862 }
  0xf9   : > { %s2525_s19 = spop %1864 }
  0xfa   : > { %799 = vrot.lane.b32.xlu1 %v762_v26, %s1944_s13  ;;  %797 = vrot.lane.b32.xlu0 %v760_v16, %s1944_s13  ;;  %v722_v26 = vmul.f32 %v697_v39, %v2404_v3  ;;  %v2413_v16 = vmul.f32 %v524_v59, %v2152_v57  ;;  %v2427_v39 = vld [vmem:[%s2135_s12 + $0xa0] sm:$0x3] }
  0xfb   : > { %v725_v37 = vmul.f32 %v700_v10, %v2427_v39  ;;  %v2449_v10 = vld [vmem:[%s2135_s12 + $0xb8] sm:$0x3] }
  0xfc   : > { %3343 = vst [vmem:[#allocation12_spill] sm:$0xff] %v2413_v16  ;;  %v781_v59 = vrot.slane %v722_v26, 1  ;;  %v2445_v26 = vmul.f32 %v527_v32, %v2324_v48  ;;  %v728_v38 = vmul.f32 %v703_v46, %v2449_v10 }
  0xfd   : > { %v786_v16 = vrot.slane %v725_v37, 1 }
  0xfe   : > { %803 = vrot.lane.b32.xlu1 %v767_v43, %s1944_s13  ;;  %801 = vrot.lane.b32.xlu0 %v765_v33, %s1944_s13  ;;  %v778_v43 = vrot.slane %v720_v63, 1  ;;  %v777_v33 = vsel %vm592_vm0, %v774_v13, %v776_v25  ;;  %v2441_v63 = vmul.f32 %v527_v32, %v2163_v1  ;;  %3348 = vst [vmem:[#allocation17_spill] sm:$0xff] %v2445_v26  ;;  %v530_v25 = vstv %s2259_s20  ;;  %s2536_s20 = spop %1866 }
  0xff   : > { %v784_v13 = vrot.slane %v724_v45, 1  ;;  %v782_v9 = vsel %vm592_vm0, %v779_v44, %v781_v59  ;;  %v533_v45 = vstv %s2261_s21  ;;  %v2466_v21 = vmul.f32 %v530_v25, %v2173_v8  ;;  %s2540_s21 = spop %1868 }
 0x100   : > { %3347 = vst [vmem:[#allocation16_spill] sm:$0xff] %v2441_v63  ;;  %v780_v52 = vsel %vm592_vm0, %v778_v43, %v779_v44  ;;  %v2469_v37 = vmul.f32 %v530_v25, %v2346_v4  ;;  %v897_v44 = vmul.f32 %v874_v53, %v2142_v49  ;;  %v898_v59 = vmul.f32 %v874_v53, %v2145_v50 }
 0x101   : > { %3350 = vst [vmem:[#allocation19_spill] sm:$0xff] %v2466_v21  ;;  %v787_v63 = vsel %vm592_vm0, %v784_v13, %v786_v16  ;;  %v2479_v26 = vmul.f32 %v533_v45, %v2182_v14  ;;  %v2482_v54 = vmul.f32 %v533_v45, %v2185_v15  ;;  %v536_v53 = vstv %s2268_s22  ;;  %s2550_s22 = spop %1870 }
 0x102   : > { %807 = vrot.lane.b32.xlu1 %v772_v5, %s1944_s13  ;;  %805 = vrot.lane.b32.xlu0 %v770_v6, %s1944_s13  ;;  %v2438_v6 = vmul.f32 %v527_v32, %v2160_v0  ;;  %v726_v5 = vmul.f32 %v703_v46, %v2218_v35  ;;  %v727_v32 = vmul.f32 %v703_v46, %v2221_v36  ;;  %v945_v55 = vrot.slane %v897_v44, 1 }
 0x103   : > { %3351 = vst [vmem:[#allocation20_spill] sm:$0xff] %v2469_v37  ;;  %3352 = vst [vmem:[#allocation21_spill] sm:$0xff] %v2479_v26  ;;  %v946_v16 = vrot.slane %v898_v59, 1  ;;  %v2502_v59 = vmul.f32 %v536_v53, %v2196_v18  ;;  %v886_v26 = vstv %s1855_s8 }
 0x104   : > { %3346 = vst [vmem:[#allocation15_spill] sm:$0xff] %v2438_v6  ;;  %v788_v46 = vrot.slane %v726_v5, 1  ;;  %v789_v43 = vrot.slane %v727_v32, 1  ;;  %v791_v6 = vrot.slane %v728_v38, 1  ;;  %3353 = vst [vmem:[#allocation22_spill] sm:$0xff] %v2482_v54  ;;  %v880_v5 = vstv %s1851_s15 }
 0x105   : > { %v905_v44 = vmul.f32 %v880_v5, %v2324_v48  ;;  %3355 = vst [vmem:[#allocation24_spill] sm:$0xff] %v2502_v59 }
 0x106   : > { %811 = vrot.lane.b32.xlu1 %v777_v33, %s1944_s13  ;;  %809 = vrot.lane.b32.xlu0 %v775_v34, %s1944_s13  ;;  %v2461_v34 = vmul.f32 %v530_v25, %v2170_v7  ;;  %v877_v33 = vstv %s1849_s14  ;;  %v785_v25 = vsel %vm592_vm0, %v783_v12, %v784_v13  ;;  %v948_v12 = vrot.slane %v899_v19, 1 }
 0x107   : > { %v900_v32 = vmul.f32 %v877_v33, %v2152_v57  ;;  %v901_v13 = vmul.f32 %v877_v33, %v2155_v58  ;;  %v902_v38 = vmul.f32 %v877_v33, %v2300_v31  ;;  %v790_v56 = vsel %vm592_vm0, %v788_v46, %v789_v43 }
 0x108   : > { %3349 = vst [vmem:[#allocation18_spill] sm:$0xff] %v2461_v34  ;;  %v2505_v33 = vmul.f32 %v536_v53, %v2199_v27  ;;  %v883_v46 = vstv %s1853_s5  ;;  %v949_v19 = vsel %vm592_vm0, %v946_v16, %v948_v12  ;;  %v947_v34 = vsel %vm592_vm0, %v945_v55, %v946_v16 }
 0x109   : > { %v958_v37 = vrot.slane %v905_v44, 1  ;;  %v911_v55 = vmul.f32 %v886_v26, %v2375_v23  ;;  %v892_v44 = vstv %s1859_s16 }
 0x10a   : > { %815 = vrot.lane.b32.xlu1 %v782_v9, %s1944_s13  ;;  %813 = vrot.lane.b32.xlu0 %v780_v52, %s1944_s13  ;;  %v2485_v52 = vmul.f32 %v533_v45, %v2375_v23  ;;  %v792_v45 = vsel %vm592_vm0, %v789_v43, %v791_v6  ;;  %v904_v9 = vmul.f32 %v880_v5, %v2163_v1  ;;  %v950_v6 = vrot.slane %v900_v32, 1 }
 0x10b   : > { %3356 = vst [vmem:[#allocation25_spill] sm:$0xff] %v2505_v33  ;;  %v903_v43 = vmul.f32 %v880_v5, %v2160_v0  ;;  %v889_v32 = vstv %s1857_s11  ;;  %v2515_v5 = vmul.f32 %v536_v53, %v2404_v3  ;;  %v910_v33 = vmul.f32 %v886_v26, %v2185_v15 }
 0x10c   : > { %3354 = vst [vmem:[#allocation23_spill] sm:$0xff] %v2485_v52  ;;  %v956_v21 = vrot.slane %v904_v9, 1  ;;  %v909_v53 = vmul.f32 %v886_v26, %v2182_v14  ;;  %v912_v16 = vmul.f32 %v889_v32, %v2196_v18  ;;  %v914_v59 = vmul.f32 %v889_v32, %v2404_v3 }
 0x10d   : > { %3357 = vst [vmem:[#allocation26_spill] sm:$0xff] %v2515_v5  ;;  %v955_v12 = vrot.slane %v903_v43, 1  ;;  %v913_v5 = vmul.f32 %v889_v32, %v2199_v27  ;;  %v966_v52 = vrot.slane %v910_v33, 1  ;;  %v968_v26 = vrot.slane %v911_v55, 1 }
 0x10e   : > { %819 = vrot.lane.b32.xlu1 %v787_v63, %s1944_s13  ;;  %817 = vrot.lane.b32.xlu0 %v785_v25, %s1944_s13  ;;  %v951_v63 = vrot.slane %v901_v13, 1  ;;  %v953_v25 = vrot.slane %v902_v38, 1  ;;  %v908_v13 = vmul.f32 %v883_v46, %v2346_v4  ;;  %v2521_v38 = vstv %s2270_s23  ;;  %s2564_s23 = spop %1872 }
 0x10f   : > { %3358 = vst [vmem:[#allocation27_spill] sm:$0xff] %v2521_v38  ;;  %v959_v43 = vsel %vm592_vm0, %v956_v21, %v958_v37  ;;  %v915_v54 = vmul.f32 %v892_v44, %v2208_v30  ;;  %v957_v37 = vsel %vm592_vm0, %v955_v12, %v956_v21  ;;  %v970_v32 = vrot.slane %v912_v16, 1  ;;  %s2579_s24 = spop %1874 }
 0x110   : > { %v952_v9 = vsel %vm592_vm0, %v950_v6, %v951_v63  ;;  %v895_v6 = vstv %s1861_s17  ;;  %v973_v33 = vrot.slane %v914_v59, 1  ;;  %v1058_v55 = vstv %s2512_s18  ;;  %s2597_s25 = spop %1876 }
 0x111   : > { %v2560_v21 = vmul.f32 %v895_v6, %v2449_v10  ;;  %v969_v59 = vsel %vm592_vm0, %v966_v52, %v968_v26  ;;  %v975_v12 = vrot.slane %v915_v54, 1  ;;  %s1879_s26 = spop %1878  ;;  %v1076_v29 = vstv %s2579_s24 }
 0x112   : > { %823 = vrot.lane.b32.xlu1 %v792_v45, %s1944_s13  ;;  %821 = vrot.lane.b32.xlu0 %v790_v56, %s1944_s13  ;;  %v906_v45 = vmul.f32 %v883_v46, %v2170_v7  ;;  %v907_v56 = vmul.f32 %v883_v46, %v2173_v8  ;;  %v954_v46 = vsel %vm592_vm0, %v951_v63, %v953_v25  ;;  %v965_v25 = vrot.slane %v909_v53, 1  ;;  %s1881_s27 = spop %1880 }
 0x113   : > { %v916_v63 = vmul.f32 %v892_v44, %v2211_v22  ;;  %v1219_v26 = vstv %s1879_s26  ;;  %s1883_s29 = spop %1882 }
 0x114   : > { %v961_v38 = vrot.slane %v907_v56, 1  ;;  %v971_v56 = vrot.slane %v913_v5, 1  ;;  %s1885_s30 = spop %1884 }
 0x115   : > { %v976_v53 = vrot.slane %v916_v63, 1  ;;  %s1887_s3 = spop %1886 }
 0x116   : > { %987 = vrot.lane.b32.xlu1 %v949_v19, %s1945_s28  ;;  %985 = vrot.lane.b32.xlu0 %v947_v34, %s1945_s28  ;;  %v960_v19 = vrot.slane %v906_v45, 1  ;;  %v963_v34 = vrot.slane %v908_v13, 1  ;;  %v917_v45 = vmul.f32 %v892_v44, %v2427_v39  ;;  %v2547_v13 = vmul.f32 %v895_v6, %v2218_v35  ;;  %s1889_s4 = spop %1888 }
 0x117   : > { %v2569_v44 = vmul.f32 %v1058_v55, %v2142_v49  ;;  %v974_v54 = vsel %vm592_vm0, %v971_v56, %v973_v33  ;;  %v977_v33 = vsel %vm592_vm0, %v975_v12, %v976_v53  ;;  %s1891_s6 = spop %1890 }
 0x118   : > { %v962_v5 = vsel %vm592_vm0, %v960_v19, %v961_v38  ;;  %v978_v16 = vrot.slane %v917_v45, 1  ;;  %v967_v19 = vsel %vm592_vm0, %v965_v25, %v966_v52  ;;  %v1064_v45 = vstv %s2536_s20  ;;  %s1893_s7 = spop %1892 }
 0x119   : > { %3360 = vst [vmem:[#allocation29_spill] sm:$0xff] %v2569_v44  ;;  %v2612_v63 = vmul.f32 %v1064_v45, %v2324_v48  ;;  %s1895_s14 = spop %1894 }
 0x11a   : > { %991 = vrot.lane.b32.xlu1 %v954_v46, %s1945_s28  ;;  %989 = vrot.lane.b32.xlu0 %v952_v9, %s1945_s28  ;;  %v964_v46 = vsel %vm592_vm0, %v961_v38, %v963_v34  ;;  %v2557_v9 = vmul.f32 %v895_v6, %v2221_v36  ;;  %v2572_v34 = vmul.f32 %v1058_v55, %v2145_v50  ;;  %v1061_v38 = vstv %s2525_s19  ;;  %s1897_s15 = spop %1896 }
 0x11b   : > { %v972_v6 = vsel %vm592_vm0, %v970_v32, %v971_v56  ;;  %v2588_v20 = vmul.f32 %v1061_v38, %v2152_v57  ;;  %v2591_v52 = vmul.f32 %v1061_v38, %v2155_v58  ;;  %v2594_v25 = vmul.f32 %v1061_v38, %v2300_v31  ;;  %s1899_s5 = spop %1898 }
 0x11c   : > { %3361 = vst [vmem:[#allocation30_spill] sm:$0xff] %v2572_v34  ;;  %v1067_v32 = vstv %s2540_s21  ;;  %v979_v56 = vsel %vm592_vm0, %v976_v53, %v978_v16  ;;  %v2609_v38 = vmul.f32 %v1064_v45, %v2163_v1  ;;  %v1073_v53 = vstv %s2564_s23  ;;  %s1901_s8 = spop %1900 }
 0x11d   : > { %3362 = vst [vmem:[#allocation31_spill] sm:$0xff] %v2588_v20  ;;  %3363 = vst [vmem:[#allocation32_spill] sm:$0xff] %v2591_v52  ;;  %v2617_v16 = vmul.f32 %v1067_v32, %v2170_v7  ;;  %v2620_v12 = vmul.f32 %v1067_v32, %v2173_v8  ;;  %v2644_v20 = vmul.f32 %v1073_v53, %v2196_v18  ;;  %v3366_v28 = vrot.slane %v2557_v9, 1  ;;  %s1903_s11 = spop %1902 }
 0x11e   : > { %995 = vrot.lane.b32.xlu1 %v959_v43, %s1945_s28  ;;  %993 = vrot.lane.b32.xlu0 %v957_v37, %s1945_s28  ;;  %v2584_v37 = vmul.f32 %v1058_v55, %v2285_v11  ;;  %3364 = vst [vmem:[#allocation33_spill] sm:$0xff] %v2594_v25  ;;  %v2606_v43 = vmul.f32 %v1064_v45, %v2160_v0 }
 0x11f   : > { %v2627_v45 = vmul.f32 %v1067_v32, %v2346_v4  ;;  %v1242_v32 = vmul.f32 %v1219_v26, %v2142_v49  ;;  %v1243_v18 = vmul.f32 %v1219_v26, %v2145_v50  ;;  %v2671_v50 = vmul.f32 %v1076_v29, %v2208_v30 }
 0x120   : > { %v2676_v25 = vmul.f32 %v1076_v29, %v2211_v22  ;;  %v3365_v22 = vrot.slane %v2560_v21, 1 }
 0x121   : > { %v1290_v30 = vrot.slane %v1242_v32, 2 }
 0x122   : > { %999 = vrot.lane.b32.xlu1 %v964_v46, %s1945_s28  ;;  %997 = vrot.lane.b32.xlu0 %v962_v5, %s1945_s28  ;;  %v1070_v46 = vstv %s2550_s22 }
 0x123   : > { %v2632_v5 = vmul.f32 %v1070_v46, %v2182_v14  ;;  %v2635_v44 = vmul.f32 %v1070_v46, %v2185_v15  ;;  %v2638_v55 = vmul.f32 %v1070_v46, %v2375_v23  ;;  %v2649_v46 = vmul.f32 %v1073_v53, %v2199_v27 }
 0x124   : > { %v1291_v27 = vrot.slane %v1243_v18, 2  ;;  %v1225_v18 = vstv %s1883_s29 }
 0x126   : > { %1003 = vrot.lane.b32.xlu1 %v969_v59, %s1945_s28  ;;  %1001 = vrot.lane.b32.xlu0 %v967_v19, %s1945_s28  ;;  %v984_v59 = vsel %vm592_vm0, %v3366_v28, %v3365_v22 }
 0x128   : > { %v315_v19 = vpop.permute.xlu1 %314  ;;  %v313_v52 = vpop.permute.xlu0 %312 }
 0x129   : > { %v2653_v34 = vadd.f32 %v315_v19, %v2311_v41  ;;  %v2656_v51 = vadd.f32 %v313_v52, %v2308_v40  ;;  %v2667_v40 = vmul.f32 %v1073_v53, %v2404_v3  ;;  %v1079_v41 = vstv %s2597_s25 }
 0x12a   : > { %1007 = vrot.lane.b32.xlu1 %v974_v54, %s1945_s28  ;;  %1005 = vrot.lane.b32.xlu0 %v972_v6, %s1945_s28  ;;  %v1244_v54 = vmul.f32 %v1219_v26, %v2285_v11  ;;  %v1222_v19 = vstv %s1881_s27  ;;  %v2688_v26 = vmul.f32 %v1076_v29, %v2427_v39 }
 0x12b   : > { %v1246_v29 = vmul.f32 %v1222_v19, %v2155_v58  ;;  %v1292_v58 = vsel %vm1129_vm1, %v1290_v30, %v1291_v27 }
 0x12c   : > { %v319_v6 = vpop.permute.xlu1 %318  ;;  %v317_v52 = vpop.permute.xlu0 %316 }
 0x12d   : > { %v2680_v53 = vadd.f32 %v319_v6, %v2321_v47  ;;  %v2683_v49 = vadd.f32 %v317_v52, %v2314_v42  ;;  %v3367_v47 = vmov %v3366_v28  ;;  %v3368_v42 = vrot.slane %v2547_v13, 1 }
 0x12e   : > { %1011 = vrot.lane.b32.xlu1 %v979_v56, %s1945_s28  ;;  %1009 = vrot.lane.b32.xlu0 %v977_v33, %s1945_s28  ;;  %v1293_v56 = vrot.slane %v1244_v54, 2  ;;  %v1245_v33 = vmul.f32 %v1222_v19, %v2152_v57  ;;  %v1247_v6 = vmul.f32 %v1222_v19, %v2300_v31  ;;  %v2706_v28 = vmul.f32 %v1079_v41, %v2218_v35 }
 0x12f   : > { %v982_v32 = vsel %vm592_vm0, %v3368_v42, %v3367_v47  ;;  %v2709_v13 = vmul.f32 %v1079_v41, %v2221_v36  ;;  %v1228_v19 = vstv %s1885_s30  ;;  %v1248_v35 = vmul.f32 %v1225_v18, %v2160_v0 }
 0x130   : > { %v323_v9 = vpop.permute.xlu1 %322  ;;  %v321_v22 = vpop.permute.xlu0 %320  ;;  %v1249_v36 = vmul.f32 %v1225_v18, %v2163_v1  ;;  %v1295_v42 = vrot.slane %v1245_v33, 2  ;;  %v1251_v21 = vmul.f32 %v1228_v19, %v2170_v7  ;;  %v1252_v47 = vmul.f32 %v1228_v19, %v2173_v8 }
 0x131   : > { %v2712_v54 = vadd.f32 %v323_v9, %v2335_v61  ;;  %v2715_v57 = vadd.f32 %v321_v22, %v2332_v60  ;;  %v1250_v61 = vmul.f32 %v1225_v18, %v2324_v48  ;;  %v1296_v9 = vrot.slane %v1246_v29, 2 }
 0x132   : > { %1015 = vrot.lane.b32.xlu1 %v984_v59, %s1945_s28  ;;  %1013 = vrot.lane.b32.xlu0 %v982_v32, %s1945_s28  ;;  %v1298_v60 = vrot.slane %v1247_v6, 2  ;;  %v1294_v22 = vsel %vm1129_vm1, %v1291_v27, %v1293_v56  ;;  %v1253_v59 = vmul.f32 %v1228_v19, %v2346_v4  ;;  %v1231_v32 = vstv %s1887_s3  ;;  %v3375_v27 = vld [vmem:[#allocation2_spill] sm:$0xff] }
 0x133   : > { %v2730_v1 = vmul.f32 %v1079_v41, %v2449_v10  ;;  %v1300_v7 = vrot.slane %v1248_v35, 2  ;;  %v1301_v8 = vrot.slane %v1249_v36, 2  ;;  %v1303_v56 = vrot.slane %v1250_v61, 2 }
 0x134   : > { %v327_v30 = vpop.permute.xlu1 %326  ;;  %v325_v52 = vpop.permute.xlu0 %324  ;;  %v1299_v29 = vsel %vm1129_vm1, %v1296_v9, %v1298_v60  ;;  %v1297_v41 = vsel %vm1129_vm1, %v1295_v42, %v1296_v9  ;;  %v1305_v19 = vrot.slane %v1251_v21, 2  ;;  %v1234_v35 = vstv %s1889_s4 }
 0x135   : > { %v2733_v18 = vadd.f32 %v327_v30, %v2342_v2  ;;  %v2736_v33 = vadd.f32 %v325_v52, %v2338_v62  ;;  %v2744_v2 = vmul.f32 %v1231_v32, %v2182_v14  ;;  %v2747_v62 = vmul.f32 %v1231_v32, %v2185_v15  ;;  %v2771_v30 = vld [vmem:[%s2135_s12 + $0x80] sm:$0xff] }
 0x136   : > { %1332 = vrot.lane.b32.xlu1 %v1294_v22, %s1944_s13  ;;  %1330 = vrot.lane.b32.xlu0 %v1292_v58, %s1944_s13  ;;  %v1306_v22 = vrot.slane %v1252_v47, 2  ;;  %v1308_v58 = vrot.slane %v1253_v59, 2  ;;  %v1166_v36 = vrot.slane %v2709_v13, 2  ;;  %v1168_v61 = vrot.slane %v2730_v1, 2  ;;  %3370 = vst [vmem:[#allocation35_spill] sm:$0xff] %v2771_v30 }
 0x137   : > { %v1304_v15 = vsel %vm1129_vm1, %v1301_v8, %v1303_v56  ;;  %v1302_v21 = vsel %vm1129_vm1, %v1300_v7, %v1301_v8  ;;  %v1256_v47 = vmul.f32 %v1231_v32, %v2375_v23  ;;  %v1237_v9 = vstv %s1891_s6 }
 0x138   : > { %v331_v6 = vpop.permute.xlu1 %330  ;;  %v329_v52 = vpop.permute.xlu0 %328  ;;  %v1310_v13 = vrot.slane %v2744_v2, 2  ;;  %v1311_v60 = vrot.slane %v2747_v62, 2  ;;  %v2774_v59 = vmul.f32 %v2771_v30, %v1234_v35  ;;  %v2777_v7 = vmul.f32 %v1234_v35, %v2404_v3  ;;  %v3377_v3 = vld [vmem:[#allocation29_spill] sm:$0xff] }
 0x139   : > { %v2752_v42 = vadd.f32 %v331_v6, %v2360_v17  ;;  %v2755_v14 = vadd.f32 %v329_v52, %v2355_v24  ;;  %v2765_v17 = vld [vmem:[%s2135_s12 + $0x78] sm:$0xff]  ;;  %v1309_v32 = vsel %vm1129_vm1, %v1306_v22, %v1308_v58  ;;  %v1307_v8 = vsel %vm1129_vm1, %v1305_v19, %v1306_v22  ;;  %v3374_v6 = vld [vmem:[#allocation3_spill] sm:$0xff]  ;;  %v3381_v22 = vld [vmem:[#allocation32_spill] sm:$0xff] }
 0x13a   : > { %1336 = vrot.lane.b32.xlu1 %v1299_v29, %s1944_s13  ;;  %1334 = vrot.lane.b32.xlu0 %v1297_v41, %s1944_s13  ;;  %3369 = vst [vmem:[#allocation34_spill] sm:$0xff] %v2765_v17  ;;  %v2768_v24 = vmul.f32 %v2765_v17, %v1234_v35  ;;  %v3371_v29 = vrot.slane %v2584_v37, 2  ;;  %v3372_v41 = vld [vmem:[#allocation30_spill] sm:$0xff]  ;;  %v3378_v30 = vrot.slane %v3377_v3, 2  ;;  %v3379_v19 = vld [vmem:[#allocation33_spill] sm:$0xff]  ;;  %v3382_v17 = vrot.slane %v3381_v22, 2 }
 0x13b   : > { %v3373_v2 = vrot.slane %v3372_v41, 2  ;;  %v3380_v37 = vrot.slane %v3379_v19, 2 }
 0x13c   : > { %v335_v1 = vpop.permute.xlu1 %334  ;;  %v333_v56 = vpop.permute.xlu0 %332 }
 0x13d   : > { %v2786_v62 = vsel %vm1129_vm1, %v3373_v2, %v3371_v29  ;;  %v2789_v52 = vadd.f32 %v335_v1, %v3374_v6  ;;  %v2792_v0 = vadd.f32 %v333_v56, %v3375_v27  ;;  %v3376_v35 = vmov %v3373_v2  ;;  %v3385_v56 = vld [vmem:[#allocation31_spill] sm:$0xff] }
 0x13e   : > { %v2799_v58 = vsel %vm1129_vm1, %v3378_v30, %v3376_v35  ;;  %v2806_v29 = vsel %vm1129_vm1, %v3382_v17, %v3380_v37  ;;  %1340 = vrot.lane.b32.xlu1 %v1304_v15, %s1944_s13  ;;  %1338 = vrot.lane.b32.xlu0 %v1302_v21, %s1944_s13  ;;  %v1313_v27 = vrot.slane %v1256_v47, 2  ;;  %v3384_v1 = vmov %v3382_v17 }
 0x13f   : > { %3383 = vst [vmem:[#allocation30_spill] sm:$0xff] %v2806_v29  ;;  %v3386_v41 = vrot.slane %v3385_v56, 2  ;;  %v3388_v30 = vrot.slane %v2612_v63, 2  ;;  %v3389_v2 = vrot.slane %v2609_v38, 2  ;;  %v3392_v15 = vrot.slane %v2606_v43, 2  ;;  %v1927_v29 = vld [vmem:[%s2135_s12 + $0x8] sm:$0xff] }
 0x140   : > { %v3394_v47 = vrot.slane %v2627_v45, 2  ;;  %v3395_v35 = vrot.slane %v2620_v12, 2  ;;  %v3398_v37 = vrot.slane %v2617_v16, 2  ;;  %v3400_v38 = vrot.slane %v2638_v55, 2  ;;  %v339_v12 = vpop.permute.xlu1 %338  ;;  %v337_v16 = vpop.permute.xlu0 %336 }
 0x141   : > { %v2815_v3 = vsel %vm1129_vm1, %v3386_v41, %v3384_v1  ;;  %v2822_v6 = vsel %vm1129_vm1, %v3389_v2, %v3388_v30  ;;  %v3391_v17 = vmov %v3389_v2  ;;  %v3401_v43 = vrot.slane %v2635_v44, 2 }
 0x142   : > { %3387 = vst [vmem:[#allocation3_spill] sm:$0xff] %v2815_v3  ;;  %3390 = vst [vmem:[#allocation2_spill] sm:$0xff] %v2822_v6  ;;  %v2829_v21 = vsel %vm1129_vm1, %v3392_v15, %v3391_v17  ;;  %v2836_v19 = vsel %vm1129_vm1, %v3395_v35, %v3394_v47  ;;  %v3397_v63 = vmov %v3395_v35  ;;  %v3404_v56 = vrot.slane %v2632_v5, 2  ;;  %1344 = vrot.lane.b32.xlu1 %v1309_v32, %s1944_s13  ;;  %v3423_v32 = vld [vmem:[#allocation22_spill] sm:$0xff] }
 0x143   : > { %3393 = vst [vmem:[#allocation29_spill] sm:$0xff] %v2829_v21  ;;  %3396 = vst [vmem:[#allocation33_spill] sm:$0xff] %v2836_v19  ;;  %v2843_v22 = vsel %vm1129_vm1, %v3398_v37, %v3397_v63  ;;  %v2850_v1 = vsel %vm1129_vm1, %v3401_v43, %v3400_v38  ;;  %v3403_v45 = vmov %v3401_v43  ;;  %v3406_v30 = vrot.slane %v2667_v40, 2  ;;  %1342 = vrot.lane.b32.xlu0 %v1307_v8, %s1944_s13  ;;  %v2939_v8 = vld [vmem:[%s2135_s12 + $0xa8] sm:$0xff] }
 0x144   : > { %3399 = vst [vmem:[#allocation32_spill] sm:$0xff] %v2843_v22  ;;  %3402 = vst [vmem:[#allocation31_spill] sm:$0xff] %v2850_v1  ;;  %v2857_v41 = vsel %vm1129_vm1, %v3404_v56, %v3403_v45  ;;  %v3407_v55 = vrot.slane %v2649_v46, 2  ;;  %v3410_v44 = vrot.slane %v2644_v20, 2  ;;  %v3412_v15 = vrot.slane %v2688_v26, 2  ;;  %v3418_v46 = vld [vmem:[#allocation5_spill] sm:$0xff] }
 0x145   : > { %3405 = vst [vmem:[#allocation36_spill] sm:$0xff] %v2857_v41  ;;  %v3413_v47 = vrot.slane %v2676_v25, 2  ;;  %v3416_v63 = vrot.slane %v2671_v50, 2  ;;  %v2888_v38 = vadd.f32 %v339_v12, %v3418_v46  ;;  %v3419_v20 = vld [vmem:[#allocation4_spill] sm:$0xff]  ;;  %v2894_v26 = vsel %vm1129_vm1, %v1166_v36, %v1168_v61 }
 0x146   : > { %v2864_v2 = vsel %vm1129_vm1, %v3407_v55, %v3406_v30  ;;  %v3409_v17 = vmov %v3407_v55  ;;  %v2891_v43 = vadd.f32 %v337_v16, %v3419_v20  ;;  %3420 = vst [vmem:[#allocation5_spill] sm:$0xff] %v2894_v26  ;;  %v3421_v45 = vrot.slane %v2706_v28, 2  ;;  %v2906_v12 = vld [vmem:[%s2135_s12 + $0x90] sm:$0xff]  ;;  %v2910_v30 = vld [vmem:[%s2135_s12 + $0x98] sm:$0xff]  ;;  %v3424_v55 = vld [vmem:[#allocation23_spill] sm:$0xff] }
 0x147   : > { %3408 = vst [vmem:[#allocation37_spill] sm:$0xff] %v2864_v2  ;;  %v2871_v5 = vsel %vm1129_vm1, %v3410_v44, %v3409_v17  ;;  %v2878_v35 = vsel %vm1129_vm1, %v3413_v47, %v3412_v15  ;;  %v3415_v40 = vmov %v3413_v47  ;;  %v1315_v25 = vrot.slane %v2768_v24, 2  ;;  %v3425_v44 = vld [vmem:[#allocation27_spill] sm:$0xff]  ;;  %v3428_v20 = vld [vmem:[#allocation26_spill] sm:$0xff]  ;;  %v3429_v17 = vld [vmem:[#allocation28_spill] sm:$0xff] }
 0x148   : > { %3411 = vst [vmem:[#allocation38_spill] sm:$0xff] %v2871_v5  ;;  %3414 = vst [vmem:[#allocation39_spill] sm:$0xff] %v2878_v35  ;;  %v2885_v37 = vsel %vm1129_vm1, %v3416_v63, %v3415_v40  ;;  %v2899_v56 = vsel %vm1129_vm1, %v3421_v45, %v1166_v36  ;;  %v1316_v50 = vrot.slane %v2774_v59, 2  ;;  %v1260_v16 = vmul.f32 %v2906_v12, %v1237_v9  ;;  %v3427_v63 = vld [vmem:[#allocation25_spill] sm:$0xff]  ;;  %v2946_v26 = vld [vmem:[%s2135_s12 + $0xb0] sm:$0xff] }
 0x149   : > { %3417 = vst [vmem:[#allocation40_spill] sm:$0xff] %v2885_v37  ;;  %3422 = vst [vmem:[#allocation4_spill] sm:$0xff] %v2899_v56  ;;  %v1261_v61 = vmul.f32 %v2910_v30, %v1237_v9  ;;  %v1318_v28 = vrot.slane %v2777_v7, 2  ;;  %v1262_v36 = vmul.f32 %v1237_v9, %v2427_v39  ;;  %v1314_v24 = vsel %vm1129_vm1, %v1311_v60, %v1313_v27  ;;  %v2927_v7 = vpop.permute.xlu1 %342  ;;  %v2929_v9 = vpop.permute.xlu0 %340  ;;  %v3426_v27 = vld [vmem:[#allocation24_spill] sm:$0xff]  ;;  %v3432_v2 = vld [vmem:[#allocation9_spill] sm:$0xff] }
 0x14a   : > { %v1312_v59 = vsel %vm1129_vm1, %v1310_v13, %v1311_v60  ;;  %v2921_v15 = vmul.f32 %v2906_v12, %v3425_v44  ;;  %v2925_v47 = vmul.f32 %v2910_v30, %v3425_v44  ;;  %v2935_v60 = vmul.f32 %v3425_v44, %v2427_v39  ;;  %1348 = vrot.lane.b32.xlu1 %v1314_v24, %s1944_s13 }
 0x14b   : > { %v1240_v46 = vstv %s1893_s7  ;;  %v2943_v56 = vmul.f32 %v2939_v8, %v3429_v17  ;;  %v2950_v40 = vmul.f32 %v2946_v26, %v3429_v17  ;;  %v1320_v13 = vrot.slane %v1260_v16, 2  ;;  %1346 = vrot.lane.b32.xlu0 %v1312_v59, %s1944_s13  ;;  %v3430_v59 = vld [vmem:[#allocation10_spill] sm:$0xff] }
 0x14c   : > { %v1321_v44 = vrot.slane %v1261_v61, 2  ;;  %v1323_v37 = vrot.slane %v1262_v36, 2  ;;  %v1319_v45 = vsel %vm1129_vm1, %v1316_v50, %v1318_v28  ;;  %v1317_v35 = vsel %vm1129_vm1, %v1315_v25, %v1316_v50 }
 0x14d   : > { %v1263_v41 = vmul.f32 %v2939_v8, %v1240_v46  ;;  %v1264_v1 = vmul.f32 %v2946_v26, %v1240_v46  ;;  %v451_v16 = vpop.permute.xlu1 %450  ;;  %v449_v22 = vpop.permute.xlu0 %448  ;;  %v1265_v24 = vmul.f32 %v1240_v46, %v2449_v10  ;;  %v1411_v36 = vstv %s1895_s14 }
 0x14e   : > { %v497_v61 = vadd.f32 %v451_v16, %v2653_v34  ;;  %v496_v28 = vadd.f32 %v449_v22, %v2656_v51  ;;  %v2965_v25 = vmul.f32 %v3429_v17, %v2449_v10  ;;  %v1414_v50 = vstv %s1897_s15  ;;  %1352 = vrot.lane.b32.xlu1 %v1319_v45, %s1944_s13  ;;  %v3435_v16 = vld [vmem:[#allocation8_spill] sm:$0xff] }
 0x14f   : > { %1350 = vrot.lane.b32.xlu0 %v1317_v35, %s1944_s13  ;;  %v3431_v5 = vrot.slane %v3430_v59, 1  ;;  %v3433_v19 = vrot.slane %v3432_v2, 1  ;;  %v3436_v51 = vrot.slane %v3435_v16, 1  ;;  %v1324_v17 = vsel %vm1129_vm1, %v1321_v44, %v1323_v37  ;;  %v1926_v59 = vld [vmem:[%s2135_s12] sm:$0xff] }
 0x150   : > { %v1322_v21 = vsel %vm1129_vm1, %v1320_v13, %v1321_v44  ;;  %v1325_v45 = vrot.slane %v1263_v41, 2  ;;  %v1434_v3 = vmul.f32 %v1926_v59, %v1411_v36  ;;  %v1436_v2 = vmul.f32 %v1411_v36, %v2285_v11 }
 0x151   : > { %v597_v46 = vsel %vm592_vm0, %v3433_v19, %v3431_v5  ;;  %v3434_v34 = vmov %v3433_v19  ;;  %v1435_v19 = vmul.f32 %v1927_v29, %v1411_v36  ;;  %v455_v5 = vpop.permute.xlu1 %454  ;;  %v453_v16 = vpop.permute.xlu0 %452  ;;  %v1328_v37 = vrot.slane %v1265_v24, 2  ;;  %v3437_v29 = vld [vmem:[#allocation14_spill] sm:$0xff]  ;;  %v3439_v36 = vld [vmem:[#allocation13_spill] sm:$0xff] }
 0x152   : > { %v595_v22 = vsel %vm592_vm0, %v3436_v51, %v3434_v34  ;;  %v2981_v6 = vadd.f32 %v597_v46, %v497_v61  ;;  %v1326_v34 = vrot.slane %v1264_v1, 2  ;;  %v499_v13 = vadd.f32 %v455_v5, %v2680_v53  ;;  %1356 = vrot.lane.b32.xlu1 %v1324_v17, %s1944_s13  ;;  %v3442_v53 = vld [vmem:[#allocation12_spill] sm:$0xff] }
 0x153   : > { %v2983_v35 = vadd.f32 %v595_v22, %v496_v28  ;;  %v498_v44 = vadd.f32 %v453_v16, %v2683_v49  ;;  %v626_v61 = vrot.slane %v2935_v60, 1  ;;  %v1928_v28 = vld [vmem:[%s2135_s12 + $0x18] sm:$0xff]  ;;  %1354 = vrot.lane.b32.xlu0 %v1322_v21, %s1944_s13  ;;  %v3438_v11 = vrot.slane %v3437_v29, 1  ;;  %v1929_v22 = vld [vmem:[%s2135_s12 + $0x20] sm:$0xff] }
 0x154   : > { %v2992_v41 = vmul.f32 %v1928_v28, %v1414_v50  ;;  %v3440_v46 = vrot.slane %v3439_v36, 1  ;;  %v3443_v51 = vrot.slane %v3442_v53, 1  ;;  %v3007_v59 = vmul.f32 %v1929_v22, %v1414_v50 }
 0x155   : > { %v1417_v5 = vstv %s1899_s5  ;;  %v1482_v16 = vrot.slane %v1434_v3, 2  ;;  %v1483_v28 = vrot.slane %v1435_v19, 2  ;;  %v1485_v29 = vrot.slane %v1436_v2, 2  ;;  %v459_v36 = vpop.permute.xlu1 %458  ;;  %v1930_v3 = vld [vmem:[%s2135_s12 + $0x30] sm:$0xff] }
 0x156   : > { %v602_v1 = vsel %vm592_vm0, %v3440_v46, %v3438_v11  ;;  %v3441_v24 = vmov %v3440_v46  ;;  %v1439_v11 = vmul.f32 %v1414_v50, %v2300_v31  ;;  %v457_v46 = vpop.permute.xlu0 %456  ;;  %v3020_v19 = vmul.f32 %v1930_v3, %v1417_v5  ;;  %v3444_v31 = vld [vmem:[#allocation17_spill] sm:$0xff]  ;;  %v3446_v2 = vld [vmem:[#allocation16_spill] sm:$0xff] }
 0x157   : > { %v600_v49 = vsel %vm592_vm0, %v3443_v51, %v3441_v24  ;;  %v3009_v17 = vadd.f32 %v602_v1, %v499_v13  ;;  %v501_v24 = vadd.f32 %v459_v36, %v2712_v54  ;;  %v500_v53 = vadd.f32 %v457_v46, %v2715_v57 }
 0x158   : > { %v3011_v21 = vadd.f32 %v600_v49, %v498_v44  ;;  %v1329_v51 = vsel %vm1129_vm1, %v1326_v34, %v1328_v37  ;;  %v1327_v13 = vsel %vm1129_vm1, %v1325_v45, %v1326_v34  ;;  %v1487_v44 = vrot.slane %v2992_v41, 2  ;;  %v3449_v37 = vld [vmem:[#allocation15_spill] sm:$0xff]  ;;  %v1931_v41 = vld [vmem:[%s2135_s12 + $0x38] sm:$0xff] }
 0x159   : > { %1360 = vrot.lane.b32.xlu1 %v1329_v51, %s1944_s13  ;;  %1358 = vrot.lane.b32.xlu0 %v1327_v13, %s1944_s13  ;;  %v3445_v50 = vrot.slane %v3444_v31, 1  ;;  %v3447_v54 = vrot.slane %v3446_v2, 1  ;;  %v3450_v49 = vrot.slane %v3449_v37, 1  ;;  %v1488_v34 = vrot.slane %v3007_v59, 2  ;;  %s1905_s13 = spop %1904 }
 0x15a   : > { %v1441_v22 = vmul.f32 %v1931_v41, %v1417_v5  ;;  %v1490_v51 = vrot.slane %v1439_v11, 2  ;;  %v1442_v13 = vmul.f32 %v1417_v5, %v2324_v48  ;;  %v1420_v3 = vstv %s1901_s8  ;;  %v461_v2 = vpop.permute.xlu0 %460  ;;  %v3451_v48 = vld [vmem:[#allocation20_spill] sm:$0xff]  ;;  %s1907_s16 = spop %1906 }
 0x15b   : > { %v607_v57 = vsel %vm592_vm0, %v3447_v54, %v3445_v50  ;;  %v3448_v1 = vmov %v3447_v54  ;;  %v1423_v31 = vstv %s1903_s11  ;;  %v463_v50 = vpop.permute.xlu1 %462  ;;  %v1486_v59 = vsel %vm1129_vm1, %v1483_v28, %v1485_v29  ;;  %v3456_v29 = vld [vmem:[#allocation18_spill] sm:$0xff] }
 0x15c   : > { %v605_v45 = vsel %vm592_vm0, %v3450_v49, %v3448_v1  ;;  %v3036_v36 = vadd.f32 %v607_v57, %v501_v24  ;;  %v503_v54 = vadd.f32 %v463_v50, %v2733_v18  ;;  %v502_v1 = vadd.f32 %v461_v2, %v2736_v33  ;;  %v3453_v57 = vld [vmem:[#allocation19_spill] sm:$0xff] }
 0x15d   : > { %v3038_v46 = vadd.f32 %v605_v45, %v500_v53  ;;  %v1484_v24 = vsel %vm1129_vm1, %v1482_v16, %v1483_v28  ;;  %v628_v53 = vrot.slane %v2943_v56, 1  ;;  %v1492_v11 = vrot.slane %v3020_v19, 2  ;;  %1524 = vrot.lane.b32.xlu1 %v1486_v59, %s1945_s28  ;;  %v1932_v45 = vld [vmem:[%s2135_s12 + $0x48] sm:$0xff]  ;;  %v1933_v59 = vld [vmem:[%s2135_s12 + $0x50] sm:$0xff] }
 0x15e   : > { %1522 = vrot.lane.b32.xlu0 %v1484_v24, %s1945_s28  ;;  %v3452_v5 = vrot.slane %v3451_v48, 1  ;;  %v3454_v18 = vrot.slane %v3453_v57, 1  ;;  %v3457_v49 = vrot.slane %v3456_v29, 1  ;;  %v1493_v28 = vrot.slane %v1441_v22, 2  ;;  %v465_v29 = vpop.permute.xlu0 %464 }
 0x15f   : > { %v1443_v41 = vmul.f32 %v1932_v45, %v1420_v3  ;;  %v1495_v2 = vrot.slane %v1442_v13, 2  ;;  %v1444_v24 = vmul.f32 %v1933_v59, %v1420_v3  ;;  %v1445_v48 = vmul.f32 %v1420_v3, %v2346_v4  ;;  %v467_v57 = vpop.permute.xlu1 %466 }
 0x160   : > { %v612_v37 = vsel %vm592_vm0, %v3454_v18, %v3452_v5  ;;  %v3455_v33 = vmov %v3454_v18  ;;  %v1934_v5 = vld [vmem:[%s2135_s12 + $0x60] sm:$0xff]  ;;  %v505_v22 = vadd.f32 %v467_v57, %v2752_v42  ;;  %v629_v13 = vrot.slane %v2950_v40, 1 }
 0x161   : > { %v610_v16 = vsel %vm592_vm0, %v3457_v49, %v3455_v33  ;;  %v3060_v19 = vadd.f32 %v612_v37, %v503_v54  ;;  %v3067_v18 = vmul.f32 %v1934_v5, %v1423_v31  ;;  %v504_v54 = vadd.f32 %v465_v29, %v2755_v14  ;;  %v1935_v33 = vld [vmem:[%s2135_s12 + $0x68] sm:$0xff]  ;;  %s1909_s12 = spop %1908 }
 0x162   : > { %v3062_v50 = vadd.f32 %v610_v16, %v502_v1  ;;  %v1491_v1 = vsel %vm1129_vm1, %v1488_v34, %v1490_v51  ;;  %v1489_v37 = vsel %vm1129_vm1, %v1487_v44, %v1488_v34  ;;  %v1447_v49 = vmul.f32 %v1935_v33, %v1423_v31  ;;  %v3461_v16 = vld [vmem:[#allocation21_spill] sm:$0xff]  ;;  %v469_v33 = vpop.permute.xlu0 %468 }
 0x163   : > { %1528 = vrot.lane.b32.xlu1 %v1491_v1, %s1945_s28  ;;  %1526 = vrot.lane.b32.xlu0 %v1489_v37, %s1945_s28  ;;  %v3458_v4 = vrot.slane %v3424_v55, 1  ;;  %v3459_v3 = vrot.slane %v3423_v32, 1  ;;  %v3462_v51 = vrot.slane %v3461_v16, 1  ;;  %v1497_v34 = vrot.slane %v1443_v41, 2  ;;  %v471_v37 = vpop.permute.xlu1 %470 }
 0x164   : > { %v1448_v45 = vmul.f32 %v1423_v31, %v2375_v23  ;;  %v1498_v57 = vrot.slane %v1444_v24, 2  ;;  %v1500_v29 = vrot.slane %v1445_v48, 2  ;;  %v1426_v55 = vstv %s1905_s13 }
 0x165   : > { %v617_v42 = vsel %vm592_vm0, %v3459_v3, %v3458_v4  ;;  %v3460_v14 = vmov %v3459_v3  ;;  %v1429_v1 = vstv %s1907_s16  ;;  %v507_v4 = vadd.f32 %v471_v37, %v2789_v52 }
 0x166   : > { %v615_v44 = vsel %vm592_vm0, %v3462_v51, %v3460_v14  ;;  %v3088_v59 = vadd.f32 %v617_v42, %v505_v22  ;;  %v506_v32 = vadd.f32 %v469_v33, %v2792_v0  ;;  %v1496_v3 = vsel %vm1129_vm1, %v1493_v28, %v1495_v2  ;;  %v3468_v42 = vld [vmem:[#allocation35_spill] sm:$0xff]  ;;  %v473_v37 = vpop.permute.xlu0 %472 }
 0x167   : > { %v3090_v5 = vadd.f32 %v615_v44, %v504_v54  ;;  %v1494_v41 = vsel %vm1129_vm1, %v1492_v11, %v1493_v28  ;;  %v1502_v23 = vrot.slane %v3067_v18, 2  ;;  %v1503_v31 = vrot.slane %v1447_v49, 2  ;;  %1532 = vrot.lane.b32.xlu1 %v1496_v3, %s1945_s28  ;;  %v3467_v28 = vld [vmem:[#allocation34_spill] sm:$0xff] }
 0x168   : > { %1530 = vrot.lane.b32.xlu0 %v1494_v41, %s1945_s28  ;;  %v3463_v24 = vrot.slane %v3428_v20, 1  ;;  %v3464_v48 = vrot.slane %v3427_v63, 1  ;;  %v3466_v0 = vrot.slane %v3426_v27, 1  ;;  %v1505_v11 = vrot.slane %v1448_v45, 2  ;;  %v3469_v20 = vld [vmem:[#allocation11_spill] sm:$0xff]  ;;  %v475_v63 = vpop.permute.xlu1 %474 }
 0x169   : > { %v1449_v18 = vmul.f32 %v3467_v28, %v1426_v55  ;;  %v1450_v14 = vmul.f32 %v3468_v42, %v1426_v55  ;;  %v1451_v16 = vmul.f32 %v1426_v55, %v3469_v20  ;;  %v1452_v51 = vmul.f32 %v2906_v12, %v1429_v1 }
 0x16a   : > { %v622_v22 = vsel %vm592_vm0, %v3464_v48, %v3463_v24  ;;  %v3465_v52 = vmov %v3464_v48  ;;  %v1453_v44 = vmul.f32 %v2910_v30, %v1429_v1  ;;  %v509_v27 = vadd.f32 %v475_v63, %v2888_v38 }
 0x16b   : > { %v620_v2 = vsel %vm592_vm0, %v3466_v0, %v3465_v52  ;;  %v3110_v54 = vadd.f32 %v622_v22, %v507_v4  ;;  %v508_v45 = vadd.f32 %v473_v37, %v2891_v43  ;;  %v1501_v33 = vsel %vm1129_vm1, %v1498_v57, %v1500_v29 }
 0x16c   : > { %v3112_v49 = vadd.f32 %v620_v2, %v506_v32  ;;  %v1499_v4 = vsel %vm1129_vm1, %v1497_v34, %v1498_v57  ;;  %v631_v32 = vrot.slane %v2965_v25, 1  ;;  %v1454_v3 = vmul.f32 %v1429_v1, %v2427_v39  ;;  %1536 = vrot.lane.b32.xlu1 %v1501_v33, %s1945_s28  ;;  %v3473_v57 = vld [vmem:[#allocation7_spill] sm:$0xff]  ;;  %v3474_v39 = vld [vmem:[#allocation6_spill] sm:$0xff]  ;;  %v479_v48 = vpop.permute.xlu1 %478 }
 0x16d   : > { %1534 = vrot.lane.b32.xlu0 %v1499_v4, %s1945_s28  ;;  %v3470_v12 = vrot.slane %v2925_v47, 1  ;;  %v3472_v30 = vrot.slane %v2921_v15, 1  ;;  %v375_v25 = vadd.f32 %v2927_v7, %v3473_v57  ;;  %v374_v29 = vadd.f32 %v2929_v9, %v3474_v39  ;;  %v477_v47 = vpop.permute.xlu0 %476 }
 0x16e   : > { %v1507_v60 = vrot.slane %v1449_v18, 2  ;;  %v1508_v41 = vrot.slane %v1450_v14, 2  ;;  %v1510_v24 = vrot.slane %v1451_v16, 2  ;;  %v1506_v52 = vsel %vm1129_vm1, %v1503_v31, %v1505_v11 }
 0x16f   : > { %v627_v38 = vsel %vm592_vm0, %v3470_v12, %v626_v61  ;;  %v3471_v43 = vmov %v3470_v12  ;;  %v1432_v61 = vstv %s1909_s12  ;;  %v511_v22 = vadd.f32 %v479_v48, %v375_v25 }
 0x170   : > { %v625_v34 = vsel %vm592_vm0, %v3472_v30, %v3471_v43  ;;  %v3140_v55 = vadd.f32 %v627_v38, %v509_v27  ;;  %v510_v15 = vadd.f32 %v477_v47, %v374_v29  ;;  %v1504_v0 = vsel %vm1129_vm1, %v1502_v23, %v1503_v31  ;;  %1540 = vrot.lane.b32.xlu1 %v1506_v52, %s1945_s28  ;;  %v796_v20 = vpop.permute.xlu1 %795 }
 0x171   : > { %v3142_v1 = vadd.f32 %v625_v34, %v508_v45  ;;  %1538 = vrot.lane.b32.xlu0 %v1504_v0, %s1945_s28  ;;  %v632_v7 = vsel %vm592_vm0, %v629_v13, %v631_v32  ;;  %v630_v9 = vsel %vm592_vm0, %v628_v53, %v629_v13  ;;  %v1512_v2 = vrot.slane %v1452_v51, 2  ;;  %v794_v16 = vpop.permute.xlu0 %793 }
 0x172   : > { %v1455_v28 = vmul.f32 %v2939_v8, %v1432_v61  ;;  %v664_v11 = vadd.f32 %v632_v7, %v511_v22  ;;  %v663_v18 = vadd.f32 %v630_v9, %v510_v15  ;;  %v1513_v23 = vrot.slane %v1453_v44, 2  ;;  %v3475_v9 = vld [vmem:[#allocation30_spill] sm:$0xff] }
 0x173   : > { %v1515_v31 = vrot.slane %v1454_v3, 2  ;;  %v1456_v42 = vmul.f32 %v2946_v26, %v1432_v61  ;;  %v1457_v14 = vmul.f32 %v1432_v61, %v2449_v10  ;;  %v842_v63 = vadd.f32 %v796_v20, %v2981_v6 }
 0x174   : > { %v841_v40 = vadd.f32 %v794_v16, %v2983_v35  ;;  %v1511_v56 = vsel %vm1129_vm1, %v1508_v41, %v1510_v24  ;;  %v1509_v53 = vsel %vm1129_vm1, %v1507_v60, %v1508_v41  ;;  %v1517_v8 = vrot.slane %v1455_v28, 2  ;;  %v800_v26 = vpop.permute.xlu1 %799 }
 0x175   : > { %1544 = vrot.lane.b32.xlu1 %v1511_v56, %s1945_s28  ;;  %1542 = vrot.lane.b32.xlu0 %v1509_v53, %s1945_s28  ;;  %v1518_v13 = vrot.slane %v1456_v42, 2  ;;  %v1520_v51 = vrot.slane %v1457_v14, 2  ;;  %v798_v44 = vpop.permute.xlu0 %797  ;;  %v844_v10 = vadd.f32 %v800_v26, %v3009_v17  ;;  %v1516_v6 = vsel %vm1129_vm1, %v1513_v23, %v1515_v31  ;;  %v3477_v31 = vld [vmem:[#allocation2_spill] sm:$0xff]  ;;  %v3480_v53 = vld [vmem:[#allocation32_spill] sm:$0xff] }
 0x176   : > { %v843_v37 = vadd.f32 %v798_v44, %v3011_v21  ;;  %v1514_v35 = vsel %vm1129_vm1, %v1512_v2, %v1513_v23 }
 0x177   : > { %v1521_v32 = vsel %vm1129_vm1, %v1518_v13, %v1520_v51  ;;  %v1519_v17 = vsel %vm1129_vm1, %v1517_v8, %v1518_v13 }
 0x178   : > { %v804_v27 = vpop.permute.xlu1 %803 }
 0x179   : > { %1548 = vrot.lane.b32.xlu1 %v1516_v6, %s1945_s28  ;;  %1546 = vrot.lane.b32.xlu0 %v1514_v35, %s1945_s28  ;;  %v802_v45 = vpop.permute.xlu0 %801  ;;  %v846_v33 = vadd.f32 %v804_v27, %v3036_v36  ;;  %v3482_v6 = vld [vmem:[#allocation36_spill] sm:$0xff] }
 0x17a   : > { %v845_v4 = vadd.f32 %v802_v45, %v3038_v46 }
 0x17c   : > { %v808_v21 = vpop.permute.xlu1 %807 }
 0x17d   : > { %1552 = vrot.lane.b32.xlu1 %v1521_v32, %s1945_s28  ;;  %1550 = vrot.lane.b32.xlu0 %v1519_v17, %s1945_s28  ;;  %v806_v3 = vpop.permute.xlu0 %805  ;;  %v848_v12 = vadd.f32 %v808_v21, %v3060_v19  ;;  %v3483_v32 = vld [vmem:[#allocation37_spill] sm:$0xff]  ;;  %v3484_v21 = vld [vmem:[#allocation38_spill] sm:$0xff]  ;;  %s1748_s28 = sshll.u32 %s3490_s10, 6 }
 0x17e   : > { %v847_v38 = vadd.f32 %v806_v3, %v3062_v50  ;;  %s3241_s19 = scalar_lea.vmem %s3298_s2, %s1748_s28 }
 0x180   : > { %v812_v43 = vpop.permute.xlu1 %811 }
 0x181   : > { %v810_v30 = vpop.permute.xlu0 %809  ;;  %v850_v36 = vadd.f32 %v812_v43, %v3088_v59 }
 0x182   : > { %v849_v46 = vadd.f32 %v810_v30, %v3090_v5 }
 0x184   : > { %v816_v34 = vpop.permute.xlu1 %815 }
 0x185   : > { %v814_v57 = vpop.permute.xlu0 %813  ;;  %v852_v25 = vadd.f32 %v816_v34, %v3110_v54  ;;  %v3486_v34 = vld [vmem:[#allocation40_spill] sm:$0xff] }
 0x186   : > { %v851_v39 = vadd.f32 %v814_v57, %v3112_v49 }
 0x188   : > { %v820_v29 = vpop.permute.xlu1 %819 }
 0x189   : > { %v818_v60 = vpop.permute.xlu0 %817  ;;  %v854_v41 = vadd.f32 %v820_v29, %v3140_v55 }
 0x18a   : > { %v853_v19 = vadd.f32 %v818_v60, %v3142_v1  ;;  %v3476_v1 = vld [vmem:[#allocation3_spill] sm:$0xff] }
 0x18c   : > { %v824_v24 = vpop.permute.xlu1 %823 }
 0x18d   : > { %v822_v50 = vpop.permute.xlu0 %821  ;;  %v856_v61 = vadd.f32 %v824_v24, %v664_v11  ;;  %v3487_v24 = vld [vmem:[#allocation5_spill] sm:$0xff] }
 0x18e   : > { %v855_v48 = vadd.f32 %v822_v50, %v663_v18 }
 0x190   : > { %v988_v47 = vpop.permute.xlu1 %987 }
 0x191   : > { %v986_v59 = vpop.permute.xlu0 %985  ;;  %v1034_v22 = vadd.f32 %v988_v47, %v842_v63  ;;  %v3488_v47 = vld [vmem:[#allocation4_spill] sm:$0xff] }
 0x192   : > { %v1033_v5 = vadd.f32 %v986_v59, %v841_v40  ;;  %v3479_v40 = vld [vmem:[#allocation33_spill] sm:$0xff] }
 0x193   : > { %v1187_v15 = vadd.f32 %v2786_v62, %v1034_v22  ;;  %v3478_v62 = vld [vmem:[#allocation29_spill] sm:$0xff] }
 0x194   : > { %v1186_v54 = vadd.f32 %v2799_v58, %v1033_v5  ;;  %v992_v52 = vpop.permute.xlu1 %991 }
 0x195   : > { %v990_v49 = vpop.permute.xlu0 %989  ;;  %v1036_v0 = vadd.f32 %v992_v52, %v844_v10  ;;  %v3481_v10 = vld [vmem:[#allocation31_spill] sm:$0xff] }
 0x196   : > { %v1035_v7 = vadd.f32 %v990_v49, %v843_v37 }
 0x197   : > { %v3188_v55 = vadd.f32 %v3475_v9, %v1036_v0 }
 0x198   : > { %v3191_v2 = vadd.f32 %v3476_v1, %v1035_v7  ;;  %v996_v28 = vpop.permute.xlu1 %995 }
 0x199   : > { %v994_v11 = vpop.permute.xlu0 %993  ;;  %v1038_v18 = vadd.f32 %v996_v28, %v846_v33 }
 0x19a   : > { %v1037_v23 = vadd.f32 %v994_v11, %v845_v4 }
 0x19b   : > { %v3194_v42 = vadd.f32 %v3477_v31, %v1038_v18 }
 0x19c   : > { %v3197_v14 = vadd.f32 %v3478_v62, %v1037_v23  ;;  %v1000_v58 = vpop.permute.xlu1 %999 }
 0x19d   : > { %v998_v20 = vpop.permute.xlu0 %997  ;;  %v1040_v16 = vadd.f32 %v1000_v58, %v848_v12 }
 0x19e   : > { %v1039_v63 = vadd.f32 %v998_v20, %v847_v38 }
 0x19f   : > { %v3200_v56 = vadd.f32 %v3479_v40, %v1040_v16 }
 0x1a0   : > { %v3203_v8 = vadd.f32 %v3480_v53, %v1039_v63  ;;  %v1004_v13 = vpop.permute.xlu1 %1003 }
 0x1a1   : > { %v1002_v51 = vpop.permute.xlu0 %1001  ;;  %v1042_v26 = vadd.f32 %v1004_v13, %v850_v36  ;;  %v3485_v36 = vld [vmem:[#allocation39_spill] sm:$0xff] }
 0x1a2   : > { %v1041_v44 = vadd.f32 %v1002_v51, %v849_v46 }
 0x1a3   : > { %v3206_v37 = vadd.f32 %v3481_v10, %v1042_v26 }
 0x1a4   : > { %v3209_v35 = vadd.f32 %v3482_v6, %v1041_v44  ;;  %v1008_v27 = vpop.permute.xlu1 %1007 }
 0x1a5   : > { %v1006_v45 = vpop.permute.xlu0 %1005  ;;  %v1044_v33 = vadd.f32 %v1008_v27, %v852_v25 }
 0x1a6   : > { %v1043_v4 = vadd.f32 %v1006_v45, %v851_v39 }
 0x1a7   : > { %v3212_v17 = vadd.f32 %v3483_v32, %v1044_v33 }
 0x1a8   : > { %v3215_v3 = vadd.f32 %v3484_v21, %v1043_v4  ;;  %v1012_v12 = vpop.permute.xlu1 %1011 }
 0x1a9   : > { %v1010_v38 = vpop.permute.xlu0 %1009  ;;  %v1046_v43 = vadd.f32 %v1012_v12, %v854_v41 }
 0x1aa   : > { %v1045_v30 = vadd.f32 %v1010_v38, %v853_v19 }
 0x1ab   : > { %v3218_v46 = vadd.f32 %v3485_v36, %v1046_v43 }
 0x1ac   : > { %v3221_v57 = vadd.f32 %v3486_v34, %v1045_v30  ;;  %v1016_v29 = vpop.permute.xlu1 %1015 }
 0x1ad   : > { %v1014_v60 = vpop.permute.xlu0 %1013  ;;  %v1048_v25 = vadd.f32 %v1016_v29, %v856_v61 }
 0x1ae   : > { %v1047_v39 = vadd.f32 %v1014_v60, %v855_v48 }
 0x1af   : > { %v3224_v50 = vadd.f32 %v3487_v24, %v1048_v25 }
 0x1b0   : > { %v3227_v59 = vadd.f32 %v3488_v47, %v1047_v39  ;;  %v1333_v22 = vpop.permute.xlu1 %1332 }
 0x1b1   : > { %v1331_v5 = vpop.permute.xlu0 %1330  ;;  %v1379_v31 = vadd.f32 %v1333_v22, %v1187_v15 }
 0x1b2   : > { %v1378_v62 = vadd.f32 %v1331_v5, %v1186_v54 }
 0x1b4   : > { %v1337_v41 = vpop.permute.xlu1 %1336 }
 0x1b5   : > { %v1335_v19 = vpop.permute.xlu0 %1334  ;;  %v1381_v40 = vadd.f32 %v1337_v41, %v3188_v55 }
 0x1b6   : > { %v1380_v53 = vadd.f32 %v1335_v19, %v3191_v2 }
 0x1b8   : > { %v1341_v52 = vpop.permute.xlu1 %1340 }
 0x1b9   : > { %v1339_v49 = vpop.permute.xlu0 %1338  ;;  %v1383_v10 = vadd.f32 %v1341_v52, %v3194_v42 }
 0x1ba   : > { %v1382_v6 = vadd.f32 %v1339_v49, %v3197_v14 }
 0x1bc   : > { %v1345_v0 = vpop.permute.xlu1 %1344 }
 0x1bd   : > { %v1343_v7 = vpop.permute.xlu0 %1342  ;;  %v1385_v32 = vadd.f32 %v1345_v0, %v3200_v56 }
 0x1be   : > { %v1384_v21 = vadd.f32 %v1343_v7, %v3203_v8 }
 0x1c0   : > { %v1349_v9 = vpop.permute.xlu1 %1348 }
 0x1c1   : > { %v1347_v1 = vpop.permute.xlu0 %1346  ;;  %v1387_v36 = vadd.f32 %v1349_v9, %v3206_v37 }
 0x1c2   : > { %v1386_v34 = vadd.f32 %v1347_v1, %v3209_v35 }
 0x1c4   : > { %v1353_v28 = vpop.permute.xlu1 %1352 }
 0x1c5   : > { %v1351_v61 = vpop.permute.xlu0 %1350  ;;  %v1389_v24 = vadd.f32 %v1353_v28, %v3212_v17 }
 0x1c6   : > { %v1388_v47 = vadd.f32 %v1351_v61, %v3215_v3 }
 0x1c8   : > { %v3229_v48 = vpop.permute.xlu1 %1356 }
 0x1c9   : > { %v3231_v11 = vpop.permute.xlu0 %1354  ;;  %v1391_v52 = vadd.f32 %v3229_v48, %v3218_v46 }
 0x1ca   : > { %v1390_v17 = vadd.f32 %v3231_v11, %v3221_v57 }
 0x1cc   : > { %v3233_v18 = vpop.permute.xlu1 %1360 }
 0x1cd   : > { %v3235_v23 = vpop.permute.xlu0 %1358  ;;  %v1393_v46 = vadd.f32 %v3233_v18, %v3224_v50 }
 0x1ce   : > { %v1392_v28 = vadd.f32 %v3235_v23, %v3227_v59 }
 0x1d0   : > { %v1525_v58 = vpop.permute.xlu1 %1524 }
 0x1d1   : > { %v1523_v20 = vpop.permute.xlu0 %1522  ;;  %v1571_v16 = vadd.f32 %v1525_v58, %v1379_v31 }
 0x1d2   : > { %v1570_v63 = vadd.f32 %v1523_v20, %v1378_v62 }
 0x1d3   : > { %v1750_v15 = vpack.c.bf16 %v1571_v16, %v1571_v16 }
 0x1d4   : > { %v1749_v54 = vpack.c.bf16 %v1570_v63, %v1570_v63 }
 0x1d5   : > { %v1529_v13 = vpop.permute.xlu1 %1528  ;;  %v1527_v51 = vpop.permute.xlu0 %1526  ;;  %1652 = vst.msk [vmem:[%s3241_s19 + $0x4] sm:$0xf] %vm1650_vm2, %v1750_v15 }
 0x1d6   : > { %1651 = vst.msk [vmem:[%s3241_s19] sm:$0xf] %vm1650_vm2, %v1749_v54  ;;  %v1573_v26 = vadd.f32 %v1529_v13, %v1381_v40  ;;  %v1572_v44 = vadd.f32 %v1527_v51, %v1380_v53 }
 0x1d8   : > { %v1752_v55 = vpack.c.bf16 %v1573_v26, %v1573_v26  ;;  %v1751_v27 = vpack.c.bf16 %v1572_v44, %v1572_v44 }
 0x1d9   : > { %v1533_v2 = vpop.permute.xlu1 %1532 }
 0x1da   : > { %v1531_v45 = vpop.permute.xlu0 %1530  ;;  %1654 = vst.msk [vmem:[%s3241_s19 + $0xc] sm:$0xf] %vm1650_vm2, %v1752_v55  ;;  %1653 = vst.msk [vmem:[%s3241_s19 + $0x8] sm:$0xf] %vm1650_vm2, %v1751_v27  ;;  %v1575_v33 = vadd.f32 %v1533_v2, %v1383_v10 }
 0x1db   : > { %v1574_v4 = vadd.f32 %v1531_v45, %v1382_v6 }
 0x1dc   : > { %v1754_v42 = vpack.c.bf16 %v1575_v33, %v1575_v33 }
 0x1dd   : > { %v1753_v12 = vpack.c.bf16 %v1574_v4, %v1574_v4 }
 0x1de   : > { %v1537_v14 = vpop.permute.xlu1 %1536  ;;  %1656 = vst.msk [vmem:[%s3241_s19 + $0x14] sm:$0xf] %vm1650_vm2, %v1754_v42 }
 0x1df   : > { %v1535_v38 = vpop.permute.xlu0 %1534  ;;  %1655 = vst.msk [vmem:[%s3241_s19 + $0x10] sm:$0xf] %vm1650_vm2, %v1753_v12  ;;  %v1577_v43 = vadd.f32 %v1537_v14, %v1385_v32 }
 0x1e0   : > { %v1576_v30 = vadd.f32 %v1535_v38, %v1384_v21 }
 0x1e1   : > { %v1756_v56 = vpack.c.bf16 %v1577_v43, %v1577_v43 }
 0x1e2   : > { %v1755_v29 = vpack.c.bf16 %v1576_v30, %v1576_v30  ;;  %v1541_v8 = vpop.permute.xlu1 %1540 }
 0x1e3   : > { %v1539_v60 = vpop.permute.xlu0 %1538  ;;  %1658 = vst.msk [vmem:[%s3241_s19 + $0x1c] sm:$0xf] %vm1650_vm2, %v1756_v56  ;;  %v1579_v25 = vadd.f32 %v1541_v8, %v1387_v36 }
 0x1e4   : > { %1657 = vst.msk [vmem:[%s3241_s19 + $0x18] sm:$0xf] %vm1650_vm2, %v1755_v29  ;;  %v1578_v39 = vadd.f32 %v1539_v60, %v1386_v34 }
 0x1e5   : > { %v1758_v37 = vpack.c.bf16 %v1579_v25, %v1579_v25 }
 0x1e6   : > { %v1757_v22 = vpack.c.bf16 %v1578_v39, %v1578_v39 }
 0x1e7   : > { %v1545_v35 = vpop.permute.xlu1 %1544  ;;  %v1543_v5 = vpop.permute.xlu0 %1542  ;;  %1660 = vst.msk [vmem:[%s3241_s19 + $0x24] sm:$0xf] %vm1650_vm2, %v1758_v37 }
 0x1e8   : > { %1659 = vst.msk [vmem:[%s3241_s19 + $0x20] sm:$0xf] %vm1650_vm2, %v1757_v22  ;;  %v1581_v41 = vadd.f32 %v1545_v35, %v1389_v24  ;;  %v1580_v19 = vadd.f32 %v1543_v5, %v1388_v47 }
 0x1ea   : > { %v1760_v3 = vpack.c.bf16 %v1581_v41, %v1581_v41  ;;  %v1759_v49 = vpack.c.bf16 %v1580_v19, %v1580_v19 }
 0x1eb   : > { %v1549_v0 = vpop.permute.xlu1 %1548  ;;  %v1547_v7 = vpop.permute.xlu0 %1546 }
 0x1ec   : > { %1662 = vst.msk [vmem:[%s3241_s19 + $0x2c] sm:$0xf] %vm1650_vm2, %v1760_v3  ;;  %1661 = vst.msk [vmem:[%s3241_s19 + $0x28] sm:$0xf] %vm1650_vm2, %v1759_v49  ;;  %v1583_v9 = vadd.f32 %v1549_v0, %v1391_v52  ;;  %v1582_v1 = vadd.f32 %v1547_v7, %v1390_v17 }
 0x1ee   : > { %v1762_v57 = vpack.c.bf16 %v1583_v9, %v1583_v9  ;;  %v1761_v61 = vpack.c.bf16 %v1582_v1, %v1582_v1 }
 0x1ef   : > { %v1553_v48 = vpop.permute.xlu1 %1552  ;;  %v1551_v11 = vpop.permute.xlu0 %1550 }
 0x1f0   : > { %1664 = vst.msk [vmem:[%s3241_s19 + $0x34] sm:$0xf] %vm1650_vm2, %v1762_v57  ;;  %1663 = vst.msk [vmem:[%s3241_s19 + $0x30] sm:$0xf] %vm1650_vm2, %v1761_v61  ;;  %v1585_v31 = vadd.f32 %v1553_v48, %v1393_v46  ;;  %v1584_v62 = vadd.f32 %v1551_v11, %v1392_v28 }
 0x1f2   : > { %v1764_v58 = vpack.c.bf16 %v1585_v31, %v1585_v31  ;;  %v1763_v20 = vpack.c.bf16 %v1584_v62, %v1584_v62 }
 0x1f4   : > { %1666 = vst.msk [vmem:[%s3241_s19 + $0x3c] sm:$0xf] %vm1650_vm2, %v1764_v58  ;;  %1665 = vst.msk [vmem:[%s3241_s19 + $0x38] sm:$0xf] %vm1650_vm2, %v1763_v20 }
 0x1f5 PF: > { %s12_s9 = sadd.s32 1, %s1942_s9  }
 0x1f6   : > { %p9_p4 = scmp.ge.s32.totalorder %s12_s9, 4  }
 0x1f8   :  { %11 = sbr.rel (!%p9_p4) target bundleno = 1 (0x1), region = 58 }

// kernel: linear_attention_forward.7
= control target key start
LH: loop header
LB: loop body
LE: loop exit
PB: predicated region body
PF: predicated region fallthrough
CT: control target
= control target key end

     0   :  { %s1610_s21 = smov 0   ;;  %s1612_s22 = smov 0   ;;  %s1925_s0 = inlined_call_operand.vmem [shape: f32[2,8,256], index: 0, kind: input, shape index: {}]   ;;  %s1926_s1 = inlined_call_operand.vmem [shape: f32[64,8], index: 1, kind: input, shape index: {}]   ;;  %s1927_s2 = inlined_call_operand.vmem [shape: f32[2,4,16,16], index: 2, kind: input, shape index: {}]   ;;  %s1928_s3 = inlined_call_operand.vmem [shape: f32[2,64,1], index: 3, kind: input, shape index: {}]   ;;  %s1929_s4 = inlined_call_operand.vmem [shape: f32[8,64], index: 4, kind: input, shape index: {}]   ;;  %s1930_s5 = inlined_call_operand.vmem [shape: f32[8,1], index: 5, kind: input, shape index: {}]   ;;  %s1931_s6 = inlined_call_operand.vmem [shape: f32[2,8,256], index: 6, kind: output, shape index: {}]  }
   0x1   :  { %s1614_s23 = smov 0  }
   0x2 LB: > { %s28_s24 = sadd.s32 1, %s1565_s22  ;;  %p1387_p0 = scmp.ge.s32.totalorder %s1569_s23, 1  ;;  %s1569_s23 = sphi %s1614_s23, %s16_s23   ;;  %s1565_s22 = sphi %s1612_s22, %s1933_s22   ;;  %s1561_s21 = sphi %s1610_s21, %s1932_s21  }
   0x3   : > { %p30_p1 = scmp.ge.s32.totalorder %s28_s24, 2  ;;  %p253_p2 = scmp.lt.s32.totalorder %s1569_s23, 3 }
   0x5   : > { %s1935_s24 = smov (%p30_p1, %s28_s24), 0  ;;  %p254_p3 = pnand %p1387_p0, %p253_p2 }
   0x6   : > { %p302_p4 = scmp.lt.s32.totalorder (!%p254_p3), %s1561_s21, 1  ;;  %v1571_v0 = vmov (!%p254_p3), 0   ;;  %v336_v1 = vld [vmem:[%s1926_s1] sm:$0xff] (!%p254_p3)  ;;  %vm361_vm0 = vcmask (!%p254_p3), 1043456   ;;  %v337_v4 = vld [vmem:[%s1926_s1 + $0x8] sm:$0xff] (!%p254_p3)  ;;  %vm348_vm1 = vcmask (!%p254_p3), 64512  }
   0x7   : > { %257 = sbr.rel (%p254_p3) target bundleno = 808 (0x328), region = 44  ;;  %400 = vmatprep.mubr.bf16.mxu0 (!%p254_p3), %v1571_v0  ;;  %1450 = vset.pattern.permute.xlu1 (!%p254_p3), %v1571_v0  ;;  %v344_v11 = vpack.c.bf16 (!%p254_p3), %v337_v4, %v336_v1  ;;  %v338_v15 = vld [vmem:[%s1926_s1 + $0x10] sm:$0xff] (!%p254_p3)  ;;  %v339_v16 = vld [vmem:[%s1926_s1 + $0x18] sm:$0xff] (!%p254_p3)  ;;  %v340_v24 = vld [vmem:[%s1926_s1 + $0x20] sm:$0xff] (!%p254_p3)  ;;  %s1572_s9 = smov (!%p254_p3), 96   ;;  %vm527_vm2 = vcmask (!%p254_p3), 130048  }
   0x8   : > { %1449 = vset.pattern.permute.xlu0 (!%p254_p3), %v1571_v0  ;;  %563 = vmatprep.mubr.bf16.mxu1 (!%p254_p3), %v1571_v0  ;;  %v345_v18 = vpack.c.bf16 (!%p254_p3), %v339_v16, %v338_v15  ;;  %v341_v25 = vld [vmem:[%s1926_s1 + $0x28] sm:$0xff] (!%p254_p3)  ;;  %v457_v30 = vld [vmem:[%s1929_s4] sm:$0xff] (!%p254_p3)  ;;  %v342_v32 = vld [vmem:[%s1926_s1 + $0x30] sm:$0xff] (!%p254_p3)  ;;  %s1573_s12 = smov (!%p254_p3), 112   ;;  %s1574_s13 = smov (!%p254_p3), 80  }
   0x9   : > { %v346_v27 = vpack.c.bf16 (!%p254_p3), %v341_v25, %v340_v24  ;;  %v343_v33 = vld [vmem:[%s1926_s1 + $0x38] sm:$0xff] (!%p254_p3)  ;;  %v1679_v34 = vpack.c.bf16 (!%p254_p3), %v457_v30, %v457_v30  ;;  %v1262_v36 = vld [vmem:[%s1930_s5] sm:$0xff] (!%p254_p3) }
   0xa   : > { %v347_v35 = vpack.c.bf16 (!%p254_p3), %v343_v33, %v342_v32 }
   0xe   : > { %s1937_s21 = smov (!%p302_p4, %s1561_s21), 1 }
   0xf   : > { %s1417_s25 = sshll.u32 %s1937_s21, 4  ;;  %s1418_s26 = sshll.u32 %s1937_s21, 6 }
  0x10   : > { %s309_s29 = scalar_lea.vmem %s1925_s0, %s1417_s25  ;;  %s320_s10 = scalar_lea.vmem %s1928_s3, %s1418_s26 }
  0x11   : > { %v333_v2 = vld [vmem:[%s309_s29 + $0x8] sm:$0xff]  ;;  %v332_v3 = vld [vmem:[%s309_s29] sm:$0xff]  ;;  %v443_v7 = vld [vmem:[%s320_s10 + $0x10] sm:$0xff]  ;;  %s1780_s16 = scalar_lea.vmem %s1927_s2, %s1418_s26  ;;  %s329_s18 = scalar_lea.vmem %s1931_s6, %s1417_s25 }
  0x12   : > { %v335_v5 = vpack.c.bf16 %v333_v2, %v333_v2  ;;  %v334_v6 = vpack.c.bf16 %v332_v3, %v332_v3  ;;  %v444_v8 = vld [vmem:[%s320_s10 + $0x18] sm:$0xff]  ;;  %v441_v9 = vld [vmem:[%s320_s10] sm:$0xff]  ;;  %1451 = vrcp.f32 %v443_v7  ;;  %v442_v12 = vld [vmem:[%s320_s10 + $0x8] sm:$0xff] }
  0x13   : > { %1453 = vrcp.f32 %v444_v8  ;;  %v446_v13 = vld [vmem:[%s320_s10 + $0x28] sm:$0xff]  ;;  %v445_v14 = vld [vmem:[%s320_s10 + $0x20] sm:$0xff]  ;;  %v448_v17 = vld [vmem:[%s320_s10 + $0x38] sm:$0xff] }
  0x14   : > { %1396 = vmatprep.subr.msk.bf16.mxu0 %vm361_vm0, %v335_v5  ;;  %v363_v10 = vsel %vm361_vm0, %v334_v6, 0  ;;  %1455 = vrcp.f32 %v441_v9  ;;  %v447_v19 = vld [vmem:[%s320_s10 + $0x30] sm:$0xff] }
  0x15   : > { %369 = vmatpush1.bf16.msra.mxu0 %v363_v10  ;;  %1457 = vrcp.f32 %v442_v12 }
  0x16   : > { %1459 = vrcp.f32 %v446_v13 }
  0x17   : > { %1461 = vrcp.f32 %v445_v14 }
  0x18   : > { %1397 = vmatmul.mubr.msk.bf16.vlgmr.msra.gmra.mrb[0].mxu0 %vm348_vm1, %v344_v11  ;;  %1463 = vrcp.f32 %v448_v17 }
  0x19   : > { %410 = vmatprep.mubr.bf16.mxu0 %v1571_v0  ;;  %1465 = vrcp.f32 %v447_v19 }
  0x1c   : > { %v1452_v20 = vpop.eup %1451 }
  0x1d   : > { %v1454_v21 = vpop.eup %1453  ;;  %661 = vperm.xlu1 %1450, %v1452_v20  }
  0x1e   : > { %v1456_v22 = vpop.eup %1455 }
  0x1f   : > { %506 = vperm.xlu0 %1449, %v1456_v22   ;;  %v1458_v23 = vpop.eup %1457 }
  0x20   : > { %1398 = vmatmul.mubr.msk.bf16.gmra.mrb[4].mxu0 %vm348_vm1, %v345_v18  ;;  %v1460_v26 = vpop.eup %1459 }
  0x21   : > { %420 = vmatprep.mubr.bf16.mxu0 %v1571_v0  ;;  %666 = vperm.xlu1 %1450, %v1454_v21   ;;  %v1462_v28 = vpop.eup %1461 }
  0x22   : > { %v1464_v29 = vpop.eup %1463 }
  0x23   : > { %511 = vperm.xlu0 %1449, %v1458_v23   ;;  %v1466_v31 = vpop.eup %1465 }
  0x25   : > { %911 = vperm.xlu1 %1450, %v1460_v26  }
  0x27   : > { %906 = vperm.xlu0 %1449, %v1462_v28  }
  0x28   : > { %1399 = vmatmul.mubr.msk.bf16.gmra.mrb[8].mxu0 %vm348_vm1, %v346_v27 }
  0x29   : > { %430 = vmatprep.mubr.bf16.mxu0 %v1571_v0  ;;  %1113 = vperm.xlu1 %1450, %v1464_v29  }
  0x2b   : > { %1108 = vperm.xlu0 %1449, %v1466_v31  }
  0x2d   : > { %1012 = vrot.lane.b32.xlu1 %v1679_v34, %s1572_s9 }
  0x2f   : > { %768 = vrot.lane.b32.xlu0 %v1679_v34, %s1573_s12 }
  0x30   : > { %1400 = vmatmul.mubr.msk.bf16.gmra.mrb[12].mxu0 %vm348_vm1, %v347_v35 }
  0x31   : > { %963 = vmatprep.mubr.bf16.mxu0 %v1571_v0  ;;  %1265 = vperm.xlu1 %1450, %v1262_v36  }
  0x33   : > { %1214 = vrot.lane.b32.xlu0 %v1679_v34, %s1574_s13 }
  0xeb   : > { %v402_v37 = vpop.f32.mrb[0].mxu0 }
  0xec   : > { %v404_v38 = vpop.f32.mrb[1].mxu0 }
  0xed   : > { %v406_v39 = vpop.f32.mrb[2].mxu0 }
  0xee   : > { %v458_v40 = vmax.f32 %v402_v37, %v406_v39  ;;  %v408_v41 = vpop.f32.mrb[3].mxu0 }
  0xef   : > { %v465_v42 = vmax.f32 %v404_v38, %v408_v41 }
  0xf0   : > { %v459_v43 = vrot.slane %v458_v40, 4 }
  0xf1   : > { %v466_v44 = vrot.slane %v465_v42, 4 }
  0xf2   : > { %v460_v45 = vmax.f32 %v458_v40, %v459_v43 }
  0xf3   : > { %v467_v46 = vmax.f32 %v465_v42, %v466_v44  ;;  %v412_v47 = vpop.f32.mrb[4].mxu0 }
  0xf4   : > { %v461_v48 = vrot.slane %v460_v45, 2  ;;  %v414_v49 = vpop.f32.mrb[5].mxu0 }
  0xf5   : > { %v468_v50 = vrot.slane %v467_v46, 2  ;;  %v416_v51 = vpop.f32.mrb[6].mxu0 }
  0xf6   : > { %v462_v52 = vmax.f32 %v460_v45, %v461_v48  ;;  %v613_v53 = vmax.f32 %v412_v47, %v416_v51  ;;  %v418_v54 = vpop.f32.mrb[7].mxu0 }
  0xf7   : > { %v469_v55 = vmax.f32 %v467_v46, %v468_v50  ;;  %v620_v56 = vmax.f32 %v414_v49, %v418_v54 }
  0xf8   : > { %v463_v57 = vrot.slane %v462_v52, 1  ;;  %v614_v58 = vrot.slane %v613_v53, 4 }
  0xf9   : > { %v470_v59 = vrot.slane %v469_v55, 1  ;;  %v621_v60 = vrot.slane %v620_v56, 4 }
  0xfa   : > { %v464_v61 = vmax.f32 %v462_v52, %v463_v57  ;;  %v615_v62 = vmax.f32 %v613_v53, %v614_v58 }
  0xfb   : > { %v471_v63 = vmax.f32 %v469_v55, %v470_v59  ;;  %v622_v1 = vmax.f32 %v620_v56, %v621_v60  ;;  %v1689_v2 = vpop.f32.mrb[8].mxu0 }
  0xfc   : > { %v472_v3 = vsub.f32 %v402_v37, %v464_v61  ;;  %v474_v4 = vsub.f32 %v406_v39, %v464_v61  ;;  %v616_v5 = vrot.slane %v615_v62, 2  ;;  %v1691_v6 = vpop.f32.mrb[9].mxu0 }
  0xfd   : > { %v473_v7 = vsub.f32 %v404_v38, %v471_v63  ;;  %v475_v8 = vsub.f32 %v408_v41, %v471_v63  ;;  %v623_v9 = vrot.slane %v622_v1, 2  ;;  %v1693_v10 = vpop.f32.mrb[10].mxu0 }
  0xfe   : > { %v476_v11 = vmul.f32 1.442695, %v472_v3  ;;  %v480_v12 = vmul.f32 1.442695, %v474_v4  ;;  %v617_v13 = vmax.f32 %v615_v62, %v616_v5  ;;  %v858_v14 = vmax.f32 %v1689_v2, %v1693_v10  ;;  %v1697_v15 = vpop.f32.mrb[11].mxu0 }
  0xff   : > { %v478_v16 = vmul.f32 1.442695, %v473_v7  ;;  %v482_v17 = vmul.f32 1.442695, %v475_v8  ;;  %v624_v18 = vmax.f32 %v622_v1, %v623_v9  ;;  %v865_v19 = vmax.f32 %v1691_v6, %v1697_v15 }
 0x100   : > { %1467 = vpow2.f32 %v476_v11  ;;  %v618_v20 = vrot.slane %v617_v13, 1  ;;  %v859_v21 = vrot.slane %v858_v14, 4 }
 0x101   : > { %1469 = vpow2.f32 %v480_v12  ;;  %v625_v22 = vrot.slane %v624_v18, 1  ;;  %v866_v23 = vrot.slane %v865_v19, 4 }
 0x102   : > { %1471 = vpow2.f32 %v478_v16  ;;  %v619_v24 = vmax.f32 %v617_v13, %v618_v20  ;;  %v860_v25 = vmax.f32 %v858_v14, %v859_v21 }
 0x103   : > { %1473 = vpow2.f32 %v482_v17  ;;  %v626_v26 = vmax.f32 %v624_v18, %v625_v22  ;;  %v867_v27 = vmax.f32 %v865_v19, %v866_v23  ;;  %v1701_v28 = vpop.f32.mrb[12].mxu0 }
 0x104   : > { %v627_v29 = vsub.f32 %v412_v47, %v619_v24  ;;  %v629_v30 = vsub.f32 %v416_v51, %v619_v24  ;;  %v861_v31 = vrot.slane %v860_v25, 2  ;;  %v1703_v32 = vpop.f32.mrb[13].mxu0 }
 0x105   : > { %v628_v33 = vsub.f32 %v414_v49, %v626_v26  ;;  %v630_v35 = vsub.f32 %v418_v54, %v626_v26  ;;  %v868_v36 = vrot.slane %v867_v27, 2  ;;  %v1705_v37 = vpop.f32.mrb[14].mxu0 }
 0x106   : > { %v631_v38 = vmul.f32 1.442695, %v627_v29  ;;  %v635_v39 = vmul.f32 1.442695, %v629_v30  ;;  %v862_v40 = vmax.f32 %v860_v25, %v861_v31  ;;  %v1060_v41 = vmax.f32 %v1701_v28, %v1705_v37  ;;  %v1709_v42 = vpop.f32.mrb[15].mxu0 }
 0x107   : > { %v633_v43 = vmul.f32 1.442695, %v628_v33  ;;  %v637_v44 = vmul.f32 1.442695, %v630_v35  ;;  %v869_v45 = vmax.f32 %v867_v27, %v868_v36  ;;  %v1067_v46 = vmax.f32 %v1703_v32, %v1709_v42 }
 0x108   : > { %1475 = vpow2.f32 %v631_v38  ;;  %v863_v47 = vrot.slane %v862_v40, 1  ;;  %v1061_v48 = vrot.slane %v1060_v41, 4 }
 0x109   : > { %1477 = vpow2.f32 %v635_v39  ;;  %v870_v49 = vrot.slane %v869_v45, 1  ;;  %v1068_v50 = vrot.slane %v1067_v46, 4 }
 0x10a   : > { %v1713_v51 = vpop.eup %1467  ;;  %1479 = vpow2.f32 %v633_v43  ;;  %v864_v52 = vmax.f32 %v862_v40, %v863_v47  ;;  %v1062_v53 = vmax.f32 %v1060_v41, %v1061_v48 }
 0x10b   : > { %v1715_v54 = vpop.eup %1469  ;;  %1481 = vpow2.f32 %v637_v44  ;;  %v871_v55 = vmax.f32 %v869_v45, %v870_v49  ;;  %v1069_v56 = vmax.f32 %v1067_v46, %v1068_v50 }
 0x10c   : > { %v1717_v57 = vpop.eup %1471  ;;  %v484_v58 = vadd.f32 %v1715_v54, %v1713_v51  ;;  %v872_v59 = vsub.f32 %v1689_v2, %v864_v52  ;;  %v874_v60 = vsub.f32 %v1693_v10, %v864_v52  ;;  %v1063_v61 = vrot.slane %v1062_v53, 2 }
 0x10d   : > { %v1723_v62 = vpop.eup %1473  ;;  %v873_v63 = vsub.f32 %v1691_v6, %v871_v55  ;;  %v875_v1 = vsub.f32 %v1697_v15, %v871_v55  ;;  %v1070_v3 = vrot.slane %v1069_v56, 2 }
 0x10e   : > { %v485_v4 = vrot.slane %v484_v58, 4  ;;  %v491_v5 = vadd.f32 %v1723_v62, %v1717_v57  ;;  %v876_v7 = vmul.f32 1.442695, %v872_v59  ;;  %v880_v8 = vmul.f32 1.442695, %v874_v60 }
 0x10f   : > { %v878_v9 = vmul.f32 1.442695, %v873_v63  ;;  %v882_v11 = vmul.f32 1.442695, %v875_v1  ;;  %v1064_v12 = vmax.f32 %v1062_v53, %v1063_v61  ;;  %v1071_v2 = vmax.f32 %v1069_v56, %v1070_v3 }
 0x110   : > { %v486_v13 = vadd.f32 %v485_v4, %v484_v58  ;;  %v492_v10 = vrot.slane %v491_v5, 4  ;;  %1483 = vpow2.f32 %v876_v7 }
 0x111   : > { %1485 = vpow2.f32 %v880_v8  ;;  %v1065_v14 = vrot.slane %v1064_v12, 1  ;;  %v1072_v16 = vrot.slane %v1071_v2, 1 }
 0x112   : > { %v1729_v6 = vpop.eup %1475  ;;  %v487_v15 = vrot.slane %v486_v13, 2  ;;  %v493_v17 = vadd.f32 %v492_v10, %v491_v5  ;;  %1487 = vpow2.f32 %v878_v9 }
 0x113   : > { %v1731_v18 = vpop.eup %1477  ;;  %1489 = vpow2.f32 %v882_v11  ;;  %v1066_v19 = vmax.f32 %v1064_v12, %v1065_v14  ;;  %v1073_v20 = vmax.f32 %v1071_v2, %v1072_v16  ;;  %v507_v11 = vpop.permute.xlu0 %506 }
 0x114   : > { %v1733_v21 = vpop.eup %1479  ;;  %v494_v22 = vrot.slane %v493_v17, 2  ;;  %v639_v23 = vadd.f32 %v1731_v18, %v1729_v6  ;;  %v488_v24 = vadd.f32 %v487_v15, %v486_v13 }
 0x115   : > { %v1737_v25 = vpop.eup %1481  ;;  %v1074_v26 = vsub.f32 %v1701_v28, %v1066_v19  ;;  %v1076_v27 = vsub.f32 %v1705_v37, %v1066_v19  ;;  %v1075_v29 = vsub.f32 %v1703_v32, %v1073_v20  ;;  %v1077_v30 = vsub.f32 %v1709_v42, %v1073_v20  ;;  %v662_v20 = vpop.permute.xlu1 %661 }
 0x116   : > { %v640_v31 = vrot.slane %v639_v23, 4  ;;  %v646_v33 = vadd.f32 %v1737_v25, %v1733_v21  ;;  %v489_v35 = vrot.slane %v488_v24, 1  ;;  %v495_v36 = vadd.f32 %v494_v22, %v493_v17 }
 0x117   : > { %v1078_v38 = vmul.f32 1.442695, %v1074_v26  ;;  %v1082_v39 = vmul.f32 1.442695, %v1076_v27  ;;  %v1080_v40 = vmul.f32 1.442695, %v1075_v29 }
 0x118   : > { %v641_v41 = vadd.f32 %v640_v31, %v639_v23  ;;  %v647_v43 = vrot.slane %v646_v33, 4  ;;  %v1084_v44 = vmul.f32 1.442695, %v1077_v30  ;;  %v490_v28 = vadd.f32 %v489_v35, %v488_v24 }
 0x119   : > { %1491 = vpow2.f32 %v1078_v38  ;;  %v496_v45 = vrot.slane %v495_v36, 1 }
 0x11a   : > { %v1745_v37 = vpop.eup %1483  ;;  %v642_v32 = vrot.slane %v641_v41, 2  ;;  %v648_v46 = vadd.f32 %v647_v43, %v646_v33  ;;  %1493 = vpow2.f32 %v1082_v39 }
 0x11b   : > { %v1747_v42 = vpop.eup %1485  ;;  %1495 = vpow2.f32 %v1080_v40  ;;  %v497_v47 = vadd.f32 %v496_v45, %v495_v36  ;;  %v512_v36 = vpop.permute.xlu0 %511 }
 0x11c   : > { %v1749_v48 = vpop.eup %1487  ;;  %v649_v49 = vrot.slane %v648_v46, 2  ;;  %v884_v50 = vadd.f32 %v1747_v42, %v1745_v37  ;;  %1497 = vpow2.f32 %v1084_v44  ;;  %v643_v52 = vadd.f32 %v642_v32, %v641_v41 }
 0x11d   : > { %v1753_v53 = vpop.eup %1489  ;;  %1499 = vrcp.f32 %v490_v28 }
 0x11e   : > { %v885_v55 = vrot.slane %v884_v50, 4  ;;  %v891_v56 = vadd.f32 %v1753_v53, %v1749_v48  ;;  %v644_v58 = vrot.slane %v643_v52, 1  ;;  %v650_v59 = vadd.f32 %v649_v49, %v648_v46  ;;  %v667_v46 = vpop.permute.xlu1 %666 }
 0x11f   : > { %1501 = vrcp.f32 %v497_v47 }
 0x120   : > { %v886_v60 = vadd.f32 %v885_v55, %v884_v50  ;;  %v892_v61 = vrot.slane %v891_v56, 4  ;;  %v645_v63 = vadd.f32 %v644_v58, %v643_v52  ;;  %v651_v1 = vrot.slane %v650_v59, 1 }
 0x122   : > { %v887_v3 = vrot.slane %v886_v60, 2  ;;  %v893_v4 = vadd.f32 %v892_v61, %v891_v56  ;;  %v652_v5 = vadd.f32 %v651_v1, %v650_v59  ;;  %1503 = vrcp.f32 %v645_v63 }
 0x123   : > { %v1757_v7 = vpop.eup %1491 }
 0x124   : > { %v1759_v8 = vpop.eup %1493  ;;  %v894_v9 = vrot.slane %v893_v4, 2  ;;  %1505 = vrcp.f32 %v652_v5  ;;  %v888_v12 = vadd.f32 %v887_v3, %v886_v60  ;;  %v524_v3 = vld [vmem:[%s1780_s16] sm:$0xff] }
 0x125   : > { %v1761_v2 = vpop.eup %1495  ;;  %v1086_v13 = vadd.f32 %v1759_v8, %v1757_v7 }
 0x126   : > { %v1765_v10 = vpop.eup %1497  ;;  %v889_v14 = vrot.slane %v888_v12, 1  ;;  %v895_v16 = vadd.f32 %v894_v9, %v893_v4  ;;  %v525_v4 = vld [vmem:[%s1780_s16 + $0x8] sm:$0xff] }
 0x127   : > { %v1500_v15 = vpop.eup %1499  ;;  %v1087_v17 = vrot.slane %v1086_v13, 4  ;;  %v1093_v19 = vadd.f32 %v1765_v10, %v1761_v2 }
 0x128   : > { %v500_v22 = vmul.f32 %v1500_v15, %v1713_v51  ;;  %v890_v23 = vadd.f32 %v889_v14, %v888_v12  ;;  %v896_v24 = vrot.slane %v895_v16, 1  ;;  %v502_v26 = vmul.f32 %v1500_v15, %v1715_v54 }
 0x129   : > { %v1502_v27 = vpop.eup %1501  ;;  %v1088_v29 = vadd.f32 %v1087_v17, %v1086_v13  ;;  %v1094_v30 = vrot.slane %v1093_v19, 4 }
 0x12a   : > { %v501_v31 = vmul.f32 %v1502_v27, %v1717_v57  ;;  %v514_v33 = vmul.f32 %v507_v11, %v500_v22  ;;  %v897_v35 = vadd.f32 %v896_v24, %v895_v16  ;;  %1507 = vrcp.f32 %v890_v23  ;;  %v912_v22 = vpop.permute.xlu1 %911  ;;  %v907_v23 = vpop.permute.xlu0 %906 }
 0x12b   : > { %v1089_v38 = vrot.slane %v1088_v29, 2  ;;  %v1095_v39 = vadd.f32 %v1094_v30, %v1093_v19  ;;  %v503_v40 = vmul.f32 %v1502_v27, %v1723_v62  ;;  %v516_v41 = vmul.f32 %v512_v36, %v502_v26 }
 0x12c   : > { %v1504_v51 = vpop.eup %1503  ;;  %v515_v43 = vmul.f32 %v507_v11, %v501_v31  ;;  %v518_v44 = vmul.f32 0.25, %v514_v33  ;;  %1509 = vrcp.f32 %v897_v35  ;;  %v1402_v33 = vld [vmem:[%s1780_s16 + $0x10] sm:$0xff]  ;;  %v1403_v35 = vld [vmem:[%s1780_s16 + $0x18] sm:$0xff] }
 0x12d   : > { %v1096_v54 = vrot.slane %v1095_v39, 2  ;;  %v655_v28 = vmul.f32 %v1504_v51, %v1729_v6  ;;  %v657_v45 = vmul.f32 %v1504_v51, %v1731_v18  ;;  %v517_v57 = vmul.f32 %v512_v36, %v503_v40  ;;  %v1408_v40 = vld [vmem:[%s1780_s16 + $0x28] sm:$0xff] }
 0x12e   : > { %v1506_v32 = vpop.eup %1505  ;;  %v520_v62 = vmul.f32 0.25, %v516_v41  ;;  %v1090_v47 = vadd.f32 %v1089_v38, %v1088_v29  ;;  %v519_v49 = vmul.f32 0.25, %v515_v43 }
 0x12f   : > { %v656_v50 = vmul.f32 %v1506_v32, %v1733_v21  ;;  %v669_v52 = vmul.f32 %v662_v20, %v655_v28  ;;  %v658_v6 = vmul.f32 %v1506_v32, %v1737_v25  ;;  %v671_v18 = vmul.f32 %v667_v46, %v657_v45  ;;  %v1114_v45 = vpop.permute.xlu1 %1113 }
 0x130   : > { %v1091_v55 = vrot.slane %v1090_v47, 1  ;;  %v1097_v56 = vadd.f32 %v1096_v54, %v1095_v39  ;;  %v521_v58 = vmul.f32 0.25, %v517_v57  ;;  %v522_v59 = vpack.c.bf16 %v520_v62, %v518_v44  ;;  %v1109_v57 = vpop.permute.xlu0 %1108 }
 0x131   : > { %v670_v60 = vmul.f32 %v662_v20, %v656_v50  ;;  %v673_v61 = vmul.f32 0.25, %v669_v52  ;;  %v672_v63 = vmul.f32 %v667_v46, %v658_v6  ;;  %v675_v1 = vmul.f32 0.25, %v671_v18 }
 0x132   : > { %v1092_v5 = vadd.f32 %v1091_v55, %v1090_v47  ;;  %v1098_v9 = vrot.slane %v1097_v56, 1  ;;  %v523_v11 = vpack.c.bf16 %v521_v58, %v519_v49  ;;  %v526_v25 = vpack.c.bf16 %v525_v4, %v524_v3  ;;  %v1411_v55 = vld [vmem:[%s1780_s16 + $0x30] sm:$0xff] }
 0x133   : > { %v674_v12 = vmul.f32 0.25, %v670_v60  ;;  %v676_v13 = vmul.f32 0.25, %v672_v63  ;;  %v677_v21 = vpack.c.bf16 %v675_v1, %v673_v61  ;;  %v682_v39 = vpack.c.bf16 %v1403_v35, %v1402_v33 }
 0x134   : > { %v1508_v14 = vpop.eup %1507  ;;  %v1099_v16 = vadd.f32 %v1098_v9, %v1097_v56  ;;  %1511 = vrcp.f32 %v1092_v5  ;;  %531 = vmatprep.subr.bf16.mxu1 %v523_v11  ;;  %v1412_v56 = vld [vmem:[%s1780_s16 + $0x38] sm:$0xff] }
 0x135   : > { %v902_v15 = vmul.f32 %v1508_v14, %v1747_v42  ;;  %v900_v17 = vmul.f32 %v1508_v14, %v1745_v37  ;;  %532 = vmatpush1.bf16.msra.mxu1 %v522_v59  ;;  %v678_v19 = vpack.c.bf16 %v676_v13, %v674_v12  ;;  %v1129_v58 = vpack.c.bf16 %v1412_v56, %v1411_v55 }
 0x136   : > { %v1510_v20 = vpop.eup %1509  ;;  %1513 = vrcp.f32 %v1099_v16 }
 0x137   : > { %v903_v24 = vmul.f32 %v1510_v20, %v1753_v53  ;;  %v916_v26 = vmul.f32 %v912_v22, %v902_v15  ;;  %v901_v27 = vmul.f32 %v1510_v20, %v1749_v48  ;;  %v914_v29 = vmul.f32 %v907_v23, %v900_v17  ;;  %686 = vmatprep.subr.bf16.mxu1 %v678_v19  ;;  %v1407_v48 = vld [vmem:[%s1780_s16 + $0x20] sm:$0xff] }
 0x138   : > { %1401 = vmatmul.mubr.msk.bf16.vlgmr.msra.gmra.mrb[0].mxu1 %vm527_vm2, %v526_v25  ;;  %v927_v54 = vpack.c.bf16 %v1408_v40, %v1407_v48 }
 0x139   : > { %v917_v37 = vmul.f32 %v912_v22, %v903_v24  ;;  %v920_v42 = vmul.f32 0.25, %v916_v26  ;;  %v915_v30 = vmul.f32 %v907_v23, %v901_v27  ;;  %v918_v31 = vmul.f32 0.25, %v914_v29  ;;  %687 = vmatpush1.bf16.msra.mxu1 %v677_v21  ;;  %718 = vmatprep.mubr.bf16.mxu1 %v1571_v0 }
 0x13b   : > { %v921_v36 = vmul.f32 0.25, %v917_v37  ;;  %v919_v53 = vmul.f32 0.25, %v915_v30  ;;  %v922_v38 = vpack.c.bf16 %v920_v42, %v918_v31 }
 0x13d   : > { %v923_v41 = vpack.c.bf16 %v921_v36, %v919_v53 }
 0x13e   : > { %v1512_v51 = vpop.eup %1511 }
 0x13f   : > { %v1104_v43 = vmul.f32 %v1512_v51, %v1759_v8  ;;  %v1102_v44 = vmul.f32 %v1512_v51, %v1757_v7  ;;  %931 = vmatprep.subr.bf16.mxu0 %v923_v41 }
 0x140   : > { %v1514_v28 = vpop.eup %1513  ;;  %1404 = vmatmul.mubr.msk.bf16.vlgmr.msra.gmra.mrb[4].mxu1 %vm527_vm2, %v682_v39  ;;  %932 = vmatpush1.bf16.msra.mxu0 %v922_v38 }
 0x141   : > { %v1105_v32 = vmul.f32 %v1514_v28, %v1765_v10  ;;  %v1118_v46 = vmul.f32 %v1114_v45, %v1104_v43  ;;  %v1103_v62 = vmul.f32 %v1514_v28, %v1761_v2  ;;  %v1116_v47 = vmul.f32 %v1109_v57, %v1102_v44  ;;  %805 = vmatprep.mubr.bf16.mxu1 %v1571_v0 }
 0x143   : > { %v1119_v8 = vmul.f32 %v1114_v45, %v1105_v32  ;;  %v1122_v7 = vmul.f32 0.25, %v1118_v46  ;;  %v1117_v49 = vmul.f32 %v1109_v57, %v1103_v62  ;;  %v1120_v50 = vmul.f32 0.25, %v1116_v47  ;;  %1409 = vmatmul.mubr.msk.bf16.vlgmr.msra.gmra.mrb[16].mxu0 %vm527_vm2, %v927_v54 }
 0x144   : > { %1165 = vmatprep.mubr.bf16.mxu0 %v1571_v0 }
 0x145   : > { %v1123_v52 = vmul.f32 0.25, %v1119_v8  ;;  %v1121_v6 = vmul.f32 0.25, %v1117_v49  ;;  %v1124_v18 = vpack.c.bf16 %v1122_v7, %v1120_v50 }
 0x147   : > { %v1125_v10 = vpack.c.bf16 %v1123_v52, %v1121_v6 }
 0x149   : > { %1133 = vmatprep.subr.bf16.mxu0 %v1125_v10 }
 0x14a   : > { %1134 = vmatpush1.bf16.msra.mxu0 %v1124_v18 }
 0x14d   : > { %1413 = vmatmul.mubr.msk.bf16.vlgmr.msra.gmra.mrb[20].mxu0 %vm527_vm2, %v1129_v58 }
 0x20b   : > { %v565_v2 = vpop.f32.mrb[0].mxu1 }
 0x20c   : > { %v578_v59 = vmul.f32 0.044715, %v565_v2  ;;  %v567_v60 = vpop.f32.mrb[1].mxu1  ;;  %v1818_v37 = vmul.f32 0.5, %v565_v2 }
 0x20d   : > { %v579_v61 = vmul.f32 0.044715, %v567_v60  ;;  %v569_v63 = vpop.f32.mrb[2].mxu1  ;;  %v1824_v35 = vmul.f32 0.5, %v567_v60 }
 0x20e   : > { %v582_v1 = vmul.f32 %v578_v59, %v565_v2  ;;  %v580_v3 = vmul.f32 0.044715, %v569_v63  ;;  %v1807_v4 = vpop.f32.mrb[3].mxu1  ;;  %v1830_v48 = vmul.f32 0.5, %v569_v63 }
 0x20f   : > { %v583_v5 = vmul.f32 %v579_v61, %v567_v60  ;;  %v581_v9 = vmul.f32 0.044715, %v1807_v4 }
 0x210   : > { %v586_v11 = vmul.f32 %v582_v1, %v565_v2  ;;  %v584_v12 = vmul.f32 %v580_v3, %v569_v63 }
 0x211   : > { %v587_v13 = vmul.f32 %v583_v5, %v567_v60  ;;  %v585_v21 = vmul.f32 %v581_v9, %v1807_v4  ;;  %v577_v9 = vmul.f32 0.5, %v1807_v4 }
 0x212   : > { %v590_v14 = vadd.f32 %v586_v11, %v565_v2  ;;  %v588_v16 = vmul.f32 %v584_v12, %v569_v63 }
 0x213   : > { %v591_v25 = vadd.f32 %v587_v13, %v567_v60  ;;  %v589_v15 = vmul.f32 %v585_v21, %v1807_v4  ;;  %v720_v17 = vpop.f32.mrb[4].mxu1 }
 0x214   : > { %v594_v19 = vmul.f32 0.7978846, %v590_v14  ;;  %v592_v20 = vadd.f32 %v588_v16, %v569_v63  ;;  %v733_v22 = vmul.f32 0.044715, %v720_v17  ;;  %v1812_v23 = vpop.f32.mrb[5].mxu1  ;;  %v1862_v12 = vmul.f32 0.5, %v720_v17 }
 0x215   : > { %v595_v24 = vmul.f32 0.7978846, %v591_v25  ;;  %v593_v26 = vadd.f32 %v589_v15, %v1807_v4  ;;  %v734_v27 = vmul.f32 0.044715, %v1812_v23  ;;  %v1816_v29 = vpop.f32.mrb[6].mxu1 }
 0x216   : > { %v596_v42 = vmul.f32 0.7978846, %v592_v20  ;;  %v737_v30 = vmul.f32 %v733_v22, %v720_v17  ;;  %v1820_v31 = vpop.f32.mrb[7].mxu1  ;;  %v1822_v33 = vpop.f32.mrb[16].mxu0  ;;  %1515 = vtanh.f32 %v594_v19  ;;  %v735_v38 = vmul.f32 0.044715, %v1816_v29 }
 0x217   : > { %v597_v36 = vmul.f32 0.7978846, %v593_v26  ;;  %v738_v53 = vmul.f32 %v734_v27, %v1812_v23  ;;  %v1828_v39 = vpop.f32.mrb[17].mxu0  ;;  %1517 = vtanh.f32 %v595_v24  ;;  %v736_v41 = vmul.f32 0.044715, %v1820_v31 }
 0x218   : > { %v741_v40 = vmul.f32 %v737_v30, %v720_v17  ;;  %v1833_v51 = vpop.f32.mrb[18].mxu0  ;;  %1519 = vtanh.f32 %v596_v42  ;;  %v739_v44 = vmul.f32 %v735_v38, %v1816_v29  ;;  %v978_v54 = vmul.f32 0.044715, %v1822_v33 }
 0x219   : > { %v742_v43 = vmul.f32 %v738_v53, %v1812_v23  ;;  %v1838_v28 = vpop.f32.mrb[19].mxu0  ;;  %1521 = vtanh.f32 %v597_v36  ;;  %v740_v57 = vmul.f32 %v736_v41, %v1820_v31  ;;  %v979_v32 = vmul.f32 0.044715, %v1828_v39 }
 0x21a   : > { %v745_v45 = vadd.f32 %v741_v40, %v720_v17  ;;  %v743_v62 = vmul.f32 %v739_v44, %v1816_v29  ;;  %v982_v47 = vmul.f32 %v978_v54, %v1822_v33  ;;  %v980_v8 = vmul.f32 0.044715, %v1833_v51 }
 0x21b   : > { %v746_v46 = vadd.f32 %v742_v43, %v1812_v23  ;;  %v744_v49 = vmul.f32 %v740_v57, %v1820_v31  ;;  %v983_v50 = vmul.f32 %v979_v32, %v1828_v39  ;;  %v981_v52 = vmul.f32 0.044715, %v1838_v28 }
 0x21c   : > { %v749_v7 = vmul.f32 0.7978846, %v745_v45  ;;  %v747_v18 = vadd.f32 %v743_v62, %v1816_v29  ;;  %v986_v55 = vmul.f32 %v982_v47, %v1822_v33  ;;  %v984_v56 = vmul.f32 %v980_v8, %v1833_v51 }
 0x21d   : > { %v750_v6 = vmul.f32 0.7978846, %v746_v46  ;;  %v748_v10 = vadd.f32 %v744_v49, %v1820_v31  ;;  %v987_v58 = vmul.f32 %v983_v50, %v1828_v39  ;;  %v985_v2 = vmul.f32 %v981_v52, %v1838_v28 }
 0x21e   : > { %1523 = vtanh.f32 %v749_v7  ;;  %v751_v59 = vmul.f32 0.7978846, %v747_v18  ;;  %v990_v60 = vadd.f32 %v986_v55, %v1822_v33  ;;  %v988_v61 = vmul.f32 %v984_v56, %v1833_v51 }
 0x21f   : > { %1525 = vtanh.f32 %v750_v6  ;;  %v752_v63 = vmul.f32 0.7978846, %v748_v10  ;;  %v991_v1 = vadd.f32 %v987_v58, %v1828_v39  ;;  %v989_v3 = vmul.f32 %v985_v2, %v1838_v28 }
 0x220   : > { %v1859_v5 = vpop.f32.mrb[20].mxu0  ;;  %v1516_v11 = vpop.eup %1515  ;;  %1527 = vtanh.f32 %v751_v59  ;;  %v994_v13 = vmul.f32 0.7978846, %v990_v60  ;;  %v992_v21 = vadd.f32 %v988_v61, %v1833_v51  ;;  %v730_v26 = vmul.f32 0.5, %v1812_v23 }
 0x221   : > { %v1865_v14 = vpop.f32.mrb[21].mxu0  ;;  %v1518_v16 = vpop.eup %1517  ;;  %1529 = vtanh.f32 %v752_v63  ;;  %v995_v25 = vmul.f32 0.7978846, %v991_v1  ;;  %v993_v15 = vadd.f32 %v989_v3, %v1838_v28  ;;  %v1180_v19 = vmul.f32 0.044715, %v1859_v5 }
 0x222   : > { %v1869_v20 = vpop.f32.mrb[22].mxu0  ;;  %v1520_v22 = vpop.eup %1519  ;;  %1531 = vtanh.f32 %v994_v13  ;;  %v996_v4 = vmul.f32 0.7978846, %v992_v21  ;;  %v1181_v17 = vmul.f32 0.044715, %v1865_v14  ;;  %v731_v53 = vmul.f32 0.5, %v1816_v29 }
 0x223   : > { %v1872_v24 = vpop.f32.mrb[23].mxu0  ;;  %v1522_v27 = vpop.eup %1521  ;;  %1533 = vtanh.f32 %v995_v25  ;;  %v997_v42 = vmul.f32 0.7978846, %v993_v15  ;;  %v1184_v30 = vmul.f32 %v1180_v19, %v1859_v5  ;;  %v1182_v36 = vmul.f32 0.044715, %v1869_v20 }
 0x224   : > { %1535 = vtanh.f32 %v996_v4  ;;  %v1185_v38 = vmul.f32 %v1181_v17, %v1865_v14  ;;  %v1183_v40 = vmul.f32 0.044715, %v1872_v24  ;;  %v603_v23 = vadd.f32 1.0, %v1518_v16 }
 0x225   : > { %1537 = vtanh.f32 %v997_v42  ;;  %v1188_v41 = vmul.f32 %v1184_v30, %v1859_v5  ;;  %v1186_v43 = vmul.f32 %v1182_v36, %v1869_v20  ;;  %v974_v44 = vmul.f32 0.5, %v1822_v33 }
 0x226   : > { %v1189_v54 = vmul.f32 %v1185_v38, %v1865_v14  ;;  %v1187_v45 = vmul.f32 %v1183_v40, %v1872_v24  ;;  %v605_v57 = vadd.f32 1.0, %v1522_v27  ;;  %v607_v62 = vmul.f32 %v603_v23, %v1824_v35 }
 0x227   : > { %v1192_v29 = vadd.f32 %v1188_v41, %v1859_v5  ;;  %v1190_v46 = vmul.f32 %v1186_v43, %v1869_v20  ;;  %v602_v47 = vadd.f32 1.0, %v1516_v11  ;;  %v604_v33 = vadd.f32 1.0, %v1520_v22  ;;  %v769_v41 = vpop.permute.xlu0 %768 }
 0x228   : > { %v1524_v32 = vpop.eup %1523  ;;  %v1193_v7 = vadd.f32 %v1189_v54, %v1865_v14  ;;  %v1191_v49 = vmul.f32 %v1187_v45, %v1872_v24  ;;  %v609_v50 = vmul.f32 %v605_v57, %v577_v9  ;;  %v732_v2 = vmul.f32 0.5, %v1820_v31 }
 0x229   : > { %v1526_v8 = vpop.eup %1525  ;;  %v1196_v52 = vmul.f32 0.7978846, %v1192_v29  ;;  %v1194_v6 = vadd.f32 %v1190_v46, %v1869_v20  ;;  %v757_v55 = vadd.f32 1.0, %v1524_v32  ;;  %v606_v63 = vmul.f32 %v602_v47, %v1818_v37 }
 0x22a   : > { %v758_v18 = vadd.f32 1.0, %v1526_v8  ;;  %v1528_v56 = vpop.eup %1527  ;;  %v1197_v10 = vmul.f32 0.7978846, %v1193_v7  ;;  %v1195_v58 = vadd.f32 %v1191_v49, %v1872_v24  ;;  %v612_v35 = vpack.c.bf16 %v609_v50, %v607_v62 }
 0x22b   : > { %v1530_v59 = vpop.eup %1529  ;;  %1539 = vtanh.f32 %v1196_v52  ;;  %v1198_v60 = vmul.f32 0.7978846, %v1194_v6  ;;  %v759_v61 = vadd.f32 1.0, %v1528_v56  ;;  %v608_v11 = vmul.f32 %v604_v33, %v1830_v48 }
 0x22c   : > { %v1532_v1 = vpop.eup %1531  ;;  %1541 = vtanh.f32 %v1197_v10  ;;  %v1199_v3 = vmul.f32 0.7978846, %v1195_v58  ;;  %v760_v9 = vadd.f32 1.0, %v1530_v59  ;;  %v762_v21 = vmul.f32 %v758_v18, %v730_v26 }
 0x22d   : > { %v1534_v13 = vpop.eup %1533  ;;  %1543 = vtanh.f32 %v1198_v60  ;;  %v761_v16 = vmul.f32 %v757_v55, %v1862_v12  ;;  %v763_v25 = vmul.f32 %v759_v61, %v731_v53  ;;  %v611_v19 = vpack.c.bf16 %v608_v11, %v606_v63 }
 0x22e   : > { %v1536_v31 = vpop.eup %1535  ;;  %1545 = vtanh.f32 %v1199_v3  ;;  %v764_v15 = vmul.f32 %v760_v9, %v732_v2  ;;  %v1003_v22 = vadd.f32 1.0, %v1534_v13  ;;  %v976_v37 = vmul.f32 0.5, %v1833_v51 }
 0x22f   : > { %v1538_v4 = vpop.eup %1537  ;;  %v765_v17 = vpack.c.bf16 %v763_v25, %v761_v16  ;;  %v1002_v27 = vadd.f32 1.0, %v1532_v1  ;;  %v1004_v42 = vadd.f32 1.0, %v1536_v31  ;;  %v975_v48 = vmul.f32 0.5, %v1828_v39 }
 0x230   : > { %v766_v30 = vpack.c.bf16 %v764_v15, %v762_v21  ;;  %v977_v36 = vmul.f32 0.5, %v1838_v28  ;;  %v1005_v26 = vadd.f32 1.0, %v1538_v4  ;;  %v1178_v32 = vmul.f32 0.5, %v1869_v20 }
 0x231   : > { %v1006_v38 = vmul.f32 %v1002_v27, %v974_v44  ;;  %v1008_v12 = vmul.f32 %v1004_v42, %v976_v37  ;;  %v1007_v53 = vmul.f32 %v1003_v22, %v975_v48  ;;  %v1176_v44 = vmul.f32 0.5, %v1859_v5  ;;  %v1013_v5 = vpop.permute.xlu1 %1012 }
 0x232   : > { %773 = vmatprep.subr.bf16.mxu1 %v766_v30  ;;  %v1009_v40 = vmul.f32 %v1005_v26, %v977_v36  ;;  %v1179_v46 = vmul.f32 0.5, %v1872_v24  ;;  %v1177_v62 = vmul.f32 0.5, %v1865_v14  ;;  %v1215_v14 = vpop.permute.xlu0 %1214 }
 0x233   : > { %774 = vmatpush1.bf16.msra.mxu1 %v765_v17  ;;  %v1010_v43 = vpack.c.bf16 %v1008_v12, %v1006_v38 }
 0x234   : > { %817 = vmatprep.subr.bf16.mxu1 %v612_v35  ;;  %v1011_v23 = vpack.c.bf16 %v1009_v40, %v1007_v53 }
 0x235   : > { %v1540_v51 = vpop.eup %1539  ;;  %v1266_v11 = vpop.permute.xlu1 %1265 }
 0x236   : > { %v1542_v54 = vpop.eup %1541  ;;  %1405 = vmatmul.mubr.msk.bf16.vlgmr.msra.gmra.mrb[8].mxu1 %vm527_vm2, %v769_v41  ;;  %v1204_v45 = vadd.f32 1.0, %v1540_v51 }
 0x237   : > { %v1544_v57 = vpop.eup %1543  ;;  %818 = vmatpush1.bf16.msra.mxu1 %v611_v19  ;;  %849 = vmatprep.mubr.bf16.mxu1 %v1571_v0  ;;  %v1205_v39 = vadd.f32 1.0, %v1542_v54 }
 0x238   : > { %v1546_v28 = vpop.eup %1545  ;;  %1017 = vmatprep.subr.bf16.mxu1 %v1011_v23  ;;  %v1206_v29 = vadd.f32 1.0, %v1544_v57  ;;  %v1208_v8 = vmul.f32 %v1204_v45, %v1176_v44 }
 0x239   : > { %v1207_v47 = vadd.f32 1.0, %v1546_v28  ;;  %v1209_v49 = vmul.f32 %v1205_v39, %v1177_v62 }
 0x23a   : > { %v1210_v7 = vmul.f32 %v1206_v29, %v1178_v32 }
 0x23b   : > { %v1211_v50 = vmul.f32 %v1207_v47, %v1179_v46 }
 0x23c   : > { %v1212_v33 = vpack.c.bf16 %v1210_v7, %v1208_v8 }
 0x23d   : > { %v1213_v52 = vpack.c.bf16 %v1211_v50, %v1209_v49 }
 0x23e   : > { %1406 = vmatmul.mubr.msk.bf16.vlgmr.msra.gmra.mrb[12].mxu1 %vm527_vm2, %v1679_v34 }
 0x23f   : > { %1018 = vmatpush1.bf16.msra.mxu1 %v1010_v43  ;;  %1049 = vmatprep.mubr.bf16.mxu1 %v1571_v0 }
 0x240   : > { %1219 = vmatprep.subr.bf16.mxu1 %v1213_v52 }
 0x246   : > { %1410 = vmatmul.mubr.msk.bf16.vlgmr.msra.gmra.mrb[16].mxu1 %vm527_vm2, %v1013_v5 }
 0x247   : > { %1220 = vmatpush1.bf16.msra.mxu1 %v1212_v33  ;;  %1251 = vmatprep.mubr.bf16.mxu1 %v1571_v0 }
 0x24e   : > { %1414 = vmatmul.mubr.msk.bf16.vlgmr.msra.gmra.mrb[20].mxu1 %vm527_vm2, %v1215_v14 }
 0x309   : > { %v807_v20 = vpop.f32.mrb[8].mxu1 }
 0x30a   : > { %v809_v24 = vpop.f32.mrb[9].mxu1 }
 0x30b   : > { %v811_v6 = vpop.f32.mrb[10].mxu1 }
 0x30c   : > { %v812_v18 = vpop.f32.mrb[11].mxu1 }
 0x311   : > { %v851_v55 = vpop.f32.mrb[12].mxu1 }
 0x312   : > { %v852_v34 = vadd.f32 %v851_v55, %v807_v20  ;;  %v853_v56 = vpop.f32.mrb[13].mxu1 }
 0x313   : > { %v854_v10 = vadd.f32 %v853_v56, %v809_v24  ;;  %v855_v58 = vpop.f32.mrb[14].mxu1 }
 0x314   : > { %v856_v2 = vpop.f32.mrb[15].mxu1 }
 0x319   : > { %v1051_v35 = vpop.f32.mrb[16].mxu1 }
 0x31a   : > { %v1058_v59 = vadd.f32 %v1051_v35, %v852_v34  ;;  %v1053_v60 = vpop.f32.mrb[17].mxu1 }
 0x31b   : > { %v1059_v61 = vadd.f32 %v1053_v60, %v854_v10  ;;  %v1055_v63 = vpop.f32.mrb[18].mxu1 }
 0x31c   : > { %v1056_v0 = vpop.f32.mrb[19].mxu1 }
 0x321   : > { %v1253_v1 = vpop.f32.mrb[20].mxu1 }
 0x322   : > { %v1260_v3 = vadd.f32 %v1253_v1, %v1058_v59  ;;  %v1255_v9 = vpop.f32.mrb[21].mxu1 }
 0x323   : > { %v1261_v13 = vadd.f32 %v1255_v9, %v1059_v61  ;;  %v1257_v21 = vpop.f32.mrb[22].mxu1 }
 0x324   : > { %v1268_v16 = vadd.f32 %v1266_v11, %v1260_v3  ;;  %v1258_v25 = vpop.f32.mrb[23].mxu1 }
 0x325   : > { %v1269_v31 = vadd.f32 %v1266_v11, %v1261_v13 }
 0x326   : > { %1270 = vst [vmem:[%s329_s18] sm:$0xff] %v1268_v16 }
 0x327   : > { %1271 = vst [vmem:[%s329_s18 + $0x8] sm:$0xff] %v1269_v31 }
 0x328 PF: > { %s16_s23 = sadd.s32 1, %s1569_s23   ;;  %s1932_s21 = smov %s1565_s22 }
 0x329   : > { %p13_p5 = scmp.ge.s32.totalorder %s16_s23, 4   ;;  %s1933_s22 = smov %s1935_s24 }
 0x32b   :  { %15 = sbr.rel (!%p13_p5) target bundleno = 2 (0x2), region = 83 }

</bundles_post_ra>
